<compile_context>
chip_gen: v5e
topology: v5e:2x2
jax: 0.10.0
libtpu: 0.0.40
codegen_flags: <defaults>
</compile_context>

<pallas_src>
import math
import functools

import jax
import jax.numpy as jnp
from jax.experimental import pallas as pl
from jax.experimental.pallas import tpu as pltpu

# ---- mini ViT config (structure of vit_large_patch14_dinov2, small sizes) ----
PATCH = 14
IMG = 28            # 2x2 patch grid
IN_CH = 3
EMBED = 64
DEPTH = 2
HEADS = 4
HEAD_DIM = EMBED // HEADS
MLP = 4 * EMBED
NUM_CLASSES = 26    # len(txt_animalclasses['fr'])
HEAD_PAD = 128      # lane-dense padded head width; cols >= NUM_CLASSES are zero
LS_INIT = 1e-5      # DINOv2 LayerScale init_values
EPS = 1e-6          # timm ViT LayerNorm eps
INV_SQRT2 = 0.7071067811865476
VEC_W = max(3 * EMBED, MLP, HEAD_PAD)   # packed-vector slab width (=256)


# ----------------------------- helpers -----------------------------------------
def _ln(x, g, b):
    # LayerNorm over the last dim, f32 math.
    mu = jnp.mean(x, axis=-1, keepdims=True)
    var = jnp.mean(jnp.square(x - mu), axis=-1, keepdims=True)
    return (x - mu) * jax.lax.rsqrt(var + EPS) * g + b


def _full_spec(a):
    zeros = (0,) * a.ndim
    return pl.BlockSpec(a.shape, lambda i, _z=zeros: _z)


def _vec_layout(S, depth):
    # Row layout of the packed small-vector parameter slab.
    names = ("ln1_g", "ln1_b", "qkv_b", "proj_b", "ls1",
             "ln2_g", "ln2_b", "fc1_b", "fc2_b", "ls2")
    rows = {}
    r = 0
    rows["patch_b"] = r; r += 1
    rows["cls"] = r; r += 1
    rows["pos"] = r; r += S
    rows["norm_g"] = r; r += 1
    rows["norm_b"] = r; r += 1
    rows["head_b"] = r; r += 1
    blocks = []
    for _ in range(depth):
        blk = {}
        for n in names:
            blk[n] = r
            r += 1
        blocks.append(blk)
    rows["blocks"] = blocks
    return rows, r


# ----------------------------- fused ViT kernel --------------------------------
def _vit_kernel(patches_ref, patch_w_ref, vec_ref, qkv_w_ref, proj_w_ref,
                fc1_w_ref, fc2_w_ref, head_w_ref, o_ref,
                *, B, N, S, D, H, Dh, depth, mlp, rows):
    f32 = jnp.float32
    vec = vec_ref[...]                                   # (n_rows, VEC_W), one load

    def row(r, w):                                       # (1, w) slice of the slab
        return vec[r:r + 1, :w]

    # ---- patch-embed matmul + cls token + positional embedding (registers) ----
    emb = jnp.dot(patches_ref[...], patch_w_ref[...],
                  preferred_element_type=f32) + row(rows["patch_b"], D)   # (B*N, D)
    pos = vec[rows["pos"]:rows["pos"] + S, :D]                            # (S, D)
    cls_row = row(rows["cls"], D) + pos[0:1, :]                           # (1, D)
    pos_pat = pos[1:S, :]                                                 # (N, D)
    pieces = []
    for b in range(B):
        pieces.append(cls_row)
        pieces.append(emb[b * N:(b + 1) * N, :] + pos_pat)
    tok = jnp.concatenate(pieces, axis=0)                                 # (B*S, D)

    # ---- compile-time block-diagonal batch mask (no integer div, just splats) --
    mrows = []
    for bi in range(B):
        mrows.append(jnp.concatenate(
            [jnp.full((S, S), 0.0 if bi == bj else -1e30, f32)
             for bj in range(B)], axis=1))
    amask = jnp.concatenate(mrows, axis=0)                                # (B*S, B*S)

    # ---- transformer blocks (static unroll over depth) -------------------------
    for d in range(depth):
        br = rows["blocks"][d]

        # attention branch: LN1 -> QKV -> per-head batched attn -> proj -> LS + res
        xn = _ln(tok, row(br["ln1_g"], D), row(br["ln1_b"], D))
        qkv = jnp.dot(xn, qkv_w_ref[d],
                      preferred_element_type=f32) + row(br["qkv_b"], 3 * D)
        heads = []
        for h in range(H):                        # H small static iterations;
            c = h * Dh                            # batch dim folded into the matmul
            q = qkv[:, c:c + Dh]                  # 1/sqrt(Dh) folded into qkv_w
            k = qkv[:, D + c:D + c + Dh]
            v = qkv[:, 2 * D + c:2 * D + c + Dh]
            s = jax.lax.dot_general(q, k, (((1,), (1,)), ((), ())),
                                    preferred_element_type=f32) + amask   # (B*S,B*S)
            s = s - jnp.max(s, axis=-1, keepdims=True)
            p = jnp.exp(s)
            p = p / jnp.sum(p, axis=-1, keepdims=True)                    # exact div
            heads.append(jnp.dot(p, v, preferred_element_type=f32))       # (B*S, Dh)
        attn = jnp.concatenate(heads, axis=1)                             # (B*S, D)
        proj = jnp.dot(attn, proj_w_ref[d],
                       preferred_element_type=f32) + row(br["proj_b"], D)
        tok = tok + proj * row(br["ls1"], D)                              # LayerScale

        # MLP branch: LN2 -> FC1 + GELU(erf) -> FC2 -> LayerScale -> residual
        yn = _ln(tok, row(br["ln2_g"], D), row(br["ln2_b"], D))
        h1 = jnp.dot(yn, fc1_w_ref[d],
                     preferred_element_type=f32) + row(br["fc1_b"], mlp)
        h1 = 0.5 * h1 * (1.0 + jax.lax.erf(h1 * INV_SQRT2))  # exact GELU (torch)
        h2 = jnp.dot(h1, fc2_w_ref[d],
                     preferred_element_type=f32) + row(br["fc2_b"], D)
        tok = tok + h2 * row(br["ls2"], D)

    # ---- head: final LN on class tokens + classifier matmul, one dense store ---
    cls_tok = jnp.concatenate([tok[b * S:b * S + 1, :] for b in range(B)], axis=0)
    xn = _ln(cls_tok, row(rows["norm_g"], D), row(rows["norm_b"], D))     # (B, D)
    logits = jnp.dot(xn, head_w_ref[...],
                     preferred_element_type=f32) + row(rows["head_b"], HEAD_PAD)
    o_ref[...] = logits.astype(o_ref.dtype)                               # (B, 128)


# ----------------------------- parameters --------------------------------------
def init_params(key):
    keys = jax.random.split(key, 16)
    ki = iter(keys)

    def nrm(shape, std=0.02):
        return (std * jax.random.normal(next(ki), shape)).astype(jnp.float32)

    patch_dim = IN_CH * PATCH * PATCH
    N = (IMG // PATCH) ** 2
    S = N + 1
    scale = 1.0 / math.sqrt(HEAD_DIM)

    rows, n_rows = _vec_layout(S, DEPTH)
    slab = jnp.zeros((n_rows, VEC_W), jnp.float32)

    def put_row(s, r, v):
        return s.at[r, :v.shape[0]].set(v)

    def put_rows(s, r, v):
        return s.at[r:r + v.shape[0], :v.shape[1]].set(v)

    # embed / final-norm / head vectors (zeros rows stay zero)
    slab = put_row(slab, rows["cls"], nrm((EMBED,)))
    slab = put_rows(slab, rows["pos"], nrm((S, EMBED)))
    slab = put_row(slab, rows["norm_g"], jnp.ones((EMBED,), jnp.float32))

    qkv_ws, proj_ws, fc1_ws, fc2_ws = [], [], [], []
    for d in range(DEPTH):
        br = rows["blocks"][d]
        slab = put_row(slab, br["ln1_g"], jnp.ones((EMBED,), jnp.float32))
        slab = put_row(slab, br["ln2_g"], jnp.ones((EMBED,), jnp.float32))
        slab = put_row(slab, br["ls1"], jnp.full((EMBED,), LS_INIT, jnp.float32))
        slab = put_row(slab, br["ls2"], jnp.full((EMBED,), LS_INIT, jnp.float32))
        # ln*_b / qkv_b / proj_b / fc*_b are zero-initialized rows.
        qkv_w = nrm((EMBED, 3 * EMBED))
        # fold attention 1/sqrt(head_dim) into Q columns (q bias is zero here).
        qkv_w = qkv_w.at[:, :EMBED].multiply(scale)
        qkv_ws.append(qkv_w)
        proj_ws.append(nrm((EMBED, EMBED)))
        fc1_ws.append(nrm((EMBED, MLP)))
        fc2_ws.append(nrm((MLP, EMBED)))

    # classifier head stored lane-dense-padded (cols >= NUM_CLASSES are zero).
    head_w = jnp.zeros((EMBED, HEAD_PAD), jnp.float32).at[:, :NUM_CLASSES].set(
        nrm((EMBED, NUM_CLASSES)))

    return {
        "patch_w": nrm((patch_dim, EMBED)),
        "vec": slab,
        "qkv_w": jnp.stack(qkv_ws),     # (DEPTH, D, 3D)
        "proj_w": jnp.stack(proj_ws),   # (DEPTH, D, D)
        "fc1_w": jnp.stack(fc1_ws),     # (DEPTH, D, MLP)
        "fc2_w": jnp.stack(fc2_ws),     # (DEPTH, MLP, D)
        "head_w": head_w,               # (D, HEAD_PAD)
    }


# ----------------------------- forward pass ------------------------------------
def vit_forward(params, x):
    # x: [B, C, H, W] (NCHW) — Model.forward returns raw logits (no softmax).
    B, C, Hh, Ww = x.shape
    gh, gw = Hh // PATCH, Ww // PATCH
    N = gh * gw
    S = N + 1
    rows, _ = _vec_layout(S, DEPTH)

    # patch-embed conv(k=14, s=14) == patchify + matmul; flatten order (C, ph, pw)
    # matches the flattened PyTorch conv weight [D, C, p, p].
    # TODO(synk): this patchify transpose stays as one XLA op in the wrapper; at
    # real ViT-L scale fold it into the kernel via an element-indexed BlockSpec.
    patches = x.reshape(B, C, gh, PATCH, gw, PATCH)
    patches = patches.transpose(0, 2, 4, 1, 3, 5).reshape(B * N, C * PATCH * PATCH)

    kern = functools.partial(
        _vit_kernel, B=B, N=N, S=S, D=EMBED, H=HEADS, Dh=HEAD_DIM,
        depth=DEPTH, mlp=MLP, rows=rows)
    args = (patches, params["patch_w"], params["vec"], params["qkv_w"],
            params["proj_w"], params["fc1_w"], params["fc2_w"], params["head_w"])

    logits_pad = pl.pallas_call(
        kern,
        out_shape=jax.ShapeDtypeStruct((B, HEAD_PAD), x.dtype),
        grid=(1,),
        in_specs=[_full_spec(a) for a in args],
        out_specs=pl.BlockSpec((B, HEAD_PAD), lambda i: (0, 0)),
        compiler_params=pltpu.CompilerParams(dimension_semantics=("arbitrary",)),
    )(*args)
    return logits_pad[:, :NUM_CLASSES]  # [B, NUM_CLASSES]


# TODO(synk): checkpoint loading (loadWeights) and the pretrained ViT-Large/14
# DINOv2 weights have no in-script equivalent; parameters are synthetic and the
# architecture is scaled down (EMBED=64, DEPTH=2) while keeping identical math.

if __name__ == "__main__":
    key = jax.random.PRNGKey(0)
    pkey, xkey = jax.random.split(key)
    params = init_params(pkey)
    x = jax.random.normal(xkey, (2, IN_CH, IMG, IMG), dtype=jnp.float32)

    logits = jax.jit(vit_forward)(params, x)
    jax.block_until_ready(logits)
    assert logits.shape == (2, NUM_CLASSES) and logits.dtype == jnp.float32
    assert bool(jnp.all(jnp.isfinite(logits)))
    print("KERNEL_OK")
</pallas_src>

<mosaic_0001>
module attributes {stable_mosaic.version = 11 : i64} {
  func.func @_vit_kernel(%arg0: i32, %arg1: memref<8x588xf32, #tpu.memory_space<vmem>>, %arg2: memref<588x64xf32, #tpu.memory_space<vmem>>, %arg3: memref<30x256xf32, #tpu.memory_space<vmem>>, %arg4: memref<2x64x192xf32, #tpu.memory_space<vmem>>, %arg5: memref<2x64x64xf32, #tpu.memory_space<vmem>>, %arg6: memref<2x64x256xf32, #tpu.memory_space<vmem>>, %arg7: memref<2x256x64xf32, #tpu.memory_space<vmem>>, %arg8: memref<64x128xf32, #tpu.memory_space<vmem>>, %arg9: memref<2x128xf32, #tpu.memory_space<vmem>>) attributes {dimension_semantics = [#tpu.dimension_semantics<arbitrary>], iteration_bounds = array<i64: 1>, scalar_prefetch = 0 : i64, scratch_operands = 0 : i64, tpu.core_type = #tpu.core_type<tc>, window_params = [{pipeline_mode = #tpu.pipeline_mode<synchronous>, transform_indices = @transform_0, window_bounds = array<i64: 8, 588>}, {pipeline_mode = #tpu.pipeline_mode<synchronous>, transform_indices = @transform_1, window_bounds = array<i64: 588, 64>}, {pipeline_mode = #tpu.pipeline_mode<synchronous>, transform_indices = @transform_2, window_bounds = array<i64: 30, 256>}, {pipeline_mode = #tpu.pipeline_mode<synchronous>, transform_indices = @transform_3, window_bounds = array<i64: 2, 64, 192>}, {pipeline_mode = #tpu.pipeline_mode<synchronous>, transform_indices = @transform_4, window_bounds = array<i64: 2, 64, 64>}, {pipeline_mode = #tpu.pipeline_mode<synchronous>, transform_indices = @transform_5, window_bounds = array<i64: 2, 64, 256>}, {pipeline_mode = #tpu.pipeline_mode<synchronous>, transform_indices = @transform_6, window_bounds = array<i64: 2, 256, 64>}, {pipeline_mode = #tpu.pipeline_mode<synchronous>, transform_indices = @transform_7, window_bounds = array<i64: 64, 128>}, {pipeline_mode = #tpu.pipeline_mode<synchronous>, transform_indices = @transform_8, window_bounds = array<i64: 2, 128>}]} {
    %c0 = arith.constant 0 : index
    %c0_0 = arith.constant 0 : index
    %0 = vector.load %arg3[%c0, %c0_0] : memref<30x256xf32, #tpu.memory_space<vmem>>, vector<30x256xf32>
    %c0_1 = arith.constant 0 : index
    %c0_2 = arith.constant 0 : index
    %1 = vector.load %arg1[%c0_1, %c0_2] : memref<8x588xf32, #tpu.memory_space<vmem>>, vector<8x588xf32>
    %c0_3 = arith.constant 0 : index
    %c0_4 = arith.constant 0 : index
    %2 = vector.load %arg2[%c0_3, %c0_4] : memref<588x64xf32, #tpu.memory_space<vmem>>, vector<588x64xf32>
    %cst = arith.constant dense<0.000000e+00> : vector<8x64xf32>
    %3 = tpu.matmul %1, %2, %cst {dimension_numbers = #tpu.dot_dimension_numbers<[1], [0], [0], [1], [0, 0, 1, 1], [], []>} : vector<8x588xf32>, vector<588x64xf32>, vector<8x64xf32> -> vector<8x64xf32>
    %4 = vector.extract_strided_slice %0 {offsets = [0, 0], sizes = [1, 64], strides = [1, 1]} : vector<30x256xf32> to vector<1x64xf32>
    %5 = vector.broadcast %4 : vector<1x64xf32> to vector<8x64xf32>
    %6 = arith.addf %3, %5 : vector<8x64xf32>
    %7 = vector.extract_strided_slice %0 {offsets = [2, 0], sizes = [5, 64], strides = [1, 1]} : vector<30x256xf32> to vector<5x64xf32>
    %8 = vector.extract_strided_slice %0 {offsets = [1, 0], sizes = [1, 64], strides = [1, 1]} : vector<30x256xf32> to vector<1x64xf32>
    %9 = vector.extract_strided_slice %7 {offsets = [0, 0], sizes = [1, 64], strides = [1, 1]} : vector<5x64xf32> to vector<1x64xf32>
    %10 = arith.addf %8, %9 : vector<1x64xf32>
    %11 = vector.extract_strided_slice %7 {offsets = [1, 0], sizes = [4, 64], strides = [1, 1]} : vector<5x64xf32> to vector<4x64xf32>
    %12 = vector.extract_strided_slice %6 {offsets = [0, 0], sizes = [4, 64], strides = [1, 1]} : vector<8x64xf32> to vector<4x64xf32>
    %13 = arith.addf %12, %11 : vector<4x64xf32>
    %14 = vector.extract_strided_slice %6 {offsets = [4, 0], sizes = [4, 64], strides = [1, 1]} : vector<8x64xf32> to vector<4x64xf32>
    %15 = arith.addf %14, %11 : vector<4x64xf32>
    %16 = tpu.concatenate %10, %13, %10, %15 in 0 : vector<1x64xf32>, vector<4x64xf32>, vector<1x64xf32>, vector<4x64xf32> -> vector<10x64xf32>
    %cst_5 = arith.constant 0.000000e+00 : f32
    %17 = vector.broadcast %cst_5 : f32 to vector<5x5xf32>
    %cst_6 = arith.constant -1.000000e+30 : f32
    %18 = vector.broadcast %cst_6 : f32 to vector<5x5xf32>
    %19 = tpu.concatenate %17, %18 in 1 : vector<5x5xf32>, vector<5x5xf32> -> vector<5x10xf32>
    %cst_7 = arith.constant -1.000000e+30 : f32
    %20 = vector.broadcast %cst_7 : f32 to vector<5x5xf32>
    %cst_8 = arith.constant 0.000000e+00 : f32
    %21 = vector.broadcast %cst_8 : f32 to vector<5x5xf32>
    %22 = tpu.concatenate %20, %21 in 1 : vector<5x5xf32>, vector<5x5xf32> -> vector<5x10xf32>
    %23 = tpu.concatenate %19, %22 in 0 : vector<5x10xf32>, vector<5x10xf32> -> vector<10x10xf32>
    %24 = vector.extract_strided_slice %0 {offsets = [10, 0], sizes = [1, 64], strides = [1, 1]} : vector<30x256xf32> to vector<1x64xf32>
    %25 = vector.extract_strided_slice %0 {offsets = [11, 0], sizes = [1, 64], strides = [1, 1]} : vector<30x256xf32> to vector<1x64xf32>
    %cst_9 = arith.constant dense<0.000000e+00> : vector<10xf32>
    %26 = vector.multi_reduction <add>, %16, %cst_9 [1] : vector<10x64xf32> to vector<10xf32>
    %27 = vector.shape_cast %26 : vector<10xf32> to vector<10x1xf32>
    %cst_10 = arith.constant 6.400000e+01 : f32
    %28 = vector.broadcast %cst_10 : f32 to vector<10x1xf32>
    %29 = arith.divf %27, %28 : vector<10x1xf32>
    %30 = vector.broadcast %29 : vector<10x1xf32> to vector<10x64xf32>
    %31 = arith.subf %16, %30 : vector<10x64xf32>
    %32 = arith.mulf %31, %31 : vector<10x64xf32>
    %cst_11 = arith.constant dense<0.000000e+00> : vector<10xf32>
    %33 = vector.multi_reduction <add>, %32, %cst_11 [1] : vector<10x64xf32> to vector<10xf32>
    %34 = vector.shape_cast %33 : vector<10xf32> to vector<10x1xf32>
    %cst_12 = arith.constant 6.400000e+01 : f32
    %35 = vector.broadcast %cst_12 : f32 to vector<10x1xf32>
    %36 = arith.divf %34, %35 : vector<10x1xf32>
    %37 = vector.broadcast %29 : vector<10x1xf32> to vector<10x64xf32>
    %38 = arith.subf %16, %37 : vector<10x64xf32>
    %cst_13 = arith.constant 9.99999997E-7 : f32
    %39 = vector.broadcast %cst_13 : f32 to vector<10x1xf32>
    %40 = arith.addf %36, %39 : vector<10x1xf32>
    %41 = math.rsqrt %40 : vector<10x1xf32>
    %42 = vector.broadcast %41 : vector<10x1xf32> to vector<10x64xf32>
    %43 = arith.mulf %38, %42 : vector<10x64xf32>
    %44 = vector.broadcast %24 : vector<1x64xf32> to vector<10x64xf32>
    %45 = arith.mulf %43, %44 : vector<10x64xf32>
    %46 = vector.broadcast %25 : vector<1x64xf32> to vector<10x64xf32>
    %47 = arith.addf %45, %46 : vector<10x64xf32>
    %c0_14 = arith.constant 0 : index
    %c0_15 = arith.constant 0 : index
    %c0_16 = arith.constant 0 : index
    %48 = vector.load %arg4[%c0_14, %c0_15, %c0_16] : memref<2x64x192xf32, #tpu.memory_space<vmem>>, vector<1x64x192xf32>
    %49 = vector.shape_cast %48 : vector<1x64x192xf32> to vector<64x192xf32>
    %cst_17 = arith.constant dense<0.000000e+00> : vector<10x192xf32>
    %50 = tpu.matmul %47, %49, %cst_17 {dimension_numbers = #tpu.dot_dimension_numbers<[1], [0], [0], [1], [0, 0, 1, 1], [], []>} : vector<10x64xf32>, vector<64x192xf32>, vector<10x192xf32> -> vector<10x192xf32>
    %51 = vector.extract_strided_slice %0 {offsets = [12, 0], sizes = [1, 192], strides = [1, 1]} : vector<30x256xf32> to vector<1x192xf32>
    %52 = vector.broadcast %51 : vector<1x192xf32> to vector<10x192xf32>
    %53 = arith.addf %50, %52 : vector<10x192xf32>
    %54 = vector.extract_strided_slice %53 {offsets = [0, 0], sizes = [10, 16], strides = [1, 1]} : vector<10x192xf32> to vector<10x16xf32>
    %55 = vector.extract_strided_slice %53 {offsets = [0, 64], sizes = [10, 16], strides = [1, 1]} : vector<10x192xf32> to vector<10x16xf32>
    %56 = vector.extract_strided_slice %53 {offsets = [0, 128], sizes = [10, 16], strides = [1, 1]} : vector<10x192xf32> to vector<10x16xf32>
    %cst_18 = arith.constant dense<0.000000e+00> : vector<10x10xf32>
    %57 = tpu.matmul %54, %55, %cst_18 {dimension_numbers = #tpu.dot_dimension_numbers<[1], [1], [0], [0], [0, 0, 1, 0], [], []>} : vector<10x16xf32>, vector<10x16xf32>, vector<10x10xf32> -> vector<10x10xf32>
    %58 = arith.addf %57, %23 : vector<10x10xf32>
    %cst_19 = arith.constant dense<0xFF800000> : vector<10xf32>
    %59 = vector.multi_reduction <maximumf>, %58, %cst_19 [1] : vector<10x10xf32> to vector<10xf32>
    %60 = vector.shape_cast %59 : vector<10xf32> to vector<10x1xf32>
    %61 = vector.broadcast %60 : vector<10x1xf32> to vector<10x10xf32>
    %62 = arith.subf %58, %61 : vector<10x10xf32>
    %63 = math.exp %62 : vector<10x10xf32>
    %cst_20 = arith.constant dense<0.000000e+00> : vector<10xf32>
    %64 = vector.multi_reduction <add>, %63, %cst_20 [1] : vector<10x10xf32> to vector<10xf32>
    %65 = vector.shape_cast %64 : vector<10xf32> to vector<10x1xf32>
    %66 = vector.broadcast %65 : vector<10x1xf32> to vector<10x10xf32>
    %67 = arith.divf %63, %66 : vector<10x10xf32>
    %cst_21 = arith.constant dense<0.000000e+00> : vector<10x16xf32>
    %68 = tpu.matmul %67, %56, %cst_21 {dimension_numbers = #tpu.dot_dimension_numbers<[1], [0], [0], [1], [0, 0, 1, 1], [], []>} : vector<10x10xf32>, vector<10x16xf32>, vector<10x16xf32> -> vector<10x16xf32>
    %69 = vector.extract_strided_slice %53 {offsets = [0, 16], sizes = [10, 16], strides = [1, 1]} : vector<10x192xf32> to vector<10x16xf32>
    %70 = vector.extract_strided_slice %53 {offsets = [0, 80], sizes = [10, 16], strides = [1, 1]} : vector<10x192xf32> to vector<10x16xf32>
    %71 = vector.extract_strided_slice %53 {offsets = [0, 144], sizes = [10, 16], strides = [1, 1]} : vector<10x192xf32> to vector<10x16xf32>
    %cst_22 = arith.constant dense<0.000000e+00> : vector<10x10xf32>
    %72 = tpu.matmul %69, %70, %cst_22 {dimension_numbers = #tpu.dot_dimension_numbers<[1], [1], [0], [0], [0, 0, 1, 0], [], []>} : vector<10x16xf32>, vector<10x16xf32>, vector<10x10xf32> -> vector<10x10xf32>
    %73 = arith.addf %72, %23 : vector<10x10xf32>
    %cst_23 = arith.constant dense<0xFF800000> : vector<10xf32>
    %74 = vector.multi_reduction <maximumf>, %73, %cst_23 [1] : vector<10x10xf32> to vector<10xf32>
    %75 = vector.shape_cast %74 : vector<10xf32> to vector<10x1xf32>
    %76 = vector.broadcast %75 : vector<10x1xf32> to vector<10x10xf32>
    %77 = arith.subf %73, %76 : vector<10x10xf32>
    %78 = math.exp %77 : vector<10x10xf32>
    %cst_24 = arith.constant dense<0.000000e+00> : vector<10xf32>
    %79 = vector.multi_reduction <add>, %78, %cst_24 [1] : vector<10x10xf32> to vector<10xf32>
    %80 = vector.shape_cast %79 : vector<10xf32> to vector<10x1xf32>
    %81 = vector.broadcast %80 : vector<10x1xf32> to vector<10x10xf32>
    %82 = arith.divf %78, %81 : vector<10x10xf32>
    %cst_25 = arith.constant dense<0.000000e+00> : vector<10x16xf32>
    %83 = tpu.matmul %82, %71, %cst_25 {dimension_numbers = #tpu.dot_dimension_numbers<[1], [0], [0], [1], [0, 0, 1, 1], [], []>} : vector<10x10xf32>, vector<10x16xf32>, vector<10x16xf32> -> vector<10x16xf32>
    %84 = vector.extract_strided_slice %53 {offsets = [0, 32], sizes = [10, 16], strides = [1, 1]} : vector<10x192xf32> to vector<10x16xf32>
    %85 = vector.extract_strided_slice %53 {offsets = [0, 96], sizes = [10, 16], strides = [1, 1]} : vector<10x192xf32> to vector<10x16xf32>
    %86 = vector.extract_strided_slice %53 {offsets = [0, 160], sizes = [10, 16], strides = [1, 1]} : vector<10x192xf32> to vector<10x16xf32>
    %cst_26 = arith.constant dense<0.000000e+00> : vector<10x10xf32>
    %87 = tpu.matmul %84, %85, %cst_26 {dimension_numbers = #tpu.dot_dimension_numbers<[1], [1], [0], [0], [0, 0, 1, 0], [], []>} : vector<10x16xf32>, vector<10x16xf32>, vector<10x10xf32> -> vector<10x10xf32>
    %88 = arith.addf %87, %23 : vector<10x10xf32>
    %cst_27 = arith.constant dense<0xFF800000> : vector<10xf32>
    %89 = vector.multi_reduction <maximumf>, %88, %cst_27 [1] : vector<10x10xf32> to vector<10xf32>
    %90 = vector.shape_cast %89 : vector<10xf32> to vector<10x1xf32>
    %91 = vector.broadcast %90 : vector<10x1xf32> to vector<10x10xf32>
    %92 = arith.subf %88, %91 : vector<10x10xf32>
    %93 = math.exp %92 : vector<10x10xf32>
    %cst_28 = arith.constant dense<0.000000e+00> : vector<10xf32>
    %94 = vector.multi_reduction <add>, %93, %cst_28 [1] : vector<10x10xf32> to vector<10xf32>
    %95 = vector.shape_cast %94 : vector<10xf32> to vector<10x1xf32>
    %96 = vector.broadcast %95 : vector<10x1xf32> to vector<10x10xf32>
    %97 = arith.divf %93, %96 : vector<10x10xf32>
    %cst_29 = arith.constant dense<0.000000e+00> : vector<10x16xf32>
    %98 = tpu.matmul %97, %86, %cst_29 {dimension_numbers = #tpu.dot_dimension_numbers<[1], [0], [0], [1], [0, 0, 1, 1], [], []>} : vector<10x10xf32>, vector<10x16xf32>, vector<10x16xf32> -> vector<10x16xf32>
    %99 = vector.extract_strided_slice %53 {offsets = [0, 48], sizes = [10, 16], strides = [1, 1]} : vector<10x192xf32> to vector<10x16xf32>
    %100 = vector.extract_strided_slice %53 {offsets = [0, 112], sizes = [10, 16], strides = [1, 1]} : vector<10x192xf32> to vector<10x16xf32>
    %101 = vector.extract_strided_slice %53 {offsets = [0, 176], sizes = [10, 16], strides = [1, 1]} : vector<10x192xf32> to vector<10x16xf32>
    %cst_30 = arith.constant dense<0.000000e+00> : vector<10x10xf32>
    %102 = tpu.matmul %99, %100, %cst_30 {dimension_numbers = #tpu.dot_dimension_numbers<[1], [1], [0], [0], [0, 0, 1, 0], [], []>} : vector<10x16xf32>, vector<10x16xf32>, vector<10x10xf32> -> vector<10x10xf32>
    %103 = arith.addf %102, %23 : vector<10x10xf32>
    %cst_31 = arith.constant dense<0xFF800000> : vector<10xf32>
    %104 = vector.multi_reduction <maximumf>, %103, %cst_31 [1] : vector<10x10xf32> to vector<10xf32>
    %105 = vector.shape_cast %104 : vector<10xf32> to vector<10x1xf32>
    %106 = vector.broadcast %105 : vector<10x1xf32> to vector<10x10xf32>
    %107 = arith.subf %103, %106 : vector<10x10xf32>
    %108 = math.exp %107 : vector<10x10xf32>
    %cst_32 = arith.constant dense<0.000000e+00> : vector<10xf32>
    %109 = vector.multi_reduction <add>, %108, %cst_32 [1] : vector<10x10xf32> to vector<10xf32>
    %110 = vector.shape_cast %109 : vector<10xf32> to vector<10x1xf32>
    %111 = vector.broadcast %110 : vector<10x1xf32> to vector<10x10xf32>
    %112 = arith.divf %108, %111 : vector<10x10xf32>
    %cst_33 = arith.constant dense<0.000000e+00> : vector<10x16xf32>
    %113 = tpu.matmul %112, %101, %cst_33 {dimension_numbers = #tpu.dot_dimension_numbers<[1], [0], [0], [1], [0, 0, 1, 1], [], []>} : vector<10x10xf32>, vector<10x16xf32>, vector<10x16xf32> -> vector<10x16xf32>
    %114 = tpu.concatenate %68, %83, %98, %113 in 1 : vector<10x16xf32>, vector<10x16xf32>, vector<10x16xf32>, vector<10x16xf32> -> vector<10x64xf32>
    %c0_34 = arith.constant 0 : index
    %c0_35 = arith.constant 0 : index
    %c0_36 = arith.constant 0 : index
    %115 = vector.load %arg5[%c0_34, %c0_35, %c0_36] : memref<2x64x64xf32, #tpu.memory_space<vmem>>, vector<1x64x64xf32>
    %116 = vector.shape_cast %115 : vector<1x64x64xf32> to vector<64x64xf32>
    %cst_37 = arith.constant dense<0.000000e+00> : vector<10x64xf32>
    %117 = tpu.matmul %114, %116, %cst_37 {dimension_numbers = #tpu.dot_dimension_numbers<[1], [0], [0], [1], [0, 0, 1, 1], [], []>} : vector<10x64xf32>, vector<64x64xf32>, vector<10x64xf32> -> vector<10x64xf32>
    %118 = vector.extract_strided_slice %0 {offsets = [13, 0], sizes = [1, 64], strides = [1, 1]} : vector<30x256xf32> to vector<1x64xf32>
    %119 = vector.broadcast %118 : vector<1x64xf32> to vector<10x64xf32>
    %120 = arith.addf %117, %119 : vector<10x64xf32>
    %121 = vector.extract_strided_slice %0 {offsets = [14, 0], sizes = [1, 64], strides = [1, 1]} : vector<30x256xf32> to vector<1x64xf32>
    %122 = vector.broadcast %121 : vector<1x64xf32> to vector<10x64xf32>
    %123 = arith.mulf %120, %122 : vector<10x64xf32>
    %124 = arith.addf %16, %123 : vector<10x64xf32>
    %125 = vector.extract_strided_slice %0 {offsets = [15, 0], sizes = [1, 64], strides = [1, 1]} : vector<30x256xf32> to vector<1x64xf32>
    %126 = vector.extract_strided_slice %0 {offsets = [16, 0], sizes = [1, 64], strides = [1, 1]} : vector<30x256xf32> to vector<1x64xf32>
    %cst_38 = arith.constant dense<0.000000e+00> : vector<10xf32>
    %127 = vector.multi_reduction <add>, %124, %cst_38 [1] : vector<10x64xf32> to vector<10xf32>
    %128 = vector.shape_cast %127 : vector<10xf32> to vector<10x1xf32>
    %cst_39 = arith.constant 6.400000e+01 : f32
    %129 = vector.broadcast %cst_39 : f32 to vector<10x1xf32>
    %130 = arith.divf %128, %129 : vector<10x1xf32>
    %131 = vector.broadcast %130 : vector<10x1xf32> to vector<10x64xf32>
    %132 = arith.subf %124, %131 : vector<10x64xf32>
    %133 = arith.mulf %132, %132 : vector<10x64xf32>
    %cst_40 = arith.constant dense<0.000000e+00> : vector<10xf32>
    %134 = vector.multi_reduction <add>, %133, %cst_40 [1] : vector<10x64xf32> to vector<10xf32>
    %135 = vector.shape_cast %134 : vector<10xf32> to vector<10x1xf32>
    %cst_41 = arith.constant 6.400000e+01 : f32
    %136 = vector.broadcast %cst_41 : f32 to vector<10x1xf32>
    %137 = arith.divf %135, %136 : vector<10x1xf32>
    %138 = vector.broadcast %130 : vector<10x1xf32> to vector<10x64xf32>
    %139 = arith.subf %124, %138 : vector<10x64xf32>
    %cst_42 = arith.constant 9.99999997E-7 : f32
    %140 = vector.broadcast %cst_42 : f32 to vector<10x1xf32>
    %141 = arith.addf %137, %140 : vector<10x1xf32>
    %142 = math.rsqrt %141 : vector<10x1xf32>
    %143 = vector.broadcast %142 : vector<10x1xf32> to vector<10x64xf32>
    %144 = arith.mulf %139, %143 : vector<10x64xf32>
    %145 = vector.broadcast %125 : vector<1x64xf32> to vector<10x64xf32>
    %146 = arith.mulf %144, %145 : vector<10x64xf32>
    %147 = vector.broadcast %126 : vector<1x64xf32> to vector<10x64xf32>
    %148 = arith.addf %146, %147 : vector<10x64xf32>
    %c0_43 = arith.constant 0 : index
    %c0_44 = arith.constant 0 : index
    %c0_45 = arith.constant 0 : index
    %149 = vector.load %arg6[%c0_43, %c0_44, %c0_45] : memref<2x64x256xf32, #tpu.memory_space<vmem>>, vector<1x64x256xf32>
    %150 = vector.shape_cast %149 : vector<1x64x256xf32> to vector<64x256xf32>
    %cst_46 = arith.constant dense<0.000000e+00> : vector<10x256xf32>
    %151 = tpu.matmul %148, %150, %cst_46 {dimension_numbers = #tpu.dot_dimension_numbers<[1], [0], [0], [1], [0, 0, 1, 1], [], []>} : vector<10x64xf32>, vector<64x256xf32>, vector<10x256xf32> -> vector<10x256xf32>
    %152 = vector.extract_strided_slice %0 {offsets = [17, 0], sizes = [1, 256], strides = [1, 1]} : vector<30x256xf32> to vector<1x256xf32>
    %153 = vector.broadcast %152 : vector<1x256xf32> to vector<10x256xf32>
    %154 = arith.addf %151, %153 : vector<10x256xf32>
    %cst_47 = arith.constant 5.000000e-01 : f32
    %155 = vector.broadcast %cst_47 : f32 to vector<10x256xf32>
    %156 = arith.mulf %155, %154 : vector<10x256xf32>
    %cst_48 = arith.constant 0.707106769 : f32
    %157 = vector.broadcast %cst_48 : f32 to vector<10x256xf32>
    %158 = arith.mulf %154, %157 : vector<10x256xf32>
    %159 = math.erf %158 : vector<10x256xf32>
    %cst_49 = arith.constant 1.000000e+00 : f32
    %160 = vector.broadcast %cst_49 : f32 to vector<10x256xf32>
    %161 = arith.addf %160, %159 : vector<10x256xf32>
    %162 = arith.mulf %156, %161 : vector<10x256xf32>
    %c0_50 = arith.constant 0 : index
    %c0_51 = arith.constant 0 : index
    %c0_52 = arith.constant 0 : index
    %163 = vector.load %arg7[%c0_50, %c0_51, %c0_52] : memref<2x256x64xf32, #tpu.memory_space<vmem>>, vector<1x256x64xf32>
    %164 = vector.shape_cast %163 : vector<1x256x64xf32> to vector<256x64xf32>
    %cst_53 = arith.constant dense<0.000000e+00> : vector<10x64xf32>
    %165 = tpu.matmul %162, %164, %cst_53 {dimension_numbers = #tpu.dot_dimension_numbers<[1], [0], [0], [1], [0, 0, 1, 1], [], []>} : vector<10x256xf32>, vector<256x64xf32>, vector<10x64xf32> -> vector<10x64xf32>
    %166 = vector.extract_strided_slice %0 {offsets = [18, 0], sizes = [1, 64], strides = [1, 1]} : vector<30x256xf32> to vector<1x64xf32>
    %167 = vector.broadcast %166 : vector<1x64xf32> to vector<10x64xf32>
    %168 = arith.addf %165, %167 : vector<10x64xf32>
    %169 = vector.extract_strided_slice %0 {offsets = [19, 0], sizes = [1, 64], strides = [1, 1]} : vector<30x256xf32> to vector<1x64xf32>
    %170 = vector.broadcast %169 : vector<1x64xf32> to vector<10x64xf32>
    %171 = arith.mulf %168, %170 : vector<10x64xf32>
    %172 = arith.addf %124, %171 : vector<10x64xf32>
    %173 = vector.extract_strided_slice %0 {offsets = [20, 0], sizes = [1, 64], strides = [1, 1]} : vector<30x256xf32> to vector<1x64xf32>
    %174 = vector.extract_strided_slice %0 {offsets = [21, 0], sizes = [1, 64], strides = [1, 1]} : vector<30x256xf32> to vector<1x64xf32>
    %cst_54 = arith.constant dense<0.000000e+00> : vector<10xf32>
    %175 = vector.multi_reduction <add>, %172, %cst_54 [1] : vector<10x64xf32> to vector<10xf32>
    %176 = vector.shape_cast %175 : vector<10xf32> to vector<10x1xf32>
    %cst_55 = arith.constant 6.400000e+01 : f32
    %177 = vector.broadcast %cst_55 : f32 to vector<10x1xf32>
    %178 = arith.divf %176, %177 : vector<10x1xf32>
    %179 = vector.broadcast %178 : vector<10x1xf32> to vector<10x64xf32>
    %180 = arith.subf %172, %179 : vector<10x64xf32>
    %181 = arith.mulf %180, %180 : vector<10x64xf32>
    %cst_56 = arith.constant dense<0.000000e+00> : vector<10xf32>
    %182 = vector.multi_reduction <add>, %181, %cst_56 [1] : vector<10x64xf32> to vector<10xf32>
    %183 = vector.shape_cast %182 : vector<10xf32> to vector<10x1xf32>
    %cst_57 = arith.constant 6.400000e+01 : f32
    %184 = vector.broadcast %cst_57 : f32 to vector<10x1xf32>
    %185 = arith.divf %183, %184 : vector<10x1xf32>
    %186 = vector.broadcast %178 : vector<10x1xf32> to vector<10x64xf32>
    %187 = arith.subf %172, %186 : vector<10x64xf32>
    %cst_58 = arith.constant 9.99999997E-7 : f32
    %188 = vector.broadcast %cst_58 : f32 to vector<10x1xf32>
    %189 = arith.addf %185, %188 : vector<10x1xf32>
    %190 = math.rsqrt %189 : vector<10x1xf32>
    %191 = vector.broadcast %190 : vector<10x1xf32> to vector<10x64xf32>
    %192 = arith.mulf %187, %191 : vector<10x64xf32>
    %193 = vector.broadcast %173 : vector<1x64xf32> to vector<10x64xf32>
    %194 = arith.mulf %192, %193 : vector<10x64xf32>
    %195 = vector.broadcast %174 : vector<1x64xf32> to vector<10x64xf32>
    %196 = arith.addf %194, %195 : vector<10x64xf32>
    %c1 = arith.constant 1 : index
    %c0_59 = arith.constant 0 : index
    %c0_60 = arith.constant 0 : index
    %197 = vector.load %arg4[%c1, %c0_59, %c0_60] : memref<2x64x192xf32, #tpu.memory_space<vmem>>, vector<1x64x192xf32>
    %198 = vector.shape_cast %197 : vector<1x64x192xf32> to vector<64x192xf32>
    %cst_61 = arith.constant dense<0.000000e+00> : vector<10x192xf32>
    %199 = tpu.matmul %196, %198, %cst_61 {dimension_numbers = #tpu.dot_dimension_numbers<[1], [0], [0], [1], [0, 0, 1, 1], [], []>} : vector<10x64xf32>, vector<64x192xf32>, vector<10x192xf32> -> vector<10x192xf32>
    %200 = vector.extract_strided_slice %0 {offsets = [22, 0], sizes = [1, 192], strides = [1, 1]} : vector<30x256xf32> to vector<1x192xf32>
    %201 = vector.broadcast %200 : vector<1x192xf32> to vector<10x192xf32>
    %202 = arith.addf %199, %201 : vector<10x192xf32>
    %203 = vector.extract_strided_slice %202 {offsets = [0, 0], sizes = [10, 16], strides = [1, 1]} : vector<10x192xf32> to vector<10x16xf32>
    %204 = vector.extract_strided_slice %202 {offsets = [0, 64], sizes = [10, 16], strides = [1, 1]} : vector<10x192xf32> to vector<10x16xf32>
    %205 = vector.extract_strided_slice %202 {offsets = [0, 128], sizes = [10, 16], strides = [1, 1]} : vector<10x192xf32> to vector<10x16xf32>
    %cst_62 = arith.constant dense<0.000000e+00> : vector<10x10xf32>
    %206 = tpu.matmul %203, %204, %cst_62 {dimension_numbers = #tpu.dot_dimension_numbers<[1], [1], [0], [0], [0, 0, 1, 0], [], []>} : vector<10x16xf32>, vector<10x16xf32>, vector<10x10xf32> -> vector<10x10xf32>
    %207 = arith.addf %206, %23 : vector<10x10xf32>
    %cst_63 = arith.constant dense<0xFF800000> : vector<10xf32>
    %208 = vector.multi_reduction <maximumf>, %207, %cst_63 [1] : vector<10x10xf32> to vector<10xf32>
    %209 = vector.shape_cast %208 : vector<10xf32> to vector<10x1xf32>
    %210 = vector.broadcast %209 : vector<10x1xf32> to vector<10x10xf32>
    %211 = arith.subf %207, %210 : vector<10x10xf32>
    %212 = math.exp %211 : vector<10x10xf32>
    %cst_64 = arith.constant dense<0.000000e+00> : vector<10xf32>
    %213 = vector.multi_reduction <add>, %212, %cst_64 [1] : vector<10x10xf32> to vector<10xf32>
    %214 = vector.shape_cast %213 : vector<10xf32> to vector<10x1xf32>
    %215 = vector.broadcast %214 : vector<10x1xf32> to vector<10x10xf32>
    %216 = arith.divf %212, %215 : vector<10x10xf32>
    %cst_65 = arith.constant dense<0.000000e+00> : vector<10x16xf32>
    %217 = tpu.matmul %216, %205, %cst_65 {dimension_numbers = #tpu.dot_dimension_numbers<[1], [0], [0], [1], [0, 0, 1, 1], [], []>} : vector<10x10xf32>, vector<10x16xf32>, vector<10x16xf32> -> vector<10x16xf32>
    %218 = vector.extract_strided_slice %202 {offsets = [0, 16], sizes = [10, 16], strides = [1, 1]} : vector<10x192xf32> to vector<10x16xf32>
    %219 = vector.extract_strided_slice %202 {offsets = [0, 80], sizes = [10, 16], strides = [1, 1]} : vector<10x192xf32> to vector<10x16xf32>
    %220 = vector.extract_strided_slice %202 {offsets = [0, 144], sizes = [10, 16], strides = [1, 1]} : vector<10x192xf32> to vector<10x16xf32>
    %cst_66 = arith.constant dense<0.000000e+00> : vector<10x10xf32>
    %221 = tpu.matmul %218, %219, %cst_66 {dimension_numbers = #tpu.dot_dimension_numbers<[1], [1], [0], [0], [0, 0, 1, 0], [], []>} : vector<10x16xf32>, vector<10x16xf32>, vector<10x10xf32> -> vector<10x10xf32>
    %222 = arith.addf %221, %23 : vector<10x10xf32>
    %cst_67 = arith.constant dense<0xFF800000> : vector<10xf32>
    %223 = vector.multi_reduction <maximumf>, %222, %cst_67 [1] : vector<10x10xf32> to vector<10xf32>
    %224 = vector.shape_cast %223 : vector<10xf32> to vector<10x1xf32>
    %225 = vector.broadcast %224 : vector<10x1xf32> to vector<10x10xf32>
    %226 = arith.subf %222, %225 : vector<10x10xf32>
    %227 = math.exp %226 : vector<10x10xf32>
    %cst_68 = arith.constant dense<0.000000e+00> : vector<10xf32>
    %228 = vector.multi_reduction <add>, %227, %cst_68 [1] : vector<10x10xf32> to vector<10xf32>
    %229 = vector.shape_cast %228 : vector<10xf32> to vector<10x1xf32>
    %230 = vector.broadcast %229 : vector<10x1xf32> to vector<10x10xf32>
    %231 = arith.divf %227, %230 : vector<10x10xf32>
    %cst_69 = arith.constant dense<0.000000e+00> : vector<10x16xf32>
    %232 = tpu.matmul %231, %220, %cst_69 {dimension_numbers = #tpu.dot_dimension_numbers<[1], [0], [0], [1], [0, 0, 1, 1], [], []>} : vector<10x10xf32>, vector<10x16xf32>, vector<10x16xf32> -> vector<10x16xf32>
    %233 = vector.extract_strided_slice %202 {offsets = [0, 32], sizes = [10, 16], strides = [1, 1]} : vector<10x192xf32> to vector<10x16xf32>
    %234 = vector.extract_strided_slice %202 {offsets = [0, 96], sizes = [10, 16], strides = [1, 1]} : vector<10x192xf32> to vector<10x16xf32>
    %235 = vector.extract_strided_slice %202 {offsets = [0, 160], sizes = [10, 16], strides = [1, 1]} : vector<10x192xf32> to vector<10x16xf32>
    %cst_70 = arith.constant dense<0.000000e+00> : vector<10x10xf32>
    %236 = tpu.matmul %233, %234, %cst_70 {dimension_numbers = #tpu.dot_dimension_numbers<[1], [1], [0], [0], [0, 0, 1, 0], [], []>} : vector<10x16xf32>, vector<10x16xf32>, vector<10x10xf32> -> vector<10x10xf32>
    %237 = arith.addf %236, %23 : vector<10x10xf32>
    %cst_71 = arith.constant dense<0xFF800000> : vector<10xf32>
    %238 = vector.multi_reduction <maximumf>, %237, %cst_71 [1] : vector<10x10xf32> to vector<10xf32>
    %239 = vector.shape_cast %238 : vector<10xf32> to vector<10x1xf32>
    %240 = vector.broadcast %239 : vector<10x1xf32> to vector<10x10xf32>
    %241 = arith.subf %237, %240 : vector<10x10xf32>
    %242 = math.exp %241 : vector<10x10xf32>
    %cst_72 = arith.constant dense<0.000000e+00> : vector<10xf32>
    %243 = vector.multi_reduction <add>, %242, %cst_72 [1] : vector<10x10xf32> to vector<10xf32>
    %244 = vector.shape_cast %243 : vector<10xf32> to vector<10x1xf32>
    %245 = vector.broadcast %244 : vector<10x1xf32> to vector<10x10xf32>
    %246 = arith.divf %242, %245 : vector<10x10xf32>
    %cst_73 = arith.constant dense<0.000000e+00> : vector<10x16xf32>
    %247 = tpu.matmul %246, %235, %cst_73 {dimension_numbers = #tpu.dot_dimension_numbers<[1], [0], [0], [1], [0, 0, 1, 1], [], []>} : vector<10x10xf32>, vector<10x16xf32>, vector<10x16xf32> -> vector<10x16xf32>
    %248 = vector.extract_strided_slice %202 {offsets = [0, 48], sizes = [10, 16], strides = [1, 1]} : vector<10x192xf32> to vector<10x16xf32>
    %249 = vector.extract_strided_slice %202 {offsets = [0, 112], sizes = [10, 16], strides = [1, 1]} : vector<10x192xf32> to vector<10x16xf32>
    %250 = vector.extract_strided_slice %202 {offsets = [0, 176], sizes = [10, 16], strides = [1, 1]} : vector<10x192xf32> to vector<10x16xf32>
    %cst_74 = arith.constant dense<0.000000e+00> : vector<10x10xf32>
    %251 = tpu.matmul %248, %249, %cst_74 {dimension_numbers = #tpu.dot_dimension_numbers<[1], [1], [0], [0], [0, 0, 1, 0], [], []>} : vector<10x16xf32>, vector<10x16xf32>, vector<10x10xf32> -> vector<10x10xf32>
    %252 = arith.addf %251, %23 : vector<10x10xf32>
    %cst_75 = arith.constant dense<0xFF800000> : vector<10xf32>
    %253 = vector.multi_reduction <maximumf>, %252, %cst_75 [1] : vector<10x10xf32> to vector<10xf32>
    %254 = vector.shape_cast %253 : vector<10xf32> to vector<10x1xf32>
    %255 = vector.broadcast %254 : vector<10x1xf32> to vector<10x10xf32>
    %256 = arith.subf %252, %255 : vector<10x10xf32>
    %257 = math.exp %256 : vector<10x10xf32>
    %cst_76 = arith.constant dense<0.000000e+00> : vector<10xf32>
    %258 = vector.multi_reduction <add>, %257, %cst_76 [1] : vector<10x10xf32> to vector<10xf32>
    %259 = vector.shape_cast %258 : vector<10xf32> to vector<10x1xf32>
    %260 = vector.broadcast %259 : vector<10x1xf32> to vector<10x10xf32>
    %261 = arith.divf %257, %260 : vector<10x10xf32>
    %cst_77 = arith.constant dense<0.000000e+00> : vector<10x16xf32>
    %262 = tpu.matmul %261, %250, %cst_77 {dimension_numbers = #tpu.dot_dimension_numbers<[1], [0], [0], [1], [0, 0, 1, 1], [], []>} : vector<10x10xf32>, vector<10x16xf32>, vector<10x16xf32> -> vector<10x16xf32>
    %263 = tpu.concatenate %217, %232, %247, %262 in 1 : vector<10x16xf32>, vector<10x16xf32>, vector<10x16xf32>, vector<10x16xf32> -> vector<10x64xf32>
    %c1_78 = arith.constant 1 : index
    %c0_79 = arith.constant 0 : index
    %c0_80 = arith.constant 0 : index
    %264 = vector.load %arg5[%c1_78, %c0_79, %c0_80] : memref<2x64x64xf32, #tpu.memory_space<vmem>>, vector<1x64x64xf32>
    %265 = vector.shape_cast %264 : vector<1x64x64xf32> to vector<64x64xf32>
    %cst_81 = arith.constant dense<0.000000e+00> : vector<10x64xf32>
    %266 = tpu.matmul %263, %265, %cst_81 {dimension_numbers = #tpu.dot_dimension_numbers<[1], [0], [0], [1], [0, 0, 1, 1], [], []>} : vector<10x64xf32>, vector<64x64xf32>, vector<10x64xf32> -> vector<10x64xf32>
    %267 = vector.extract_strided_slice %0 {offsets = [23, 0], sizes = [1, 64], strides = [1, 1]} : vector<30x256xf32> to vector<1x64xf32>
    %268 = vector.broadcast %267 : vector<1x64xf32> to vector<10x64xf32>
    %269 = arith.addf %266, %268 : vector<10x64xf32>
    %270 = vector.extract_strided_slice %0 {offsets = [24, 0], sizes = [1, 64], strides = [1, 1]} : vector<30x256xf32> to vector<1x64xf32>
    %271 = vector.broadcast %270 : vector<1x64xf32> to vector<10x64xf32>
    %272 = arith.mulf %269, %271 : vector<10x64xf32>
    %273 = arith.addf %172, %272 : vector<10x64xf32>
    %274 = vector.extract_strided_slice %0 {offsets = [25, 0], sizes = [1, 64], strides = [1, 1]} : vector<30x256xf32> to vector<1x64xf32>
    %275 = vector.extract_strided_slice %0 {offsets = [26, 0], sizes = [1, 64], strides = [1, 1]} : vector<30x256xf32> to vector<1x64xf32>
    %cst_82 = arith.constant dense<0.000000e+00> : vector<10xf32>
    %276 = vector.multi_reduction <add>, %273, %cst_82 [1] : vector<10x64xf32> to vector<10xf32>
    %277 = vector.shape_cast %276 : vector<10xf32> to vector<10x1xf32>
    %cst_83 = arith.constant 6.400000e+01 : f32
    %278 = vector.broadcast %cst_83 : f32 to vector<10x1xf32>
    %279 = arith.divf %277, %278 : vector<10x1xf32>
    %280 = vector.broadcast %279 : vector<10x1xf32> to vector<10x64xf32>
    %281 = arith.subf %273, %280 : vector<10x64xf32>
    %282 = arith.mulf %281, %281 : vector<10x64xf32>
    %cst_84 = arith.constant dense<0.000000e+00> : vector<10xf32>
    %283 = vector.multi_reduction <add>, %282, %cst_84 [1] : vector<10x64xf32> to vector<10xf32>
    %284 = vector.shape_cast %283 : vector<10xf32> to vector<10x1xf32>
    %cst_85 = arith.constant 6.400000e+01 : f32
    %285 = vector.broadcast %cst_85 : f32 to vector<10x1xf32>
    %286 = arith.divf %284, %285 : vector<10x1xf32>
    %287 = vector.broadcast %279 : vector<10x1xf32> to vector<10x64xf32>
    %288 = arith.subf %273, %287 : vector<10x64xf32>
    %cst_86 = arith.constant 9.99999997E-7 : f32
    %289 = vector.broadcast %cst_86 : f32 to vector<10x1xf32>
    %290 = arith.addf %286, %289 : vector<10x1xf32>
    %291 = math.rsqrt %290 : vector<10x1xf32>
    %292 = vector.broadcast %291 : vector<10x1xf32> to vector<10x64xf32>
    %293 = arith.mulf %288, %292 : vector<10x64xf32>
    %294 = vector.broadcast %274 : vector<1x64xf32> to vector<10x64xf32>
    %295 = arith.mulf %293, %294 : vector<10x64xf32>
    %296 = vector.broadcast %275 : vector<1x64xf32> to vector<10x64xf32>
    %297 = arith.addf %295, %296 : vector<10x64xf32>
    %c1_87 = arith.constant 1 : index
    %c0_88 = arith.constant 0 : index
    %c0_89 = arith.constant 0 : index
    %298 = vector.load %arg6[%c1_87, %c0_88, %c0_89] : memref<2x64x256xf32, #tpu.memory_space<vmem>>, vector<1x64x256xf32>
    %299 = vector.shape_cast %298 : vector<1x64x256xf32> to vector<64x256xf32>
    %cst_90 = arith.constant dense<0.000000e+00> : vector<10x256xf32>
    %300 = tpu.matmul %297, %299, %cst_90 {dimension_numbers = #tpu.dot_dimension_numbers<[1], [0], [0], [1], [0, 0, 1, 1], [], []>} : vector<10x64xf32>, vector<64x256xf32>, vector<10x256xf32> -> vector<10x256xf32>
    %301 = vector.extract_strided_slice %0 {offsets = [27, 0], sizes = [1, 256], strides = [1, 1]} : vector<30x256xf32> to vector<1x256xf32>
    %302 = vector.broadcast %301 : vector<1x256xf32> to vector<10x256xf32>
    %303 = arith.addf %300, %302 : vector<10x256xf32>
    %cst_91 = arith.constant 5.000000e-01 : f32
    %304 = vector.broadcast %cst_91 : f32 to vector<10x256xf32>
    %305 = arith.mulf %304, %303 : vector<10x256xf32>
    %cst_92 = arith.constant 0.707106769 : f32
    %306 = vector.broadcast %cst_92 : f32 to vector<10x256xf32>
    %307 = arith.mulf %303, %306 : vector<10x256xf32>
    %308 = math.erf %307 : vector<10x256xf32>
    %cst_93 = arith.constant 1.000000e+00 : f32
    %309 = vector.broadcast %cst_93 : f32 to vector<10x256xf32>
    %310 = arith.addf %309, %308 : vector<10x256xf32>
    %311 = arith.mulf %305, %310 : vector<10x256xf32>
    %c1_94 = arith.constant 1 : index
    %c0_95 = arith.constant 0 : index
    %c0_96 = arith.constant 0 : index
    %312 = vector.load %arg7[%c1_94, %c0_95, %c0_96] : memref<2x256x64xf32, #tpu.memory_space<vmem>>, vector<1x256x64xf32>
    %313 = vector.shape_cast %312 : vector<1x256x64xf32> to vector<256x64xf32>
    %cst_97 = arith.constant dense<0.000000e+00> : vector<10x64xf32>
    %314 = tpu.matmul %311, %313, %cst_97 {dimension_numbers = #tpu.dot_dimension_numbers<[1], [0], [0], [1], [0, 0, 1, 1], [], []>} : vector<10x256xf32>, vector<256x64xf32>, vector<10x64xf32> -> vector<10x64xf32>
    %315 = vector.extract_strided_slice %0 {offsets = [28, 0], sizes = [1, 64], strides = [1, 1]} : vector<30x256xf32> to vector<1x64xf32>
    %316 = vector.broadcast %315 : vector<1x64xf32> to vector<10x64xf32>
    %317 = arith.addf %314, %316 : vector<10x64xf32>
    %318 = vector.extract_strided_slice %0 {offsets = [29, 0], sizes = [1, 64], strides = [1, 1]} : vector<30x256xf32> to vector<1x64xf32>
    %319 = vector.broadcast %318 : vector<1x64xf32> to vector<10x64xf32>
    %320 = arith.mulf %317, %319 : vector<10x64xf32>
    %321 = arith.addf %273, %320 : vector<10x64xf32>
    %322 = vector.extract_strided_slice %321 {offsets = [0, 0], sizes = [1, 64], strides = [1, 1]} : vector<10x64xf32> to vector<1x64xf32>
    %323 = vector.extract_strided_slice %321 {offsets = [5, 0], sizes = [1, 64], strides = [1, 1]} : vector<10x64xf32> to vector<1x64xf32>
    %324 = tpu.concatenate %322, %323 in 0 : vector<1x64xf32>, vector<1x64xf32> -> vector<2x64xf32>
    %325 = vector.extract_strided_slice %0 {offsets = [7, 0], sizes = [1, 64], strides = [1, 1]} : vector<30x256xf32> to vector<1x64xf32>
    %326 = vector.extract_strided_slice %0 {offsets = [8, 0], sizes = [1, 64], strides = [1, 1]} : vector<30x256xf32> to vector<1x64xf32>
    %cst_98 = arith.constant dense<0.000000e+00> : vector<2xf32>
    %327 = vector.multi_reduction <add>, %324, %cst_98 [1] : vector<2x64xf32> to vector<2xf32>
    %328 = vector.shape_cast %327 : vector<2xf32> to vector<2x1xf32>
    %cst_99 = arith.constant 6.400000e+01 : f32
    %329 = vector.broadcast %cst_99 : f32 to vector<2x1xf32>
    %330 = arith.divf %328, %329 : vector<2x1xf32>
    %331 = vector.broadcast %330 : vector<2x1xf32> to vector<2x64xf32>
    %332 = arith.subf %324, %331 : vector<2x64xf32>
    %333 = arith.mulf %332, %332 : vector<2x64xf32>
    %cst_100 = arith.constant dense<0.000000e+00> : vector<2xf32>
    %334 = vector.multi_reduction <add>, %333, %cst_100 [1] : vector<2x64xf32> to vector<2xf32>
    %335 = vector.shape_cast %334 : vector<2xf32> to vector<2x1xf32>
    %cst_101 = arith.constant 6.400000e+01 : f32
    %336 = vector.broadcast %cst_101 : f32 to vector<2x1xf32>
    %337 = arith.divf %335, %336 : vector<2x1xf32>
    %338 = vector.broadcast %330 : vector<2x1xf32> to vector<2x64xf32>
    %339 = arith.subf %324, %338 : vector<2x64xf32>
    %cst_102 = arith.constant 9.99999997E-7 : f32
    %340 = vector.broadcast %cst_102 : f32 to vector<2x1xf32>
    %341 = arith.addf %337, %340 : vector<2x1xf32>
    %342 = math.rsqrt %341 : vector<2x1xf32>
    %343 = vector.broadcast %342 : vector<2x1xf32> to vector<2x64xf32>
    %344 = arith.mulf %339, %343 : vector<2x64xf32>
    %345 = vector.broadcast %325 : vector<1x64xf32> to vector<2x64xf32>
    %346 = arith.mulf %344, %345 : vector<2x64xf32>
    %347 = vector.broadcast %326 : vector<1x64xf32> to vector<2x64xf32>
    %348 = arith.addf %346, %347 : vector<2x64xf32>
    %c0_103 = arith.constant 0 : index
    %c0_104 = arith.constant 0 : index
    %349 = vector.load %arg8[%c0_103, %c0_104] : memref<64x128xf32, #tpu.memory_space<vmem>>, vector<64x128xf32>
    %cst_105 = arith.constant dense<0.000000e+00> : vector<2x128xf32>
    %350 = tpu.matmul %348, %349, %cst_105 {dimension_numbers = #tpu.dot_dimension_numbers<[1], [0], [0], [1], [0, 0, 1, 1], [], []>} : vector<2x64xf32>, vector<64x128xf32>, vector<2x128xf32> -> vector<2x128xf32>
    %351 = vector.extract_strided_slice %0 {offsets = [9, 0], sizes = [1, 128], strides = [1, 1]} : vector<30x256xf32> to vector<1x128xf32>
    %352 = vector.broadcast %351 : vector<1x128xf32> to vector<2x128xf32>
    %353 = arith.addf %350, %352 : vector<2x128xf32>
    %c0_106 = arith.constant 0 : index
    %c0_107 = arith.constant 0 : index
    %354 = vector.load %arg9[%c0_106, %c0_107] : memref<2x128xf32, #tpu.memory_space<vmem>>, vector<2x128xf32>
    tpu.vector_store %arg9[%c0_106, %c0_107], %353 {strides = array<i32>} : memref<2x128xf32, #tpu.memory_space<vmem>>, vector<2x128xf32>,
    return
  }
  func.func @transform_0(%arg0: i32) -> (i32, i32) {
    %c0_i32 = arith.constant 0 : i32
    %c0_i32_0 = arith.constant 0 : i32
    %c0_i32_1 = arith.constant 0 : i32
    return %c0_i32, %c0_i32_0 : i32, i32
  }
  func.func @transform_1(%arg0: i32) -> (i32, i32) {
    %c0_i32 = arith.constant 0 : i32
    %c0_i32_0 = arith.constant 0 : i32
    %c0_i32_1 = arith.constant 0 : i32
    return %c0_i32, %c0_i32_0 : i32, i32
  }
  func.func @transform_2(%arg0: i32) -> (i32, i32) {
    %c0_i32 = arith.constant 0 : i32
    %c0_i32_0 = arith.constant 0 : i32
    %c0_i32_1 = arith.constant 0 : i32
    return %c0_i32, %c0_i32_0 : i32, i32
  }
  func.func @transform_3(%arg0: i32) -> (i32, i32, i32) {
    %c0_i32 = arith.constant 0 : i32
    %c0_i32_0 = arith.constant 0 : i32
    %c0_i32_1 = arith.constant 0 : i32
    %c0_i32_2 = arith.constant 0 : i32
    return %c0_i32, %c0_i32_0, %c0_i32_1 : i32, i32, i32
  }
  func.func @transform_4(%arg0: i32) -> (i32, i32, i32) {
    %c0_i32 = arith.constant 0 : i32
    %c0_i32_0 = arith.constant 0 : i32
    %c0_i32_1 = arith.constant 0 : i32
    %c0_i32_2 = arith.constant 0 : i32
    return %c0_i32, %c0_i32_0, %c0_i32_1 : i32, i32, i32
  }
  func.func @transform_5(%arg0: i32) -> (i32, i32, i32) {
    %c0_i32 = arith.constant 0 : i32
    %c0_i32_0 = arith.constant 0 : i32
    %c0_i32_1 = arith.constant 0 : i32
    %c0_i32_2 = arith.constant 0 : i32
    return %c0_i32, %c0_i32_0, %c0_i32_1 : i32, i32, i32
  }
  func.func @transform_6(%arg0: i32) -> (i32, i32, i32) {
    %c0_i32 = arith.constant 0 : i32
    %c0_i32_0 = arith.constant 0 : i32
    %c0_i32_1 = arith.constant 0 : i32
    %c0_i32_2 = arith.constant 0 : i32
    return %c0_i32, %c0_i32_0, %c0_i32_1 : i32, i32, i32
  }
  func.func @transform_7(%arg0: i32) -> (i32, i32) {
    %c0_i32 = arith.constant 0 : i32
    %c0_i32_0 = arith.constant 0 : i32
    %c0_i32_1 = arith.constant 0 : i32
    return %c0_i32, %c0_i32_0 : i32, i32
  }
  func.func @transform_8(%arg0: i32) -> (i32, i32) {
    %c0_i32 = arith.constant 0 : i32
    %c0_i32_0 = arith.constant 0 : i32
    %c0_i32_1 = arith.constant 0 : i32
    return %c0_i32, %c0_i32_0 : i32, i32
  }
}

</mosaic_0001>

<bundles_post_ra>
// kernel: vit_forward.1
= control target key start
LH: loop header
LB: loop body
LE: loop exit
PB: predicated region body
PF: predicated region fallthrough
CT: control target
= control target key end

     0   :  { %s4222_s0 = inlined_call_operand.vmem [shape: f32[8,588], index: 0, kind: input, shape index: {}]   ;;  %s4223_s1 = inlined_call_operand.vmem [shape: f32[588,64], index: 1, kind: input, shape index: {}]   ;;  %s4224_s2 = inlined_call_operand.vmem [shape: f32[30,256], index: 2, kind: input, shape index: {}]   ;;  %s4225_s3 = inlined_call_operand.vmem [shape: f32[2,64,192], index: 3, kind: input, shape index: {}]   ;;  %s4226_s4 = inlined_call_operand.vmem [shape: f32[2,64,64], index: 4, kind: input, shape index: {}]   ;;  %s4227_s5 = inlined_call_operand.vmem [shape: f32[2,64,256], index: 5, kind: input, shape index: {}]   ;;  %s4228_s6 = inlined_call_operand.vmem [shape: f32[2,256,64], index: 6, kind: input, shape index: {}]   ;;  %s4229_s7 = inlined_call_operand.vmem [shape: f32[64,128], index: 7, kind: input, shape index: {}]   ;;  %s4230_s8 = inlined_call_operand.hbm [shape: f32[2,128], index: 8, kind: output, shape index: {}]  }
   0x1   :  { %v57_v0 = vld [vmem:[%s4223_s1 + $0x78] sm:$0xff]  ;;  %v56_v1 = vld [vmem:[%s4223_s1 + $0x70] sm:$0xff]  ;;  %v55_v3 = vld [vmem:[%s4223_s1 + $0x68] sm:$0xff] }
   0x2   :  { %125 = vmatpush.msra.mxu0 %v57_v0  ;;  %v89_v2 = vld [vmem:[%s4223_s1 + $0x178] sm:$0xff]  ;;  %v88_v4 = vld [vmem:[%s4223_s1 + $0x170] sm:$0xff]  ;;  %v87_v7 = vld [vmem:[%s4223_s1 + $0x168] sm:$0xff] }
   0x3   :  { %165 = vmatpush.msra.mxu2 %v89_v2  ;;  %v105_v5 = vld [vmem:[%s4223_s1 + $0x1f8] sm:$0xff]  ;;  %v54_v8 = vld [vmem:[%s4223_s1 + $0x60] sm:$0xff]  ;;  %v104_v9 = vld [vmem:[%s4223_s1 + $0x1f0] sm:$0xff] }
   0x4   :  { %126 = vmatpush.msra.mxu0 %v56_v1  ;;  %185 = vmatpush.msra.mxu3 %v105_v5  ;;  %v73_v6 = vld [vmem:[%s4223_s1 + $0xf8] sm:$0xff]  ;;  %v72_v10 = vld [vmem:[%s4223_s1 + $0xf0] sm:$0xff]  ;;  %v86_v11 = vld [vmem:[%s4223_s1 + $0x160] sm:$0xff] }
   0x5   :  { %166 = vmatpush.msra.mxu2 %v88_v4  ;;  %145 = vmatpush.msra.mxu1 %v73_v6  ;;  %v103_v12 = vld [vmem:[%s4223_s1 + $0x1e8] sm:$0xff]  ;;  %v53_v13 = vld [vmem:[%s4223_s1 + $0x58] sm:$0xff]  ;;  %v102_v15 = vld [vmem:[%s4223_s1 + $0x1e0] sm:$0xff] }
   0x6   :  { %127 = vmatpush.msra.mxu0 %v55_v3  ;;  %186 = vmatpush.msra.mxu3 %v104_v9  ;;  %v71_v14 = vld [vmem:[%s4223_s1 + $0xe8] sm:$0xff]  ;;  %v85_v16 = vld [vmem:[%s4223_s1 + $0x158] sm:$0xff]  ;;  %v70_v17 = vld [vmem:[%s4223_s1 + $0xe0] sm:$0xff] }
   0x7   :  { %167 = vmatpush.msra.mxu2 %v87_v7  ;;  %146 = vmatpush.msra.mxu1 %v72_v10  ;;  %v52_v18 = vld [vmem:[%s4223_s1 + $0x50] sm:$0xff]  ;;  %v101_v19 = vld [vmem:[%s4223_s1 + $0x1d8] sm:$0xff]  ;;  %v51_v22 = vld [vmem:[%s4223_s1 + $0x48] sm:$0xff] }
   0x8   :  { %128 = vmatpush.msra.mxu0 %v54_v8  ;;  %187 = vmatpush.msra.mxu3 %v103_v12  ;;  %v84_v20 = vld [vmem:[%s4223_s1 + $0x150] sm:$0xff]  ;;  %v69_v21 = vld [vmem:[%s4223_s1 + $0xd8] sm:$0xff]  ;;  %v83_v24 = vld [vmem:[%s4223_s1 + $0x148] sm:$0xff] }
   0x9   :  { %168 = vmatpush.msra.mxu2 %v86_v11  ;;  %147 = vmatpush.msra.mxu1 %v71_v14  ;;  %v100_v23 = vld [vmem:[%s4223_s1 + $0x1d0] sm:$0xff]  ;;  %v50_v26 = vld [vmem:[%s4223_s1 + $0x40] sm:$0xff]  ;;  %v99_v27 = vld [vmem:[%s4223_s1 + $0x1c8] sm:$0xff] }
   0xa   :  { %129 = vmatpush.msra.mxu0 %v53_v13  ;;  %188 = vmatpush.msra.mxu3 %v102_v15  ;;  %v68_v25 = vld [vmem:[%s4223_s1 + $0xd0] sm:$0xff]  ;;  %v82_v28 = vld [vmem:[%s4223_s1 + $0x140] sm:$0xff]  ;;  %v67_v29 = vld [vmem:[%s4223_s1 + $0xc8] sm:$0xff] }
   0xb   :  { %169 = vmatpush.msra.mxu2 %v85_v16  ;;  %148 = vmatpush.msra.mxu1 %v70_v17  ;;  %v49_v30 = vld [vmem:[%s4223_s1 + $0x38] sm:$0xff]  ;;  %v98_v31 = vld [vmem:[%s4223_s1 + $0x1c0] sm:$0xff]  ;;  %v48_v34 = vld [vmem:[%s4223_s1 + $0x30] sm:$0xff] }
   0xc   :  { %130 = vmatpush.msra.mxu0 %v52_v18  ;;  %189 = vmatpush.msra.mxu3 %v101_v19  ;;  %v81_v32 = vld [vmem:[%s4223_s1 + $0x138] sm:$0xff]  ;;  %v66_v33 = vld [vmem:[%s4223_s1 + $0xc0] sm:$0xff]  ;;  %v80_v36 = vld [vmem:[%s4223_s1 + $0x130] sm:$0xff] }
   0xd   :  { %170 = vmatpush.msra.mxu2 %v84_v20  ;;  %149 = vmatpush.msra.mxu1 %v69_v21  ;;  %v97_v35 = vld [vmem:[%s4223_s1 + $0x1b8] sm:$0xff]  ;;  %v47_v38 = vld [vmem:[%s4223_s1 + $0x28] sm:$0xff]  ;;  %v96_v39 = vld [vmem:[%s4223_s1 + $0x1b0] sm:$0xff] }
   0xe   :  { %131 = vmatpush.msra.mxu0 %v51_v22  ;;  %190 = vmatpush.msra.mxu3 %v100_v23  ;;  %v65_v37 = vld [vmem:[%s4223_s1 + $0xb8] sm:$0xff]  ;;  %v79_v40 = vld [vmem:[%s4223_s1 + $0x128] sm:$0xff]  ;;  %v64_v41 = vld [vmem:[%s4223_s1 + $0xb0] sm:$0xff] }
   0xf   :  { %171 = vmatpush.msra.mxu2 %v83_v24  ;;  %150 = vmatpush.msra.mxu1 %v68_v25  ;;  %v46_v42 = vld [vmem:[%s4223_s1 + $0x20] sm:$0xff]  ;;  %v95_v43 = vld [vmem:[%s4223_s1 + $0x1a8] sm:$0xff]  ;;  %v45_v46 = vld [vmem:[%s4223_s1 + $0x18] sm:$0xff] }
  0x10   :  { %132 = vmatpush.msra.mxu0 %v50_v26  ;;  %191 = vmatpush.msra.mxu3 %v99_v27  ;;  %v78_v44 = vld [vmem:[%s4223_s1 + $0x120] sm:$0xff]  ;;  %v63_v45 = vld [vmem:[%s4223_s1 + $0xa8] sm:$0xff]  ;;  %v77_v48 = vld [vmem:[%s4223_s1 + $0x118] sm:$0xff] }
  0x11   :  { %172 = vmatpush.msra.mxu2 %v82_v28  ;;  %151 = vmatpush.msra.mxu1 %v67_v29  ;;  %v94_v47 = vld [vmem:[%s4223_s1 + $0x1a0] sm:$0xff]  ;;  %v44_v50 = vld [vmem:[%s4223_s1 + $0x10] sm:$0xff]  ;;  %v93_v51 = vld [vmem:[%s4223_s1 + $0x198] sm:$0xff] }
  0x12   :  { %133 = vmatpush.msra.mxu0 %v49_v30  ;;  %192 = vmatpush.msra.mxu3 %v98_v31  ;;  %v62_v49 = vld [vmem:[%s4223_s1 + $0xa0] sm:$0xff]  ;;  %v76_v52 = vld [vmem:[%s4223_s1 + $0x110] sm:$0xff]  ;;  %v61_v53 = vld [vmem:[%s4223_s1 + $0x98] sm:$0xff] }
  0x13   :  { %173 = vmatpush.msra.mxu2 %v81_v32  ;;  %152 = vmatpush.msra.mxu1 %v66_v33  ;;  %v43_v54 = vld [vmem:[%s4223_s1 + $0x8] sm:$0xff]  ;;  %v92_v55 = vld [vmem:[%s4223_s1 + $0x190] sm:$0xff] }
  0x14   :  { %134 = vmatpush.msra.mxu0 %v48_v34  ;;  %193 = vmatpush.msra.mxu3 %v97_v35 }
  0x15   :  { %174 = vmatpush.msra.mxu2 %v80_v36  ;;  %153 = vmatpush.msra.mxu1 %v65_v37 }
  0x16   :  { %135 = vmatpush.msra.mxu0 %v47_v38  ;;  %194 = vmatpush.msra.mxu3 %v96_v39 }
  0x17   :  { %175 = vmatpush.msra.mxu2 %v79_v40  ;;  %154 = vmatpush.msra.mxu1 %v64_v41 }
  0x18   :  { %136 = vmatpush.msra.mxu0 %v46_v42  ;;  %195 = vmatpush.msra.mxu3 %v95_v43 }
  0x19   :  { %176 = vmatpush.msra.mxu2 %v78_v44  ;;  %155 = vmatpush.msra.mxu1 %v63_v45 }
  0x1a   :  { %137 = vmatpush.msra.mxu0 %v45_v46  ;;  %196 = vmatpush.msra.mxu3 %v94_v47 }
  0x1b   :  { %177 = vmatpush.msra.mxu2 %v77_v48  ;;  %156 = vmatpush.msra.mxu1 %v62_v49 }
  0x1c   :  { %13 = vsyncpa [#allocation3], 0  ;;  %138 = vmatpush.msra.mxu0 %v44_v50  ;;  %197 = vmatpush.msra.mxu3 %v93_v51  ;;  %v75_v56 = vld [vmem:[%s4223_s1 + $0x108] sm:$0xff]  ;;  %v60_v57 = vld [vmem:[%s4223_s1 + $0x90] sm:$0xff]  ;;  %vm121_vm0 = vcmask 1043456   ;;  %vm117_vm1 = vcmask 621568  }
  0x1d   :  { %v42_v58 = vld [vmem:[%s4223_s1] sm:$0xff]  ;;  %178 = vmatpush.msra.mxu2 %v76_v52  ;;  %157 = vmatpush.msra.mxu1 %v61_v53  ;;  %v91_v59 = vld [vmem:[%s4223_s1 + $0x188] sm:$0xff]  ;;  %v39_v62 = vld [vmem:[%s4222_s0 + $0x10] sm:$0xff]  ;;  %vm4231_vm2 = vcmask 1040384   ;;  %vm248_vm3 = vcmask 1044480   ;;  %vm250_vm4 = vcmask 1045504  }
  0x1e   :  { %139 = vmatpush.msra.mxu0 %v43_v54  ;;  %v115_v60 = vld [vmem:[%s4223_s1 + $0x248] sm:$0xf]  ;;  %198 = vmatpush.msra.mxu3 %v92_v55  ;;  %v74_v61 = vld [vmem:[%s4223_s1 + $0x100] sm:$0xff]  ;;  %v40_v3 = vld [vmem:[%s4222_s0 + $0x18] sm:$0xff]  ;;  %vm259_vm5 = vcmask 523264   ;;  %vm263_vm6 = vcmask 517120  }
  0x1f   :  { %179 = vmatpush.msra.mxu2 %v75_v56  ;;  %158 = vmatpush.msra.mxu1 %v60_v57  ;;  %v59_v63 = vld [vmem:[%s4223_s1 + $0x88] sm:$0xff]  ;;  %v114_v0 = vld [vmem:[%s4223_s1 + $0x240] sm:$0xff]  ;;  %v113_v4 = vld [vmem:[%s4223_s1 + $0x238] sm:$0xff]  ;;  %v2774_v42 = vmov 64.0   ;;  %s2775_s19 = smov 64   ;;  %s2776_s22 = smov 32  }
  0x20   :  { %140 = vmatpush.msra.mxu0 %v42_v58  ;;  %199 = vmatpush.msra.mxu3 %v91_v59  ;;  %v90_v1 = vld [vmem:[%s4223_s1 + $0x180] sm:$0xff]  ;;  %v38_v6 = vld [vmem:[%s4222_s0 + $0x8] sm:$0xff]  ;;  %v112_v7 = vld [vmem:[%s4223_s1 + $0x230] sm:$0xff]  ;;  %2645 = vrcp.f32 %v2774_v42  ;;  %s2777_s23 = smov 48   ;;  %vm482_vm14 = vcmask 1041408   ;;  %s2778_s24 = smov 16  }
  0x21   :  { %180 = vmatpush.msra.mxu2 %v74_v61  ;;  %v37_v2 = vld [vmem:[%s4222_s0] sm:$0xff]  ;;  %159 = vmatpush.msra.mxu1 %v59_v63  ;;  %v111_v8 = vld [vmem:[%s4223_s1 + $0x228] sm:$0xff]  ;;  %v109_v10 = vld [vmem:[%s4223_s1 + $0x218] sm:$0xff]  ;;  %s2779_s25 = smov 96   ;;  %s2780_s26 = smov 80   ;;  %vm394_vm15 = vcmask 130048  }
  0x22   :  { %2473 = vmatpush.msk.msrb.mxu0 %vm121_vm0, %v115_v60  ;;  %181 = vmatmul.f32.vlgmr.msra.gmra.mxu2 %v39_v62  ;;  %v58_v5 = vld [vmem:[%s4223_s1 + $0x80] sm:$0xff]  ;;  %v108_v11 = vld [vmem:[%s4223_s1 + $0x210] sm:$0xff]  ;;  %v107_v12 = vld [vmem:[%s4223_s1 + $0x208] sm:$0xff]  ;;  %s2781_s27 = smov 112   ;;  %vm252_vm0 = vcmask 39936   ;;  %s2464_s16 = sshll.u32 %s4230_s8, 4  ;;  %s2465_s16 = int_to_ptr.hbm [resolvable:$true] %s2464_s16 }
  0x23   :  { %200 = vmatpush.msra.mxu3 %v90_v1  ;;  %141 = vmatmul.f32.vlgmr.msra.gmra.mxu0 %v37_v2  ;;  %v110_v9 = vld [vmem:[%s4223_s1 + $0x220] sm:$0xff]  ;;  %v332_v59 = vld [vmem:[%s4225_s3 + $0x70] sm:$0xff]  ;;  %v333_v60 = vld [vmem:[%s4225_s3 + $0x78] sm:$0xff] }
  0x24   :  { %212 = vmatpush.msrb.mxu0 %v114_v0  ;;  %201 = vmatmul.f32.vlgmr.msra.gmra.mxu3 %v40_v3  ;;  %v106_v13 = vld [vmem:[%s4223_s1 + $0x200] sm:$0xff]  ;;  %v331_v62 = vld [vmem:[%s4225_s3 + $0x68] sm:$0xff]  ;;  %v328_v63 = vld [vmem:[%s4225_s3 + $0x50] sm:$0xff] }
  0x25   :  { %160 = vmatpush.msra.mxu1 %v58_v5  ;;  %v41_v14 = vld [vmem:[%s4222_s0 + $0x20] sm:$0xff]  ;;  %373 = vmatpush.msrb.mxu2 %v333_v60  ;;  %v329_v0 = vld [vmem:[%s4225_s3 + $0x58] sm:$0xff]  ;;  %v327_v2 = vld [vmem:[%s4225_s3 + $0x48] sm:$0xff] }
  0x26   :  { %213 = vmatpush.msrb.mxu0 %v113_v4  ;;  %161 = vmatmul.f32.vlgmr.msra.gmra.mxu1 %v38_v6  ;;  %v30_v15 = vld [vmem:[%s4224_s2] sm:$0xff]  ;;  %v2646_v43 = vpop.eup %2645  ;;  %v324_v3 = vld [vmem:[%s4225_s3 + $0x30] sm:$0xff]  ;;  %v325_v4 = vld [vmem:[%s4225_s3 + $0x38] sm:$0xff] }
  0x27   :  { %v116_v16 = vperm.slane %v30_v15, 0  ;;  %v226_v24 = vrot.slane %v30_v15, 1  ;;  %v229_v26 = vrot.slane %v30_v15, 3  ;;  %v232_v27 = vrot.slane %v30_v15, 7  ;;  %350 = vmatpush.msrb.mxu1 %v332_v59  ;;  %v330_v61 = vld [vmem:[%s4225_s3 + $0x60] sm:$0xff]  ;;  %374 = vmatpush.msrb.mxu2 %v331_v62  ;;  %v323_v6 = vld [vmem:[%s4225_s3 + $0x28] sm:$0xff] }
  0x28   :  { %214 = vmatpush.msrb.mxu0 %v112_v7  ;;  %v268_v44 = vmul.f32 64.0, %v2646_v43  ;;  %vm272_vm7 = vweird.f32 %v2646_v43  ;;  %v326_v1 = vld [vmem:[%s4225_s3 + $0x40] sm:$0xff]  ;;  %v320_v7 = vld [vmem:[%s4225_s3 + $0x10] sm:$0xff] }
  0x29   :  { %v228_v28 = vadd.f32 %v226_v24, %v30_v15  ;;  %351 = vmatpush.msrb.mxu1 %v330_v61  ;;  %375 = vmatpush.msrb.mxu2 %v329_v0  ;;  %v322_v5 = vld [vmem:[%s4225_s3 + $0x20] sm:$0xff] }
  0x2a   :  { %215 = vmatpush.msrb.mxu0 %v111_v8  ;;  %v269_v45 = vsub.f32 1.0, %v268_v44  ;;  %v321_v8 = vld [vmem:[%s4225_s3 + $0x18] sm:$0xff] }
  0x2b   :  { %v236_v33 = vrot.slane %v228_v28, 1  ;;  %v241_v34 = vrot.slane %v228_v28, 4  ;;  %352 = vmatpush.msrb.mxu1 %v328_v63  ;;  %376 = vmatpush.msrb.mxu2 %v327_v2 }
  0x2c   :  { %216 = vmatpush.msrb.mxu0 %v110_v9  ;;  %v270_v46 = vmul.f32 %v2646_v43, %v269_v45  ;;  %v318_v9 = vld [vmem:[%s4225_s3] sm:$0xff] }
  0x2d   :  { %353 = vmatpush.msrb.mxu1 %v326_v1  ;;  %377 = vmatpush.msrb.mxu2 %v325_v4  ;;  %v2782_v4 = vmov 0.0  }
  0x2e   :  { %217 = vmatpush.msrb.mxu0 %v109_v10  ;;  %v271_v47 = vadd.f32 %v2646_v43, %v270_v46  ;;  %v319_v10 = vld [vmem:[%s4225_s3 + $0x8] sm:$0xff] }
  0x2f   :  { %354 = vmatpush.msrb.mxu1 %v324_v3  ;;  %378 = vmatpush.msrb.mxu2 %v323_v6 }
  0x30   :  { %218 = vmatpush.msrb.mxu0 %v108_v11  ;;  %v3081_v48 = vsel %vm272_vm7, %v2646_v43, %v271_v47 }
  0x31   :  { %355 = vmatpush.msrb.mxu1 %v322_v5  ;;  %379 = vmatpush.msrb.mxu2 %v321_v8  ;;  %v254_v5 = vsel %vm252_vm0, -1e+30, %v2782_v4 }
  0x32   :  { %219 = vmatpush.msrb.mxu0 %v107_v12  ;;  %v3203_v6 = vrot.slane %v254_v5, 3 }
  0x33   :  { %356 = vmatpush.msrb.mxu1 %v320_v7  ;;  %380 = vmatpush.msrb.mxu2 %v319_v10  ;;  %v2783_v7 = vmov -1e+30  }
  0x34   :  { %220 = vmatpush.msrb.mxu0 %v106_v13  ;;  %v253_v8 = vsel %vm252_vm0, 0.0, %v2783_v7 }
  0x35   :  { %2474 = vmatmul.msk.f32.vlgmr.msrb.gmra.mxu0 %vm117_vm1, %v41_v14  ;;  %357 = vmatpush.msrb.mxu1 %v318_v9  ;;  %v3207_v9 = vsel %vm248_vm3, %v253_v8, %v3203_v6  ;;  %vm430_vm1 = vcmask 74752  }
  0xa0   :  { %v142_v17 = vpop.f32.mrf.mxu0 }
  0xa1   :  { %v143_v18 = vadd.f32 %v142_v17, %v116_v16 }
  0xa3   :  { %v162_v19 = vpop.f32.mrf.mxu1 }
  0xa4   :  { %v163_v20 = vadd.f32 %v162_v19, %v143_v18 }
  0xa5   :  { %v182_v21 = vpop.f32.mrf.mxu2 }
  0xa6   :  { %v183_v22 = vadd.f32 %v182_v21, %v163_v20 }
  0xa7   :  { %v202_v23 = vpop.f32.mrf.mxu3 }
  0xa8   :  { %v203_v25 = vadd.f32 %v202_v23, %v183_v22  ;;  %v3150_v22 = vld [vmem:[%s4224_s2 + $0x10] sm:$0xff] }
  0xa9   :  { %v334_v42 = vperm.slane %v3150_v22, 4 }
  0xb2   :  { %v222_v29 = vpop.f32.mrf.mxu0 }
  0xb3   :  { %v223_v30 = vadd.f32 %v222_v29, %v203_v25 }
  0xb5   :  { %v231_v31 = vadd.f32 %v229_v26, %v223_v30  ;;  %v234_v32 = vadd.f32 %v232_v27, %v223_v30  ;;  %v312_v26 = vperm.slane %v3150_v22, 2  ;;  %v315_v30 = vperm.slane %v3150_v22, 3 }
  0xb7   :  { %v239_v35 = vrot.slane %v231_v31, 7  ;;  %v3070_v36 = vrot.slane %v234_v32, 6 }
  0xb9   :  { %v247_v37 = vsel %vm4231_vm2, %v236_v33, %v239_v35  ;;  %v264_v41 = vsel %vm263_vm6, %v3070_v36, 0.0 }
  0xba   :  { %v249_v38 = vsel %vm248_vm3, %v247_v37, %v241_v34 }
  0xbb   :  { %v3075_v39 = vsel %vm250_vm4, %v249_v38, %v3070_v36  ;;  %vm426_vm4 = vcmask 80896  }
  0xbc   :  { %v260_v40 = vsel %vm259_vm5, %v3075_v39, 0.0 }
  0xbd   :  { %261 = vadd.xlane.f32.xlu0 %v260_v40 }
  0xc5   :  { %265 = vadd.xlane.f32.xlu0 %v264_v41 }
 0x130   :  { %v262_v49 = vpop.xlane.xlu0 %261 }
 0x131   :  { %v274_v50 = vmul.f32 %v3081_v48, %v262_v49  ;;  %v32_v49 = vld [vmem:[%s4224_s2 + $0x18] sm:$0xff] }
 0x133   :  { %v3085_v51 = vsub.f32 %v3075_v39, %v274_v50  ;;  %v335_v50 = vperm.slane %v32_v49, 4 }
 0x135   :  { %v278_v52 = vmul.f32 %v3085_v51, %v3085_v51 }
 0x137   :  { %v280_v53 = vsel %vm259_vm5, %v278_v52, 0.0 }
 0x138   :  { %281 = vadd.xlane.f32.xlu1 %v280_v53  ;;  %v266_v54 = vpop.xlane.xlu0 %265 }
 0x139   :  { %v275_v55 = vmul.f32 %v3081_v48, %v266_v54 }
 0x13b   :  { %v3092_v56 = vsub.f32 %v3070_v36, %v275_v55 }
 0x13d   :  { %v279_v57 = vmul.f32 %v3092_v56, %v3092_v56 }
 0x13f   :  { %v283_v58 = vsel %vm263_vm6, %v279_v57, 0.0 }
 0x140   :  { %284 = vadd.xlane.f32.xlu1 %v283_v58 }
 0x1ab   :  { %v282_v11 = vpop.xlane.xlu1 %281 }
 0x1ac   :  { %v286_v12 = vmul.f32 %v282_v11, %v3081_v48 }
 0x1ae   :  { %v288_v13 = vadd.f32 1e-06, %v286_v12 }
 0x1b0   :  { %2647 = vrsqrt.f32 %v288_v13  ;;  %vm296_vm9 = vweird.f32 %v288_v13 }
 0x1b3   :  { %v285_v14 = vpop.xlane.xlu1 %284 }
 0x1b4   :  { %v287_v15 = vmul.f32 %v285_v14, %v3081_v48 }
 0x1b6   :  { %v2648_v16 = vpop.eup %2647  ;;  %v289_v17 = vadd.f32 1e-06, %v287_v15 }
 0x1b7   :  { %v291_v18 = vmul.f32 %v2648_v16, %v288_v13  ;;  %vm297_vm8 = vweird.f32 %v2648_v16 }
 0x1b8   :  { %2649 = vrsqrt.f32 %v289_v17  ;;  %vm298_vm10 = vmor %vm296_vm9, %vm297_vm8  ;;  %vm306_vm12 = vweird.f32 %v289_v17 }
 0x1b9   :  { %v292_v19 = vmul.f32 %v2648_v16, %v291_v18 }
 0x1bb   :  { %v293_v20 = vmul.f32 0.5, %v292_v19 }
 0x1bd   :  { %v294_v21 = vsub.f32 1.5, %v293_v20 }
 0x1be   :  { %v2650_v23 = vpop.eup %2649 }
 0x1bf   :  { %v295_v24 = vmul.f32 %v2648_v16, %v294_v21  ;;  %v301_v25 = vmul.f32 %v2650_v23, %v289_v17  ;;  %vm307_vm11 = vweird.f32 %v2650_v23 }
 0x1c0   :  { %vm308_vm13 = vmor %vm306_vm12, %vm307_vm11 }
 0x1c1   :  { %v299_v27 = vsel %vm298_vm10, %v2648_v16, %v295_v24  ;;  %v302_v28 = vmul.f32 %v2650_v23, %v301_v25 }
 0x1c2   :  { %v310_v29 = vmul.f32 %v299_v27, %v3085_v51 }
 0x1c3   :  { %v303_v31 = vmul.f32 0.5, %v302_v28 }
 0x1c4   :  { %v313_v32 = vmul.f32 %v312_v26, %v310_v29 }
 0x1c5   :  { %v304_v33 = vsub.f32 1.5, %v303_v31 }
 0x1c6   :  { %v316_v34 = vadd.f32 %v315_v30, %v313_v32 }
 0x1c7   :  { %v305_v35 = vmul.f32 %v2650_v23, %v304_v33 }
 0x1c8   :  { %2475 = vmatmul.msk.f32.vlgmr.msrb.gmra.mxu1 %vm259_vm5, %v316_v34  ;;  %2477 = vmatmul.msk.f32.vlgmr.msrb.gmra.mxu2 %vm259_vm5, %v316_v34 }
 0x1c9   :  { %v309_v37 = vsel %vm308_vm13, %v2650_v23, %v305_v35 }
 0x1ca   :  { %v311_v38 = vmul.f32 %v309_v37, %v3092_v56 }
 0x1cc   :  { %v314_v40 = vmul.f32 %v312_v26, %v311_v38 }
 0x1ce   :  { %v317_v41 = vadd.f32 %v315_v30, %v314_v40 }
 0x1d0   :  { %2476 = vmatmul.msk.f32.gmra.mxu1 %vm259_vm5, %v317_v41  ;;  %2478 = vmatmul.msk.f32.gmra.mxu2 %vm259_vm5, %v317_v41 }
 0x245   :  { %v359_v43 = vpop.f32.mrf.mxu1 }
 0x246   :  { %v360_v44 = vadd.f32 %v359_v43, %v334_v42 }
 0x248   :  { %390 = vrot.lane.b32.xlu2 %v360_v44, %s2775_s19 }
 0x24b   :  { %v382_v45 = vpop.f32.mrf.mxu2 }
 0x24c   :  { %v3170_v53 = vadd.f32 %v382_v45, %v335_v50 }
 0x24d   :  { %v362_v46 = vpop.f32.mrf.mxu1 }
 0x24e   :  { %v363_v47 = vadd.f32 %v362_v46, %v334_v42 }
 0x250   :  { %639 = vrot.lane.b32.xlu1 %v363_v47, %s2776_s22  ;;  %515 = vrot.lane.b32.xlu0 %v363_v47, %s2777_s23 }
 0x251   :  { %392 = vrot.lane.b32.xlu2 %v363_v47, %s2775_s19 }
 0x253   :  { %v385_v51 = vpop.f32.mrf.mxu2 }
 0x254   :  { %v3168_v52 = vadd.f32 %v385_v51, %v335_v50 }
 0x256   :  { %2483 = vmatpush.msk.msrb.mxu3 %vm482_vm14, %v3168_v52 }
 0x258   :  { %501 = vmatpush.msrb.mxu3 %v3170_v53  ;;  %762 = vrot.lane.b32.xlu1 %v363_v47, %s2778_s24 }
 0x259   :  { %633 = vrot.lane.b32.xlu0 %v360_v44, %s2779_s25  ;;  %513 = vrot.lane.b32.xlu2 %v360_v44, %s2777_s23 }
 0x260   :  { %756 = vrot.lane.b32.xlu1 %v360_v44, %s2780_s26 }
 0x261   :  { %635 = vrot.lane.b32.xlu0 %v363_v47, %s2779_s25  ;;  %509 = vrot.lane.b32.xlu2 %v360_v44, %s2781_s27 }
 0x269   :  { %758 = vrot.lane.b32.xlu0 %v363_v47, %s2780_s26  ;;  %637 = vrot.lane.b32.xlu2 %v360_v44, %s2776_s22 }
 0x271   :  { %511 = vrot.lane.b32.xlu2 %v363_v47, %s2781_s27 }
 0x279   :  { %760 = vrot.lane.b32.xlu2 %v360_v44, %s2778_s24 }
 0x2a2   :  { %v391_v54 = vpop.permute.xlu2 %390 }
 0x2ab   :  { %v393_v55 = vpop.permute.xlu2 %392 }
 0x2ac   :  { %2479 = vmatpush.xpose.msk.msra.mxu0 %vm394_vm15, %v393_v55  ;;  %2632 = vmatpush.xpose.msk.msra.mxu1 %vm394_vm15, %v393_v55 }
 0x2b0   :  { %2480 = vmatpush.xpose.msk.msra.mxu0 %vm394_vm15, %v391_v54  ;;  %2633 = vmatpush.xpose.msk.msra.mxu1 %vm394_vm15, %v391_v54 }
 0x2b3   :  { %2481 = vmatmul.msk.f32.vlgmr.msra.gmra.mxu0 %vm394_vm15, %v360_v44  ;;  %2482 = vmatmul.msk.f32.vlgmr.msra.gmra.mxu1 %vm394_vm15, %v363_v47  ;;  %v514_v56 = vpop.permute.xlu2 %513 }
 0x2bb   :  { %v510_v57 = vpop.permute.xlu2 %509 }
 0x2c2   :  { %v640_v58 = vpop.permute.xlu1 %639  ;;  %v516_v59 = vpop.permute.xlu0 %515 }
 0x2c3   :  { %v638_v60 = vpop.permute.xlu2 %637  ;;  %2486 = vmatpush.xpose.msk.msrb.mxu0 %vm394_vm15, %v516_v59  ;;  %2493 = vmatpush.xpose.msk.msra.mxu2 %vm394_vm15, %v640_v58 }
 0x2c7   :  { %2487 = vmatpush.xpose.msk.msrb.mxu0 %vm394_vm15, %v514_v56  ;;  %2494 = vmatpush.xpose.msk.msra.mxu2 %vm394_vm15, %v638_v60 }
 0x2ca   :  { %v763_v61 = vpop.permute.xlu1 %762  ;;  %2488 = vmatmul.msk.f32.vlgmr.msrb.gmra.mxu0 %vm394_vm15, %v510_v57 }
 0x2cb   :  { %v634_v62 = vpop.permute.xlu0 %633  ;;  %v512_v63 = vpop.permute.xlu2 %511  ;;  %2500 = vmatpush.xpose.msk.msra.mxu0 %vm394_vm15, %v763_v61 }
 0x2cc   :  { %2495 = vmatmul.msk.f32.vlgmr.msra.gmra.mxu2 %vm394_vm15, %v634_v62 }
 0x2d2   :  { %2489 = vmatmul.msk.f32.gmra.mxu0 %vm394_vm15, %v512_v63  ;;  %v757_v2 = vpop.permute.xlu1 %756 }
 0x2d3   :  { %v636_v0 = vpop.permute.xlu0 %635  ;;  %v761_v1 = vpop.permute.xlu2 %760 }
 0x2d4   :  { %2496 = vmatmul.msk.f32.gmra.mxu2 %vm394_vm15, %v636_v0  ;;  %2501 = vmatpush.xpose.msk.msra.mxu0 %vm394_vm15, %v761_v1 }
 0x2da   :  { %2502 = vmatmul.msk.f32.vlgmr.msra.gmra.mxu0 %vm394_vm15, %v757_v2 }
 0x2db   :  { %v759_v3 = vpop.permute.xlu0 %758 }
 0x2e2   :  { %2503 = vmatmul.msk.f32.gmra.mxu0 %vm394_vm15, %v759_v3 }
 0x330   :  { %v420_v10 = vpop.f32.mrf.mxu0  ;;  %v423_v11 = vpop.f32.mrf.mxu1 }
 0x331   :  { %v421_v12 = vadd.f32 %v420_v10, %v3207_v9  ;;  %v424_v13 = vadd.f32 %v423_v11, %v3203_v6 }
 0x333   :  { %v431_v14 = vsel %vm430_vm1, %v424_v13, -inf  ;;  %v427_v15 = vsel %vm426_vm4, %v421_v12, -inf }
 0x334   :  { %432 = vmax.xlane.f32.xlu0 %v431_v14  ;;  %428 = vmax.xlane.f32.xlu2 %v427_v15 }
 0x347   :  { %v542_v16 = vpop.f32.mrf.mxu0 }
 0x348   :  { %v543_v21 = vadd.f32 %v542_v16, %v3207_v9 }
 0x34a   :  { %v548_v28 = vsel %vm426_vm4, %v543_v21, -inf }
 0x34f   :  { %v666_v17 = vpop.f32.mrf.mxu2  ;;  %v545_v18 = vpop.f32.mrf.mxu0 }
 0x350   :  { %v667_v19 = vadd.f32 %v666_v17, %v3207_v9  ;;  %v546_v30 = vadd.f32 %v545_v18, %v3203_v6 }
 0x352   :  { %v672_v20 = vsel %vm426_vm4, %v667_v19, -inf  ;;  %v551_v33 = vsel %vm430_vm1, %v546_v30, -inf }
 0x353   :  { %673 = vmax.xlane.f32.xlu1 %v672_v20 }
 0x357   :  { %v669_v23 = vpop.f32.mrf.mxu2  ;;  %v789_v24 = vpop.f32.mrf.mxu0 }
 0x358   :  { %v670_v25 = vadd.f32 %v669_v23, %v3203_v6  ;;  %v790_v26 = vadd.f32 %v789_v24, %v3207_v9 }
 0x35a   :  { %v675_v27 = vsel %vm430_vm1, %v670_v25, -inf  ;;  %v795_v29 = vsel %vm426_vm4, %v790_v26, -inf }
 0x35b   :  { %676 = vmax.xlane.f32.xlu2 %v675_v27  ;;  %549 = vmax.xlane.f32.xlu1 %v548_v28 }
 0x35c   :  { %796 = vmax.xlane.f32.xlu0 %v795_v29 }
 0x35f   :  { %v792_v31 = vpop.f32.mrf.mxu0 }
 0x360   :  { %v793_v32 = vadd.f32 %v792_v31, %v3203_v6 }
 0x362   :  { %v798_v34 = vsel %vm430_vm1, %v793_v32, -inf }
 0x363   :  { %552 = vmax.xlane.f32.xlu2 %v551_v33  ;;  %799 = vmax.xlane.f32.xlu1 %v798_v34 }
 0x370   :  { %599 = vrot.lane.b32.xlu0 %v3168_v52, %s2781_s27 }
 0x37c   :  { %597 = vrot.lane.b32.xlu1 %v3170_v53, %s2781_s27 }
 0x3a7   :  { %v433_v35 = vpop.xlane.xlu0 %432  ;;  %v429_v37 = vpop.xlane.xlu2 %428 }
 0x3a8   :  { %v435_v38 = vsub.f32 %v424_v13, %v433_v35  ;;  %v434_v40 = vsub.f32 %v421_v12, %v429_v37 }
 0x3aa   :  { %v438_v41 = vmul.f32 1.442695, %v435_v38  ;;  %v436_v42 = vmul.f32 1.442695, %v434_v40 }
 0x3ac   :  { %2651 = vpow2.f32 %v438_v41 }
 0x3ad   :  { %2653 = vpow2.f32 %v436_v42 }
 0x3b2   :  { %v3229_v43 = vpop.eup %2651 }
 0x3b3   :  { %v3231_v44 = vpop.eup %2653  ;;  %v443_v45 = vsel %vm430_vm1, %v3229_v43, 0.0 }
 0x3b4   :  { %444 = vadd.xlane.f32.xlu1 %v443_v45  ;;  %v440_v46 = vsel %vm426_vm4, %v3231_v44, 0.0 }
 0x3b5   :  { %441 = vadd.xlane.f32.xlu0 %v440_v46 }
 0x3c6   :  { %v674_v47 = vpop.xlane.xlu1 %673 }
 0x3c7   :  { %v678_v49 = vsub.f32 %v667_v19, %v674_v47 }
 0x3c9   :  { %v680_v50 = vmul.f32 1.442695, %v678_v49 }
 0x3cb   :  { %2655 = vpow2.f32 %v680_v50 }
 0x3ce   :  { %v550_v51 = vpop.xlane.xlu1 %549  ;;  %v677_v54 = vpop.xlane.xlu2 %676 }
 0x3cf   :  { %v554_v55 = vsub.f32 %v543_v21, %v550_v51  ;;  %v797_v56 = vpop.xlane.xlu0 %796  ;;  %v679_v60 = vsub.f32 %v670_v25, %v677_v54 }
 0x3d0   :  { %v801_v57 = vsub.f32 %v790_v26, %v797_v56 }
 0x3d1   :  { %v3237_v58 = vpop.eup %2655  ;;  %v556_v59 = vmul.f32 1.442695, %v554_v55  ;;  %v682_v63 = vmul.f32 1.442695, %v679_v60 }
 0x3d2   :  { %v803_v61 = vmul.f32 1.442695, %v801_v57  ;;  %v684_v62 = vsel %vm426_vm4, %v3237_v58, 0.0 }
 0x3d3   :  { %2657 = vpow2.f32 %v556_v59  ;;  %685 = vadd.xlane.f32.xlu2 %v684_v62 }
 0x3d4   :  { %2659 = vpow2.f32 %v803_v61 }
 0x3d5   :  { %2661 = vpow2.f32 %v682_v63 }
 0x3d6   :  { %v553_v0 = vpop.xlane.xlu2 %552  ;;  %v800_v1 = vpop.xlane.xlu1 %799 }
 0x3d7   :  { %v555_v2 = vsub.f32 %v546_v30, %v553_v0  ;;  %v802_v5 = vsub.f32 %v793_v32, %v800_v1 }
 0x3d9   :  { %v3241_v3 = vpop.eup %2657  ;;  %v558_v4 = vmul.f32 1.442695, %v555_v2  ;;  %v805_v11 = vmul.f32 1.442695, %v802_v5 }
 0x3da   :  { %v560_v7 = vsel %vm426_vm4, %v3241_v3, 0.0  ;;  %v3245_v8 = vpop.eup %2659 }
 0x3db   :  { %2663 = vpow2.f32 %v558_v4  ;;  %561 = vadd.xlane.f32.xlu2 %v560_v7  ;;  %v807_v10 = vsel %vm426_vm4, %v3245_v8, 0.0  ;;  %v3249_v12 = vpop.eup %2661 }
 0x3dc   :  { %808 = vadd.xlane.f32.xlu1 %v807_v10  ;;  %2665 = vpow2.f32 %v805_v11  ;;  %v687_v15 = vsel %vm430_vm1, %v3249_v12, 0.0 }
 0x3e1   :  { %v3251_v13 = vpop.eup %2663 }
 0x3e2   :  { %v600_v14 = vpop.permute.xlu0 %599  ;;  %v563_v16 = vsel %vm430_vm1, %v3251_v13, 0.0  ;;  %v3258_v17 = vpop.eup %2665 }
 0x3e3   :  { %2490 = vmatpush.msk.msrb.mxu1 %vm482_vm14, %v600_v14  ;;  %688 = vadd.xlane.f32.xlu2 %v687_v15  ;;  %v810_v18 = vsel %vm430_vm1, %v3258_v17, 0.0 }
 0x3e4   :  { %564 = vadd.xlane.f32.xlu0 %v563_v16 }
 0x3eb   :  { %811 = vadd.xlane.f32.xlu2 %v810_v18 }
 0x3ee   :  { %v598_v19 = vpop.permute.xlu1 %597 }
 0x3ef   :  { %625 = vmatpush.msrb.mxu1 %v598_v19 }
 0x3f5   :  { %843 = vrot.lane.b32.xlu1 %v3170_v53, %s2780_s26 }
 0x3f8   :  { %720 = vrot.lane.b32.xlu0 %v3170_v53, %s2779_s25 }
 0x400   :  { %845 = vrot.lane.b32.xlu0 %v3168_v52, %s2780_s26 }
 0x403   :  { %722 = vrot.lane.b32.xlu2 %v3168_v52, %s2779_s25 }
 0x427   :  { %v445_v20 = vpop.xlane.xlu1 %444 }
 0x428   :  { %2667 = vrcp.f32 %v445_v20  ;;  %v442_v21 = vpop.xlane.xlu0 %441  ;;  %v472_v35 = vand.u32 2147483648, %v445_v20  ;;  %vm466_vm11 = vweird.f32 %v445_v20  ;;  %v470_v40 = vand.u32 2147483647, %v445_v20 }
 0x429   :  { %2669 = vrcp.f32 %v442_v21  ;;  %v457_v29 = vand.u32 2147483648, %v442_v21  ;;  %v455_v53 = vand.u32 2147483647, %v442_v21  ;;  %vm451_vm7 = vweird.f32 %v442_v21 }
 0x42a   :  { %v473_v42 = vor.u32 1.1754944e-38, %v472_v35  ;;  %vm471_vm13 = vcmp.eq.f32.partialorder %v470_v40, 8.507059e+37 }
 0x42b   :  { %v458_v33 = vor.u32 1.1754944e-38, %v457_v29  ;;  %vm456_vm9 = vcmp.eq.f32.partialorder %v455_v53, 8.507059e+37 }
 0x42e   :  { %v2668_v23 = vpop.eup %2667 }
 0x42f   :  { %v2670_v24 = vpop.eup %2669  ;;  %v462_v25 = vmul.f32 %v2668_v23, %v445_v20  ;;  %vm467_vm10 = vweird.f32 %v2668_v23 }
 0x430   :  { %v447_v26 = vmul.f32 %v2670_v24, %v442_v21  ;;  %vm452_vm3 = vweird.f32 %v2670_v24  ;;  %vm468_vm12 = vmor %vm466_vm11, %vm467_vm10 }
 0x431   :  { %v463_v27 = vsub.f32 1.0, %v462_v25  ;;  %vm453_vm8 = vmor %vm451_vm7, %vm452_vm3 }
 0x432   :  { %v448_v28 = vsub.f32 1.0, %v447_v26 }
 0x433   :  { %v464_v30 = vmul.f32 %v2668_v23, %v463_v27  ;;  %v911_v27 = vld [vmem:[%s4226_s4] sm:$0xff] }
 0x434   :  { %v449_v31 = vmul.f32 %v2670_v24, %v448_v28 }
 0x435   :  { %v465_v34 = vadd.f32 %v2668_v23, %v464_v30 }
 0x436   :  { %v450_v32 = vadd.f32 %v2670_v24, %v449_v31 }
 0x437   :  { %v469_v41 = vsel %vm468_vm12, %v2668_v23, %v465_v34 }
 0x438   :  { %v454_v52 = vsel %vm453_vm8, %v2670_v24, %v450_v32  ;;  %v474_v45 = vsel %vm471_vm13, %v473_v42, %v469_v41 }
 0x439   :  { %v459_v37 = vsel %vm456_vm9, %v458_v33, %v454_v52  ;;  %v475_v46 = vmul.f32 %v3229_v43, %v474_v45 }
 0x43a   :  { %v460_v38 = vmul.f32 %v3231_v44, %v459_v37 }
 0x43c   :  { %2484 = vmatmul.msk.f32.vlgmr.msrb.gmra.mxu3 %vm426_vm4, %v460_v38 }
 0x444   :  { %2485 = vmatmul.msk.f32.gmra.mxu3 %vm426_vm4, %v475_v46 }
 0x446   :  { %v686_v47 = vpop.xlane.xlu2 %685 }
 0x447   :  { %2671 = vrcp.f32 %v686_v47  ;;  %v701_v21 = vand.u32 2147483648, %v686_v47  ;;  %vm695_vm10 = vweird.f32 %v686_v47  ;;  %v699_v24 = vand.u32 2147483647, %v686_v47 }
 0x449   :  { %v702_v53 = vor.u32 1.1754944e-38, %v701_v21  ;;  %v916_v21 = vld [vmem:[%s4226_s4 + $0x28] sm:$0xff] }
 0x44d   :  { %v2672_v50 = vpop.eup %2671 }
 0x44e   :  { %v562_v49 = vpop.xlane.xlu2 %561  ;;  %v691_v44 = vmul.f32 %v2672_v50, %v686_v47  ;;  %vm696_vm9 = vweird.f32 %v2672_v50 }
 0x44f   :  { %2673 = vrcp.f32 %v562_v49  ;;  %v3274_v51 = vpop.xlane.xlu1 %808  ;;  %v577_v60 = vand.u32 2147483648, %v562_v49  ;;  %v575_v62 = vand.u32 2147483647, %v562_v49  ;;  %vm571_vm3 = vweird.f32 %v562_v49  ;;  %vm3293_vm11 = vmor %vm695_vm10, %vm696_vm9 }
 0x450   :  { %2675 = vrcp.f32 %v3274_v51  ;;  %v692_v43 = vsub.f32 1.0, %v691_v44 }
 0x451   :  { %v578_v4 = vor.u32 1.1754944e-38, %v577_v60  ;;  %vm576_vm8 = vcmp.eq.f32.partialorder %v575_v62, 8.507059e+37 }
 0x452   :  { %v693_v0 = vmul.f32 %v2672_v50, %v692_v43 }
 0x454   :  { %v694_v18 = vadd.f32 %v2672_v50, %v693_v0 }
 0x455   :  { %v2674_v54 = vpop.eup %2673 }
 0x456   :  { %v567_v55 = vmul.f32 %v2674_v54, %v562_v49  ;;  %v3277_v56 = vpop.xlane.xlu2 %688  ;;  %vm572_vm0 = vweird.f32 %v2674_v54  ;;  %v3280_v63 = vpop.eup %2675  ;;  %v698_v30 = vsel %vm3293_vm11, %v2672_v50, %v694_v18 }
 0x457   :  { %v565_v57 = vpop.xlane.xlu0 %564  ;;  %2677 = vrcp.f32 %v3277_v56  ;;  %vm573_vm7 = vmor %vm571_vm3, %vm572_vm0  ;;  %v814_v10 = vmul.f32 %v3280_v63, %v3274_v51  ;;  %vm700_vm0 = vcmp.eq.f32.partialorder %v699_v24, 8.507059e+37  ;;  %vm819_vm9 = vweird.f32 %v3280_v63  ;;  %v914_v24 = vld [vmem:[%s4226_s4 + $0x18] sm:$0xff] }
 0x458   :  { %v568_v59 = vsub.f32 1.0, %v567_v55  ;;  %2679 = vrcp.f32 %v565_v57  ;;  %v592_v26 = vand.u32 2147483648, %v565_v57  ;;  %v590_v29 = vand.u32 2147483647, %v565_v57 }
 0x459   :  { %v815_v25 = vsub.f32 1.0, %v814_v10  ;;  %vm586_vm13 = vweird.f32 %v565_v57  ;;  %v703_v37 = vsel %vm700_vm0, %v702_v53, %v698_v30  ;;  %vm710_vm10 = vweird.f32 %v3277_v56 }
 0x45a   :  { %v569_v61 = vmul.f32 %v2674_v54, %v568_v59  ;;  %v593_v52 = vor.u32 1.1754944e-38, %v592_v26  ;;  %v716_v42 = vand.u32 2147483648, %v3277_v56  ;;  %v704_v50 = vmul.f32 %v3237_v58, %v703_v37  ;;  %v912_v26 = vld [vmem:[%s4226_s4 + $0x8] sm:$0xff] }
 0x45b   :  { %v816_v33 = vmul.f32 %v3280_v63, %v815_v25  ;;  %v714_v44 = vand.u32 2147483647, %v3277_v56  ;;  %v822_v55 = vand.u32 2147483647, %v3274_v51  ;;  %v913_v25 = vld [vmem:[%s4226_s4 + $0x10] sm:$0xff] }
 0x45c   :  { %v570_v1 = vadd.f32 %v2674_v54, %v569_v61  ;;  %v717_v58 = vor.u32 1.1754944e-38, %v716_v42 }
 0x45d   :  { %v3282_v2 = vpop.eup %2677  ;;  %v817_v46 = vadd.f32 %v3280_v63, %v816_v33  ;;  %vm715_vm0 = vcmp.eq.f32.partialorder %v714_v44, 8.507059e+37 }
 0x45e   :  { %v2680_v5 = vpop.eup %2679  ;;  %v574_v7 = vsel %vm573_vm7, %v2674_v54, %v570_v1  ;;  %v706_v11 = vmul.f32 %v3282_v2, %v3277_v56  ;;  %v3288_v14 = vpop.xlane.xlu2 %811  ;;  %vm591_vm7 = vcmp.eq.f32.partialorder %v590_v29, 8.507059e+37  ;;  %v824_v54 = vand.u32 2147483648, %v3274_v51 }
 0x45f   :  { %v579_v15 = vsel %vm576_vm8, %v578_v4, %v574_v7  ;;  %v582_v16 = vmul.f32 %v2680_v5, %v565_v57  ;;  %2681 = vrcp.f32 %v3288_v14  ;;  %vm587_vm12 = vweird.f32 %v2680_v5 }
 0x460   :  { %v707_v19 = vsub.f32 1.0, %v706_v11  ;;  %v580_v20 = vmul.f32 %v3241_v3, %v579_v15  ;;  %vm588_vm3 = vmor %vm586_vm13, %vm587_vm12  ;;  %vm711_vm8 = vweird.f32 %v3282_v2  ;;  %vm818_vm12 = vweird.f32 %v3274_v51 }
 0x461   :  { %v583_v23 = vsub.f32 1.0, %v582_v16  ;;  %vm712_vm11 = vmor %vm710_vm10, %vm711_vm8  ;;  %v825_v43 = vor.u32 1.1754944e-38, %v824_v54  ;;  %v839_v0 = vand.u32 2147483648, %v3288_v14  ;;  %vm833_vm8 = vweird.f32 %v3288_v14 }
 0x462   :  { %2491 = vmatmul.msk.f32.vlgmr.msrb.gmra.mxu1 %vm426_vm4, %v580_v20  ;;  %v708_v3 = vmul.f32 %v3282_v2, %v707_v19  ;;  %vm820_vm13 = vmor %vm818_vm12, %vm819_vm9  ;;  %v918_v19 = vld [vmem:[%s4226_s4 + $0x38] sm:$0xff]  ;;  %v917_v20 = vld [vmem:[%s4226_s4 + $0x30] sm:$0xff]  ;;  %vm908_vm12 = vcmask 392192  }
 0x463   :  { %v584_v28 = vmul.f32 %v2680_v5, %v583_v23  ;;  %v821_v56 = vsel %vm820_vm13, %v3280_v63, %v817_v46  ;;  %v840_v4 = vor.u32 1.1754944e-38, %v839_v0  ;;  %934 = vmatpush.msrb.mxu2 %v918_v19  ;;  %v915_v23 = vld [vmem:[%s4226_s4 + $0x20] sm:$0xff] }
 0x464   :  { %v709_v41 = vadd.f32 %v3282_v2, %v708_v3  ;;  %v1016_v0 = vld [vmem:[%s4227_s5 + $0x60] sm:$0xff] }
 0x465   :  { %v2682_v31 = vpop.eup %2681  ;;  %v585_v32 = vadd.f32 %v2680_v5, %v584_v28  ;;  %935 = vmatpush.msrb.mxu2 %v917_v20 }
 0x466   :  { %v829_v34 = vmul.f32 %v2682_v31, %v3288_v14  ;;  %v723_v35 = vpop.permute.xlu2 %722 }
 0x467   :  { %2497 = vmatpush.msk.msra.mxu3 %vm482_vm14, %v723_v35  ;;  %v589_v38 = vsel %vm588_vm3, %v2680_v5, %v585_v32  ;;  %vm823_vm3 = vcmp.eq.f32.partialorder %v822_v55, 8.507059e+37  ;;  %v844_v1 = vpop.permute.xlu1 %843  ;;  %936 = vmatpush.msrb.mxu2 %v916_v21 }
 0x468   :  { %v594_v40 = vsel %vm591_vm7, %v593_v52, %v589_v38  ;;  %v830_v47 = vsub.f32 1.0, %v829_v34  ;;  %v826_v60 = vsel %vm823_vm3, %v825_v43, %v821_v56  ;;  %vm834_vm7 = vweird.f32 %v2682_v31 }
 0x469   :  { %v595_v45 = vmul.f32 %v3251_v13, %v594_v40  ;;  %v713_v13 = vsel %vm712_vm11, %v3282_v2, %v709_v41  ;;  %v827_v63 = vmul.f32 %v3245_v8, %v826_v60  ;;  %v837_v2 = vand.u32 2147483647, %v3288_v14  ;;  %vm835_vm9 = vmor %vm833_vm8, %vm834_vm7  ;;  %937 = vmatpush.msrb.mxu2 %v915_v23 }
 0x46a   :  { %v721_v49 = vpop.permute.xlu0 %720  ;;  %v831_v57 = vmul.f32 %v2682_v31, %v830_v47  ;;  %v718_v59 = vsel %vm715_vm0, %v717_v58, %v713_v13  ;;  %vm905_vm11 = vcmask 261120   ;;  %v919_v38 = vperm.slane %v3150_v22, 5 }
 0x46b   :  { %2492 = vmatmul.msk.f32.gmra.mxu1 %vm426_vm4, %v595_v45  ;;  %748 = vmatpush.msra.mxu3 %v721_v49  ;;  %v719_v62 = vmul.f32 %v3249_v12, %v718_v59  ;;  %vm838_vm10 = vcmp.eq.f32.partialorder %v837_v2, 8.507059e+37  ;;  %v949_v40 = vperm.slane %v3150_v22, 6  ;;  %v1015_v2 = vld [vmem:[%s4227_s5 + $0x58] sm:$0xff] }
 0x46c   :  { %2498 = vmatmul.msk.f32.vlgmr.msra.gmra.mxu3 %vm426_vm4, %v704_v50  ;;  %v832_v51 = vadd.f32 %v2682_v31, %v831_v57  ;;  %938 = vmatpush.msrb.mxu2 %v914_v24 }
 0x46e   :  { %v836_v12 = vsel %vm835_vm9, %v2682_v31, %v832_v51  ;;  %939 = vmatpush.msrb.mxu2 %v913_v25  ;;  %v1019_v51 = vld [vmem:[%s4227_s5 + $0x78] sm:$0xff] }
 0x46f   :  { %v841_v5 = vsel %vm838_vm10, %v840_v4, %v836_v12  ;;  %1059 = vmatpush.msrb.mxu0 %v1019_v51  ;;  %v1012_v12 = vld [vmem:[%s4227_s5 + $0x40] sm:$0xff]  ;;  %v1013_v4 = vld [vmem:[%s4227_s5 + $0x48] sm:$0xff] }
 0x470   :  { %v842_v7 = vmul.f32 %v3258_v17, %v841_v5  ;;  %940 = vmatpush.msrb.mxu2 %v912_v26  ;;  %v1010_v5 = vld [vmem:[%s4227_s5 + $0x30] sm:$0xff] }
 0x472   :  { %v846_v61 = vpop.permute.xlu0 %845  ;;  %941 = vmatpush.msrb.mxu2 %v911_v27 }
 0x473   :  { %2504 = vmatpush.msk.msra.mxu1 %vm482_vm14, %v846_v61 }
 0x474   :  { %2499 = vmatmul.msk.f32.gmra.mxu3 %vm426_vm4, %v719_v62  ;;  %v1018_v62 = vld [vmem:[%s4227_s5 + $0x70] sm:$0xff] }
 0x475   :  { %871 = vmatpush.msra.mxu1 %v844_v1  ;;  %1036 = vmatpush.msrb.mxu3 %v1018_v62  ;;  %v1017_v1 = vld [vmem:[%s4227_s5 + $0x68] sm:$0xff]  ;;  %v1276_v62 = vld [vmem:[%s4228_s6 + $0xd0] sm:$0xff] }
 0x476   :  { %2505 = vmatmul.msk.f32.vlgmr.msra.gmra.mxu1 %vm426_vm4, %v827_v63  ;;  %1060 = vmatpush.msrb.mxu0 %v1017_v1  ;;  %v1014_v63 = vld [vmem:[%s4227_s5 + $0x50] sm:$0xff]  ;;  %v1275_v1 = vld [vmem:[%s4228_s6 + $0xc8] sm:$0xff] }
 0x477   :  { %1037 = vmatpush.msrb.mxu3 %v1016_v0  ;;  %v1262_v0 = vld [vmem:[%s4228_s6 + $0x60] sm:$0xff] }
 0x478   :  { %1061 = vmatpush.msrb.mxu0 %v1015_v2 }
 0x479   :  { %1038 = vmatpush.msrb.mxu3 %v1014_v63 }
 0x47a   :  { %1062 = vmatpush.msrb.mxu0 %v1013_v4  ;;  %v1261_v4 = vld [vmem:[%s4228_s6 + $0x58] sm:$0xff] }
 0x47b   :  { %1039 = vmatpush.msrb.mxu3 %v1012_v12 }
 0x47d   :  { %1040 = vmatpush.msrb.mxu3 %v1010_v5  ;;  %v1274_v5 = vld [vmem:[%s4228_s6 + $0xc0] sm:$0xff] }
 0x47e   :  { %2506 = vmatmul.msk.f32.gmra.mxu1 %vm426_vm4, %v842_v7  ;;  %v1011_v7 = vld [vmem:[%s4227_s5 + $0x38] sm:$0xff] }
 0x47f   :  { %1063 = vmatpush.msrb.mxu0 %v1011_v7 }
 0x4bf   :  { %v503_v10 = vpop.f32.mrf.mxu3 }
 0x4c7   :  { %v506_v15 = vpop.f32.mrf.mxu3 }
 0x4df   :  { %v627_v11 = vpop.f32.mrf.mxu1 }
 0x4e0   :  { %881 = vrot.lane.b32.xlu0 %v627_v11, %s2778_s24  ;;  %v1009_v11 = vld [vmem:[%s4227_s5 + $0x28] sm:$0xff] }
 0x4e1   :  { %1064 = vmatpush.msrb.mxu0 %v1009_v11 }
 0x4e8   :  { %v630_v8 = vpop.f32.mrf.mxu1 }
 0x4e9   :  { %883 = vrot.lane.b32.xlu0 %v630_v8, %s2778_s24  ;;  %v1007_v8 = vld [vmem:[%s4227_s5 + $0x18] sm:$0xff] }
 0x4ea   :  { %1065 = vmatpush.msrb.mxu0 %v1007_v8  ;;  %v1260_v8 = vld [vmem:[%s4228_s6 + $0x50] sm:$0xff] }
 0x4ef   :  { %v750_v14 = vpop.f32.mrf.mxu3 }
 0x4f0   :  { %889 = vrot.lane.b32.xlu1 %v750_v14, %s2776_s22  ;;  %v1004_v14 = vld [vmem:[%s4227_s5] sm:$0xff] }
 0x4f3   :  { %v873_v16 = vpop.f32.mrf.mxu1 }
 0x4f4   :  { %897 = vrot.lane.b32.xlu2 %v873_v16, %s2777_s23  ;;  %v1005_v16 = vld [vmem:[%s4227_s5 + $0x8] sm:$0xff] }
 0x4f5   :  { %1066 = vmatpush.msrb.mxu0 %v1005_v16  ;;  %v1273_v16 = vld [vmem:[%s4228_s6 + $0xb8] sm:$0xff] }
 0x4f7   :  { %v753_v18 = vpop.f32.mrf.mxu3 }
 0x4f8   :  { %891 = vrot.lane.b32.xlu1 %v753_v18, %s2776_s22 }
 0x4fb   :  { %v876_v17 = vpop.f32.mrf.mxu1 }
 0x4fc   :  { %899 = vrot.lane.b32.xlu2 %v876_v17, %s2777_s23 }
 0x54e   :  { %v898_v29 = vpop.permute.xlu2 %897 }
 0x552   :  { %v882_v28 = vpop.permute.xlu0 %881 }
 0x553   :  { %v903_v30 = vsel %vm394_vm15, %v503_v10, %v882_v28  ;;  %v1008_v10 = vld [vmem:[%s4227_s5 + $0x20] sm:$0xff] }
 0x554   :  { %1041 = vmatpush.msrb.mxu3 %v1008_v10 }
 0x556   :  { %v900_v34 = vpop.permute.xlu2 %899 }
 0x55b   :  { %v884_v32 = vpop.permute.xlu0 %883 }
 0x55c   :  { %v904_v33 = vsel %vm394_vm15, %v506_v15, %v884_v32  ;;  %v1006_v15 = vld [vmem:[%s4227_s5 + $0x10] sm:$0xff] }
 0x55d   :  { %1042 = vmatpush.msrb.mxu3 %v1006_v15 }
 0x55f   :  { %1043 = vmatpush.msrb.mxu3 %v1004_v14 }
 0x562   :  { %v890_v3 = vpop.permute.xlu1 %889 }
 0x563   :  { %v906_v31 = vsel %vm905_vm11, %v903_v30, %v890_v3 }
 0x564   :  { %v909_v53 = vsel %vm908_vm12, %v906_v31, %v898_v29  ;;  %v3448_v31 = vld [vmem:[%s4224_s2 + $0x20] sm:$0xff] }
 0x565   :  { %2507 = vmatmul.msk.f32.vlgmr.msrb.gmra.mxu2 %vm259_vm5, %v909_v53  ;;  %v998_v53 = vperm.slane %v3150_v22, 7 }
 0x56a   :  { %v892_v52 = vpop.permute.xlu1 %891 }
 0x56b   :  { %v907_v35 = vsel %vm905_vm11, %v904_v33, %v892_v52 }
 0x56c   :  { %v910_v37 = vsel %vm908_vm12, %v907_v35, %v900_v34  ;;  %v1001_v34 = vperm.slane %v3448_v31, 0 }
 0x56d   :  { %2508 = vmatmul.msk.f32.gmra.mxu2 %vm259_vm5, %v910_v37 }
 0x5e8   :  { %v943_v41 = vpop.f32.mrf.mxu2 }
 0x5e9   :  { %v944_v42 = vadd.f32 %v943_v41, %v919_v38 }
 0x5eb   :  { %v950_v45 = vmul.f32 %v949_v40, %v944_v42 }
 0x5ed   :  { %v3372_v46 = vadd.f32 %v950_v45, %v3075_v39 }
 0x5ef   :  { %v954_v47 = vsel %vm259_vm5, %v3372_v46, 0.0 }
 0x5f0   :  { %955 = vadd.xlane.f32.xlu0 %v954_v47  ;;  %v946_v49 = vpop.f32.mrf.mxu2 }
 0x5f1   :  { %v947_v50 = vadd.f32 %v946_v49, %v919_v38  ;;  %v1281_v49 = vld [vmem:[%s4228_s6 + $0xf8] sm:$0xff] }
 0x5f2   :  { %1306 = vmatpush.msra.mxu2 %v1281_v49 }
 0x5f3   :  { %v951_v44 = vmul.f32 %v949_v40, %v947_v50  ;;  %v3464_v50 = vld [vmem:[%s4224_s2 + $0x28] sm:$0xff] }
 0x5f5   :  { %v3377_v54 = vadd.f32 %v951_v44, %v3070_v36  ;;  %v1280_v44 = vld [vmem:[%s4228_s6 + $0xf0] sm:$0xff] }
 0x5f6   :  { %1307 = vmatpush.msra.mxu2 %v1280_v44 }
 0x5f7   :  { %v957_v55 = vsel %vm263_vm6, %v3377_v54, 0.0 }
 0x5f8   :  { %958 = vadd.xlane.f32.xlu1 %v957_v55  ;;  %v1021_v55 = vperm.slane %v3464_v50, 1 }
 0x663   :  { %v956_v13 = vpop.xlane.xlu0 %955 }
 0x664   :  { %v960_v58 = vmul.f32 %v956_v13, %v3081_v48  ;;  %v1279_v13 = vld [vmem:[%s4228_s6 + $0xe8] sm:$0xff] }
 0x665   :  { %1308 = vmatpush.msra.mxu2 %v1279_v13  ;;  %v1255_v13 = vld [vmem:[%s4228_s6 + $0x28] sm:$0xff] }
 0x666   :  { %v3383_v39 = vsub.f32 %v3372_v46, %v960_v58  ;;  %v1265_v58 = vld [vmem:[%s4228_s6 + $0x78] sm:$0xff] }
 0x667   :  { %1283 = vmatpush.msrb.mxu1 %v1265_v58  ;;  %v1268_v58 = vld [vmem:[%s4228_s6 + $0x90] sm:$0xff] }
 0x668   :  { %v964_v56 = vmul.f32 %v3383_v39, %v3383_v39 }
 0x66a   :  { %v966_v57 = vsel %vm259_vm5, %v964_v56, 0.0 }
 0x66b   :  { %967 = vadd.xlane.f32.xlu2 %v966_v57  ;;  %v959_v43 = vpop.xlane.xlu1 %958 }
 0x66c   :  { %v961_v36 = vmul.f32 %v959_v43, %v3081_v48  ;;  %v1264_v43 = vld [vmem:[%s4228_s6 + $0x70] sm:$0xff] }
 0x66d   :  { %1284 = vmatpush.msrb.mxu1 %v1264_v43 }
 0x66e   :  { %v3390_v59 = vsub.f32 %v3377_v54, %v961_v36  ;;  %v1277_v36 = vld [vmem:[%s4228_s6 + $0xd8] sm:$0xff] }
 0x670   :  { %v965_v60 = vmul.f32 %v3390_v59, %v3390_v59 }
 0x672   :  { %v969_v61 = vsel %vm263_vm6, %v965_v60, 0.0  ;;  %v1020_v60 = vperm.slane %v3448_v31, 1 }
 0x673   :  { %970 = vadd.xlane.f32.xlu0 %v969_v61  ;;  %v1263_v61 = vld [vmem:[%s4228_s6 + $0x68] sm:$0xff] }
 0x674   :  { %1285 = vmatpush.msrb.mxu1 %v1263_v61 }
 0x676   :  { %1286 = vmatpush.msrb.mxu1 %v1262_v0 }
 0x678   :  { %1287 = vmatpush.msrb.mxu1 %v1261_v4 }
 0x67a   :  { %1288 = vmatpush.msrb.mxu1 %v1260_v8  ;;  %v1266_v8 = vld [vmem:[%s4228_s6 + $0x80] sm:$0xff] }
 0x6de   :  { %v968_v18 = vpop.xlane.xlu2 %967 }
 0x6df   :  { %v972_v17 = vmul.f32 %v968_v18, %v3081_v48 }
 0x6e1   :  { %v974_v19 = vadd.f32 1e-06, %v972_v17 }
 0x6e3   :  { %2683 = vrsqrt.f32 %v974_v19  ;;  %vm982_vm0 = vweird.f32 %v974_v19 }
 0x6e6   :  { %v971_v20 = vpop.xlane.xlu0 %970 }
 0x6e7   :  { %v973_v21 = vmul.f32 %v971_v20, %v3081_v48 }
 0x6e9   :  { %v2684_v23 = vpop.eup %2683  ;;  %v975_v24 = vadd.f32 1e-06, %v973_v21 }
 0x6ea   :  { %v977_v25 = vmul.f32 %v2684_v23, %v974_v19  ;;  %vm983_vm13 = vweird.f32 %v2684_v23  ;;  %v1259_v19 = vld [vmem:[%s4228_s6 + $0x48] sm:$0xff] }
 0x6eb   :  { %2685 = vrsqrt.f32 %v975_v24  ;;  %vm984_vm3 = vmor %vm982_vm0, %vm983_vm13  ;;  %vm992_vm8 = vweird.f32 %v975_v24  ;;  %1289 = vmatpush.msrb.mxu1 %v1259_v19 }
 0x6ec   :  { %v978_v26 = vmul.f32 %v2684_v23, %v977_v25 }
 0x6ee   :  { %v979_v27 = vmul.f32 0.5, %v978_v26  ;;  %v1258_v26 = vld [vmem:[%s4228_s6 + $0x40] sm:$0xff] }
 0x6ef   :  { %1290 = vmatpush.msrb.mxu1 %v1258_v26 }
 0x6f0   :  { %v980_v28 = vsub.f32 1.5, %v979_v27  ;;  %v1271_v27 = vld [vmem:[%s4228_s6 + $0xa8] sm:$0xff] }
 0x6f1   :  { %v2686_v29 = vpop.eup %2685 }
 0x6f2   :  { %v981_v30 = vmul.f32 %v2684_v23, %v980_v28  ;;  %v987_v3 = vmul.f32 %v2686_v29, %v975_v24  ;;  %vm993_vm7 = vweird.f32 %v2686_v29 }
 0x6f3   :  { %vm994_vm9 = vmor %vm992_vm8, %vm993_vm7 }
 0x6f4   :  { %v985_v32 = vsel %vm984_vm3, %v2684_v23, %v981_v30  ;;  %v988_v33 = vmul.f32 %v2686_v29, %v987_v3  ;;  %v1272_v23 = vld [vmem:[%s4228_s6 + $0xb0] sm:$0xff] }
 0x6f5   :  { %v996_v52 = vmul.f32 %v985_v32, %v3383_v39  ;;  %v1278_v39 = vld [vmem:[%s4228_s6 + $0xe0] sm:$0xff] }
 0x6f6   :  { %v989_v35 = vmul.f32 0.5, %v988_v33  ;;  %1309 = vmatpush.msra.mxu2 %v1278_v39  ;;  %v1257_v33 = vld [vmem:[%s4228_s6 + $0x38] sm:$0xff] }
 0x6f7   :  { %v999_v37 = vmul.f32 %v998_v53, %v996_v52  ;;  %v1270_v52 = vld [vmem:[%s4228_s6 + $0xa0] sm:$0xff]  ;;  %1291 = vmatpush.msrb.mxu1 %v1257_v33 }
 0x6f8   :  { %v990_v38 = vsub.f32 1.5, %v989_v35  ;;  %1310 = vmatpush.msra.mxu2 %v1277_v36 }
 0x6f9   :  { %v1002_v40 = vadd.f32 %v1001_v34, %v999_v37 }
 0x6fa   :  { %v991_v41 = vmul.f32 %v2686_v29, %v990_v38  ;;  %1311 = vmatpush.msra.mxu2 %v1276_v62  ;;  %v1254_v62 = vld [vmem:[%s4228_s6 + $0x20] sm:$0xff] }
 0x6fb   :  { %2509 = vmatmul.msk.f32.vlgmr.msrb.gmra.mxu3 %vm259_vm5, %v1002_v40  ;;  %2511 = vmatmul.msk.f32.vlgmr.msrb.gmra.mxu0 %vm259_vm5, %v1002_v40 }
 0x6fc   :  { %v995_v22 = vsel %vm994_vm9, %v2686_v29, %v991_v41  ;;  %1312 = vmatpush.msra.mxu2 %v1275_v1 }
 0x6fd   :  { %v997_v42 = vmul.f32 %v995_v22, %v3390_v59  ;;  %v1256_v22 = vld [vmem:[%s4228_s6 + $0x30] sm:$0xff] }
 0x6fe   :  { %1313 = vmatpush.msra.mxu2 %v1274_v5  ;;  %1292 = vmatpush.msrb.mxu1 %v1256_v22 }
 0x6ff   :  { %v1000_v45 = vmul.f32 %v998_v53, %v997_v42  ;;  %v1269_v42 = vld [vmem:[%s4228_s6 + $0x98] sm:$0xff] }
 0x700   :  { %1314 = vmatpush.msra.mxu2 %v1273_v16  ;;  %1293 = vmatpush.msrb.mxu1 %v1255_v13 }
 0x701   :  { %v1003_v47 = vadd.f32 %v1001_v34, %v1000_v45 }
 0x702   :  { %1315 = vmatpush.msra.mxu2 %v1272_v23  ;;  %1294 = vmatpush.msrb.mxu1 %v1254_v62 }
 0x703   :  { %2510 = vmatmul.msk.f32.gmra.mxu3 %vm259_vm5, %v1003_v47  ;;  %2512 = vmatmul.msk.f32.gmra.mxu0 %vm259_vm5, %v1003_v47 }
 0x704   :  { %1316 = vmatpush.msra.mxu2 %v1271_v27 }
 0x706   :  { %1317 = vmatpush.msra.mxu2 %v1270_v52 }
 0x708   :  { %1318 = vmatpush.msra.mxu2 %v1269_v42 }
 0x70a   :  { %1319 = vmatpush.msra.mxu2 %v1268_v58 }
 0x778   :  { %v1068_v56 = vpop.f32.mrf.mxu0 }
 0x779   :  { %v3479_v57 = vadd.f32 %v1068_v56, %v1021_v55 }
 0x77b   :  { %v3488_v59 = vmul.f32 0.70710677, %v3479_v57 }
 0x77d   :  { %v1122_v51 = vmul.f32 %v3488_v59, %v3488_v59 }
 0x77e   :  { %v1045_v63 = vpop.f32.mrf.mxu3 }
 0x77f   :  { %v3505_v2 = vmin.f32 %v1122_v51, 16.0  ;;  %v3507_v12 = vadd.f32 %v1045_v63, %v1020_v60  ;;  %v1267_v51 = vld [vmem:[%s4228_s6 + $0x88] sm:$0xff] }
 0x780   :  { %v1071_v7 = vpop.f32.mrf.mxu0  ;;  %1320 = vmatpush.msra.mxu2 %v1267_v51 }
 0x781   :  { %v1124_v10 = vmul.f32 2.1237322e-06, %v3505_v2  ;;  %v1135_v11 = vmul.f32 3.8918573e-05, %v3505_v2  ;;  %v3517_v15 = vadd.f32 %v1071_v7, %v1021_v55  ;;  %v3523_v14 = vmul.f32 0.70710677, %v3507_v12 }
 0x782   :  { %1321 = vmatpush.msra.mxu2 %v1266_v8 }
 0x783   :  { %v1125_v18 = vadd.f32 0.00028619796, %v1124_v10  ;;  %v1136_v17 = vadd.f32 0.001143296, %v1135_v11  ;;  %v1082_v20 = vmul.f32 %v3523_v14, %v3523_v14  ;;  %v3534_v21 = vmul.f32 0.70710677, %v3517_v15 }
 0x784   :  { %v1253_v11 = vld [vmem:[%s4228_s6 + $0x18] sm:$0xff] }
 0x785   :  { %v1126_v24 = vmul.f32 %v1125_v18, %v3505_v2  ;;  %v1137_v25 = vmul.f32 %v1136_v17, %v3505_v2  ;;  %v3547_v28 = vmin.f32 %v1082_v20, 16.0  ;;  %v1202_v29 = vmul.f32 %v3534_v21, %v3534_v21  ;;  %1295 = vmatpush.msrb.mxu1 %v1253_v11  ;;  %v1252_v20 = vld [vmem:[%s4228_s6 + $0x10] sm:$0xff] }
 0x786   :  { %v1048_v30 = vpop.f32.mrf.mxu3 }
 0x787   :  { %v1127_v3 = vadd.f32 0.0036580483, %v1126_v24  ;;  %v1138_v53 = vadd.f32 0.014752088, %v1137_v25  ;;  %v3551_v32 = vadd.f32 %v1048_v30, %v1020_v60  ;;  %v1084_v34 = vmul.f32 2.1237322e-06, %v3547_v28  ;;  %1296 = vmatpush.msrb.mxu1 %v1252_v20 }
 0x788   :  { %v1095_v35 = vmul.f32 3.8918573e-05, %v3547_v28  ;;  %v3561_v37 = vmin.f32 %v1202_v29, 16.0  ;;  %v1251_v29 = vld [vmem:[%s4228_s6 + $0x8] sm:$0xff] }
 0x789   :  { %v1128_v38 = vmul.f32 %v1127_v3, %v3505_v2  ;;  %v1139_v40 = vmul.f32 %v1138_v53, %v3505_v2  ;;  %v3566_v41 = vmul.f32 0.70710677, %v3551_v32  ;;  %v1085_v45 = vadd.f32 0.00028619796, %v1084_v34  ;;  %v1250_v3 = vld [vmem:[%s4228_s6] sm:$0xff]  ;;  %1297 = vmatpush.msrb.mxu1 %v1251_v29 }
 0x78a   :  { %v1096_v47 = vadd.f32 0.001143296, %v1095_v35  ;;  %v1204_v49 = vmul.f32 2.1237322e-06, %v3561_v37  ;;  %v1215_v36 = vmul.f32 3.8918573e-05, %v3561_v37 }
 0x78b   :  { %v1140_v44 = vadd.f32 0.112945676, %v1139_v40  ;;  %v1162_v55 = vmul.f32 %v3566_v41, %v3566_v41  ;;  %v1086_v39 = vmul.f32 %v1085_v45, %v3547_v28  ;;  %v1129_v60 = vadd.f32 0.05243302, %v1128_v38  ;;  %1298 = vmatpush.msrb.mxu1 %v1250_v3 }
 0x78c   :  { %v1097_v56 = vmul.f32 %v1096_v47, %v3547_v28  ;;  %v1205_v43 = vadd.f32 0.00028619796, %v1204_v49  ;;  %v1216_v4 = vadd.f32 0.001143296, %v1215_v36 }
 0x78d   :  { %v1141_v61 = vmul.f32 %v1140_v44, %v3505_v2  ;;  %v1087_v0 = vadd.f32 0.0036580483, %v1086_v39  ;;  %v3594_v7 = vmin.f32 %v1162_v55, 16.0  ;;  %v1130_v18 = vmul.f32 %v1129_v60, %v3505_v2 }
 0x78e   :  { %v1098_v1 = vadd.f32 0.014752088, %v1097_v56  ;;  %v1206_v63 = vmul.f32 %v1205_v43, %v3561_v37  ;;  %v1217_v16 = vmul.f32 %v1216_v4, %v3561_v37 }
 0x78f   :  { %v1142_v5 = vadd.f32 0.4994258, %v1141_v61  ;;  %v1088_v19 = vmul.f32 %v1087_v0, %v3547_v28  ;;  %v1164_v27 = vmul.f32 2.1237322e-06, %v3594_v7  ;;  %v1131_v33 = vadd.f32 0.18741608, %v1130_v18 }
 0x790   :  { %v1099_v10 = vmul.f32 %v1098_v1, %v3547_v28  ;;  %v1207_v24 = vadd.f32 0.0036580483, %v1206_v63  ;;  %v1218_v25 = vadd.f32 0.014752088, %v1217_v16  ;;  %v1175_v34 = vmul.f32 3.8918573e-05, %v3594_v7 }
 0x791   :  { %v1143_v17 = vmul.f32 %v1142_v5, %v3505_v2  ;;  %v1089_v52 = vadd.f32 0.05243302, %v1088_v19  ;;  %v1165_v40 = vadd.f32 0.00028619796, %v1164_v27  ;;  %v1132_v45 = vmul.f32 %v1131_v33, %v3505_v2 }
 0x792   :  { %v1100_v23 = vadd.f32 0.112945676, %v1099_v10  ;;  %v1219_v53 = vmul.f32 %v1218_v25, %v3561_v37  ;;  %v1208_v38 = vmul.f32 %v1207_v24, %v3561_v37  ;;  %v1176_v44 = vadd.f32 0.001143296, %v1175_v34 }
 0x793   :  { %v1144_v26 = vadd.f32 1.0, %v1143_v17  ;;  %v1090_v47 = vmul.f32 %v1089_v52, %v3547_v28  ;;  %v1166_v39 = vmul.f32 %v1165_v40, %v3594_v7  ;;  %v1133_v60 = vadd.f32 1.1283791, %v1132_v45 }
 0x794   :  { %v1101_v30 = vmul.f32 %v1100_v23, %v3547_v28  ;;  %v1220_v22 = vadd.f32 0.112945676, %v1219_v53  ;;  %v1209_v13 = vadd.f32 0.05243302, %v1208_v38  ;;  %v1177_v43 = vmul.f32 %v1176_v44, %v3594_v7 }
 0x795   :  { %2687 = vrcp.f32 %v1144_v26  ;;  %v1091_v61 = vadd.f32 0.18741608, %v1090_v47  ;;  %v1154_v1 = vand.u32 2147483647, %v1144_v26  ;;  %v1156_v63 = vand.u32 2147483648, %v1144_v26 }
 0x796   :  { %v1102_v35 = vadd.f32 0.4994258, %v1101_v30  ;;  %v1221_v49 = vmul.f32 %v1220_v22, %v3561_v37  ;;  %v1210_v2 = vmul.f32 %v1209_v13, %v3561_v37  ;;  %v1178_v0 = vadd.f32 0.014752088, %v1177_v43 }
 0x797   :  { %v1167_v4 = vadd.f32 0.0036580483, %v1166_v39  ;;  %v1092_v8 = vmul.f32 %v1091_v61, %v3547_v28  ;;  %vm1150_vm13 = vweird.f32 %v1144_v26  ;;  %v1157_v19 = vor.u32 1.1754944e-38, %v1156_v63 }
 0x798   :  { %v1103_v42 = vmul.f32 %v1102_v35, %v3547_v28  ;;  %v1222_v56 = vadd.f32 0.4994258, %v1221_v49  ;;  %v1179_v11 = vmul.f32 %v1178_v0, %v3594_v7  ;;  %v1211_v17 = vadd.f32 0.18741608, %v1210_v2 }
 0x799   :  { %v1168_v23 = vmul.f32 %v1167_v4, %v3594_v7  ;;  %v1134_v24 = vmul.f32 %v1133_v60, %v3488_v59  ;;  %vm1155_vm3 = vcmp.eq.f32.partialorder %v1154_v1, 8.507059e+37  ;;  %v1093_v30 = vadd.f32 1.1283791, %v1092_v8 }
 0x79a   :  { %v1104_v55 = vadd.f32 1.0, %v1103_v42  ;;  %v1223_v51 = vmul.f32 %v1222_v56, %v3561_v37  ;;  %v1180_v27 = vadd.f32 0.112945676, %v1179_v11  ;;  %v1075_v40 = vmul.f32 0.5, %v3479_v57 }
 0x79b   :  { %v2688_v58 = vpop.eup %2687  ;;  %v1169_v35 = vadd.f32 0.05243302, %v1168_v23  ;;  %v1094_v42 = vmul.f32 %v1093_v30, %v3523_v14 }
 0x79c   :  { %v1146_v36 = vmul.f32 %v2688_v58, %v1144_v26  ;;  %2689 = vrcp.f32 %v1104_v55  ;;  %vm1151_vm10 = vweird.f32 %v2688_v58  ;;  %v3629_v10 = vadd.f32 1.0, %v1223_v51 }
 0x79d   :  { %vm1152_vm0 = vmor %vm1150_vm13, %vm1151_vm10  ;;  %v1116_v53 = vand.u32 2147483648, %v1104_v55  ;;  %v1212_v26 = vmul.f32 %v1211_v17, %v3561_v37  ;;  %v1181_v33 = vmul.f32 %v1180_v27, %v3594_v7  ;;  %v1114_v34 = vand.u32 2147483647, %v1104_v55 }
 0x79e   :  { %v1147_v62 = vsub.f32 1.0, %v1146_v36  ;;  %2691 = vrcp.f32 %v3629_v10  ;;  %vm1110_vm8 = vweird.f32 %v1104_v55  ;;  %v1170_v39 = vmul.f32 %v1169_v35, %v3594_v7 }
 0x79f   :  { %v1182_v22 = vadd.f32 0.4994258, %v1181_v33  ;;  %v1117_v37 = vor.u32 1.1754944e-38, %v1116_v53  ;;  %v1213_v44 = vadd.f32 1.1283791, %v1212_v26  ;;  %vm1115_vm10 = vcmp.eq.f32.partialorder %v1114_v34, 8.507059e+37 }
 0x7a0   :  { %v1148_v5 = vmul.f32 %v2688_v58, %v1147_v62  ;;  %v1236_v36 = vand.u32 2147483648, %v3629_v10  ;;  %v1234_v61 = vand.u32 2147483647, %v3629_v10  ;;  %v1074_v51 = vmul.f32 0.5, %v3507_v12 }
 0x7a1   :  { %v1183_v13 = vmul.f32 %v1182_v22, %v3594_v7  ;;  %v1171_v0 = vadd.f32 0.18741608, %v1170_v39  ;;  %v1214_v4 = vmul.f32 %v1213_v44, %v3534_v21  ;;  %v1076_v33 = vmul.f32 0.5, %v3551_v32 }
 0x7a2   :  { %v2690_v16 = vpop.eup %2689  ;;  %v1149_v18 = vadd.f32 %v2688_v58, %v1148_v5  ;;  %v1237_v1 = vor.u32 1.1754944e-38, %v1236_v36  ;;  %v1282_v35 = vperm.slane %v3448_v31, 2 }
 0x7a3   :  { %v1106_v20 = vmul.f32 %v2690_v16, %v1104_v55  ;;  %vm1111_vm7 = vweird.f32 %v2690_v16  ;;  %v1184_v14 = vadd.f32 1.0, %v1183_v13  ;;  %v1172_v17 = vmul.f32 %v1171_v0, %v3594_v7  ;;  %v2530_v0 = vld [vmem:[%s4225_s3 + $0xe8] sm:$0xff] }
 0x7a4   :  { %v1153_v25 = vsel %vm1152_vm0, %v2688_v58, %v1149_v18  ;;  %v2692_v38 = vpop.eup %2691  ;;  %vm1112_vm9 = vmor %vm1110_vm8, %vm1111_vm7  ;;  %vm1230_vm0 = vweird.f32 %v3629_v10  ;;  %vm1235_vm7 = vcmp.eq.f32.partialorder %v1234_v61, 8.507059e+37 }
 0x7a5   :  { %v1158_v29 = vsel %vm1155_vm3, %v1157_v19, %v1153_v25  ;;  %v1107_v3 = vsub.f32 1.0, %v1106_v20  ;;  %v1226_v47 = vmul.f32 %v2692_v38, %v3629_v10  ;;  %vm1231_vm13 = vweird.f32 %v2692_v38 }
 0x7a6   :  { %v1159_v28 = vmul.f32 %v1158_v29, %v1134_v24  ;;  %2693 = vrcp.f32 %v1184_v14  ;;  %vm1232_vm3 = vmor %vm1230_vm0, %vm1231_vm13  ;;  %v1077_v10 = vmul.f32 0.5, %v3517_v15  ;;  %v1173_v24 = vadd.f32 1.1283791, %v1172_v17  ;;  %v2521_v17 = vld [vmem:[%s4225_s3 + $0xa0] sm:$0xff] }
 0x7a7   :  { %v1108_v52 = vmul.f32 %v2690_v16, %v1107_v3  ;;  %v1227_v56 = vsub.f32 1.0, %v1226_v47  ;;  %v1196_v25 = vand.u32 2147483648, %v1184_v14  ;;  %v1194_v21 = vand.u32 2147483647, %v1184_v14 }
 0x7a8   :  { %v2514_v59 = vclamps-f32 %v1159_v28, 1.0  ;;  %v1174_v7 = vmul.f32 %v1173_v24, %v3566_v41  ;;  %v2518_v24 = vld [vmem:[%s4225_s3 + $0x88] sm:$0xff] }
 0x7a9   :  { %v1109_v45 = vadd.f32 %v2690_v16, %v1108_v52  ;;  %v1228_v55 = vmul.f32 %v2692_v38, %v1227_v56  ;;  %v1197_v3 = vor.u32 1.1754944e-38, %v1196_v25  ;;  %vm1195_vm13 = vcmp.eq.f32.partialorder %v1194_v21, 8.507059e+37 }
 0x7aa   :  { %v1243_v49 = vadd.f32 1.0, %v2514_v59  ;;  %v1329_v59 = vperm.slane %v3448_v31, 3 }
 0x7ab   :  { %v1113_v58 = vsel %vm1112_vm9, %v2690_v16, %v1109_v45  ;;  %v1229_v2 = vadd.f32 %v2692_v38, %v1228_v55  ;;  %vm1190_vm9 = vweird.f32 %v1184_v14 }
 0x7ac   :  { %v1247_v57 = vmul.f32 %v1243_v49, %v1075_v40  ;;  %v1118_v43 = vsel %vm1115_vm10, %v1117_v37, %v1113_v58  ;;  %v2694_v18 = vpop.eup %2693 }
 0x7ad   :  { %v1119_v60 = vmul.f32 %v1118_v43, %v1094_v42  ;;  %v1233_v5 = vsel %vm1232_vm3, %v2692_v38, %v1229_v2  ;;  %v1186_v20 = vmul.f32 %v2694_v18, %v1184_v14  ;;  %vm1191_vm8 = vweird.f32 %v2694_v18  ;;  %v2532_v2 = vld [vmem:[%s4225_s3 + $0xf8] sm:$0xff] }
 0x7ae   :  { %1322 = vmatmul.f32.vlgmr.msra.gmra.mxu2 %v1247_v57  ;;  %v1238_v11 = vsel %vm1235_vm7, %v1237_v1, %v1233_v5  ;;  %vm1192_vm10 = vmor %vm1190_vm9, %vm1191_vm8  ;;  %1440 = vmatpush.msra.mxu0 %v2532_v2  ;;  %v2527_v1 = vld [vmem:[%s4225_s3 + $0xd0] sm:$0xff]  ;;  %v2526_v5 = vld [vmem:[%s4225_s3 + $0xc8] sm:$0xff] }
 0x7af   :  { %v2513_v62 = vclamps-f32 %v1119_v60, 1.0  ;;  %v1239_v16 = vmul.f32 %v1238_v11, %v1214_v4  ;;  %v1187_v23 = vsub.f32 1.0, %v1186_v20  ;;  %v2525_v4 = vld [vmem:[%s4225_s3 + $0xc0] sm:$0xff]  ;;  %v2523_v11 = vld [vmem:[%s4225_s3 + $0xb0] sm:$0xff] }
 0x7b0   :  { %1441 = vmatpush.msra.mxu0 %v2530_v0 }
 0x7b1   :  { %v1242_v63 = vadd.f32 1.0, %v2513_v62  ;;  %v2516_v19 = vclamps-f32 %v1239_v16, 1.0  ;;  %v1188_v29 = vmul.f32 %v2694_v18, %v1187_v23  ;;  %v2531_v62 = vld [vmem:[%s4225_s3 + $0xf0] sm:$0xff]  ;;  %v2517_v23 = vld [vmem:[%s4225_s3 + $0x80] sm:$0xff] }
 0x7b2   :  { %1417 = vmatpush.msra.mxu3 %v2531_v62 }
 0x7b3   :  { %v1246_v8 = vmul.f32 %v1242_v63, %v1074_v51  ;;  %v1245_v12 = vadd.f32 1.0, %v2516_v19  ;;  %v1189_v30 = vadd.f32 %v2694_v18, %v1188_v29  ;;  %v2529_v51 = vld [vmem:[%s4225_s3 + $0xe0] sm:$0xff]  ;;  %v2528_v63 = vld [vmem:[%s4225_s3 + $0xd8] sm:$0xff]  ;;  %v2522_v19 = vld [vmem:[%s4225_s3 + $0xa8] sm:$0xff] }
 0x7b4   :  { %1418 = vmatpush.msra.mxu3 %v2529_v51  ;;  %1442 = vmatpush.msra.mxu0 %v2528_v63 }
 0x7b5   :  { %1299 = vmatmul.f32.vlgmr.msrb.gmra.mxu1 %v1246_v8  ;;  %v1249_v27 = vmul.f32 %v1245_v12, %v1077_v10  ;;  %v1193_v28 = vsel %vm1192_vm10, %v2694_v18, %v1189_v30  ;;  %v2524_v8 = vld [vmem:[%s4225_s3 + $0xb8] sm:$0xff]  ;;  %v2519_v10 = vld [vmem:[%s4225_s3 + $0x90] sm:$0xff] }
 0x7b6   :  { %v1198_v53 = vsel %vm1195_vm13, %v1197_v3, %v1193_v28  ;;  %1419 = vmatpush.msra.mxu3 %v2527_v1  ;;  %1443 = vmatpush.msra.mxu0 %v2526_v5  ;;  %v2520_v12 = vld [vmem:[%s4225_s3 + $0x98] sm:$0xff] }
 0x7b7   :  { %1325 = vmatmul.f32.gmra.mxu2 %v1249_v27  ;;  %v1199_v26 = vmul.f32 %v1198_v53, %v1174_v7  ;;  %v1378_v53 = vperm.slane %v3448_v31, 4 }
 0x7b8   :  { %1420 = vmatpush.msra.mxu3 %v2525_v4  ;;  %1444 = vmatpush.msra.mxu0 %v2524_v8 }
 0x7b9   :  { %v2515_v15 = vclamps-f32 %v1199_v26, 1.0 }
 0x7ba   :  { %1421 = vmatpush.msra.mxu3 %v2523_v11  ;;  %1445 = vmatpush.msra.mxu0 %v2522_v19 }
 0x7bb   :  { %v1244_v52 = vadd.f32 1.0, %v2515_v15 }
 0x7bc   :  { %1422 = vmatpush.msra.mxu3 %v2521_v17  ;;  %1446 = vmatpush.msra.mxu0 %v2520_v12 }
 0x7bd   :  { %v1248_v34 = vmul.f32 %v1244_v52, %v1076_v33  ;;  %v1381_v52 = vperm.slane %v3448_v31, 5 }
 0x7be   :  { %1423 = vmatpush.msra.mxu3 %v2519_v10  ;;  %1447 = vmatpush.msra.mxu0 %v2518_v24 }
 0x7bf   :  { %1302 = vmatmul.f32.gmra.mxu1 %v1248_v34 }
 0x7c0   :  { %1424 = vmatpush.msra.mxu3 %v2517_v23 }
 0x831   :  { %v1323_v22 = vpop.f32.mrf.mxu2 }
 0x832   :  { %v1300_v38 = vpop.f32.mrf.mxu1 }
 0x833   :  { %v1301_v40 = vadd.f32 %v1300_v38, %v1282_v35 }
 0x835   :  { %v1324_v42 = vadd.f32 %v1323_v22, %v1301_v40 }
 0x837   :  { %v1330_v45 = vmul.f32 %v1329_v59, %v1324_v42 }
 0x839   :  { %v3655_v41 = vadd.f32 %v1330_v45, %v3372_v46 }
 0x83a   :  { %v1326_v37 = vpop.f32.mrf.mxu2 }
 0x83b   :  { %v1334_v47 = vsel %vm259_vm5, %v3655_v41, 0.0 }
 0x83c   :  { %1335 = vadd.xlane.f32.xlu1 %v1334_v47  ;;  %v1303_v32 = vpop.f32.mrf.mxu1 }
 0x83d   :  { %v1304_v49 = vadd.f32 %v1303_v32, %v1282_v35 }
 0x83f   :  { %v1327_v44 = vadd.f32 %v1326_v37, %v1304_v49 }
 0x841   :  { %v1331_v13 = vmul.f32 %v1329_v59, %v1327_v44  ;;  %v1401_v44 = vperm.slane %v3448_v31, 6 }
 0x843   :  { %v3660_v58 = vadd.f32 %v1331_v13, %v3377_v54 }
 0x845   :  { %v1337_v39 = vsel %vm263_vm6, %v3660_v58, 0.0 }
 0x846   :  { %1338 = vadd.xlane.f32.xlu2 %v1337_v39 }
 0x8af   :  { %v1336_v56 = vpop.xlane.xlu1 %1335 }
 0x8b0   :  { %v1340_v46 = vmul.f32 %v1336_v56, %v3081_v48 }
 0x8b2   :  { %v1342_v57 = vsub.f32 %v3655_v41, %v1340_v46  ;;  %v1402_v46 = vperm.slane %v3464_v50, 6 }
 0x8b4   :  { %v1344_v43 = vmul.f32 %v1342_v57, %v1342_v57 }
 0x8b6   :  { %v1346_v36 = vsel %vm259_vm5, %v1344_v43, 0.0 }
 0x8b7   :  { %1347 = vadd.xlane.f32.xlu0 %v1346_v36 }
 0x8b9   :  { %v1339_v14 = vpop.xlane.xlu2 %1338 }
 0x8ba   :  { %v1341_v60 = vmul.f32 %v1339_v14, %v3081_v48 }
 0x8bc   :  { %v3669_v55 = vsub.f32 %v3660_v58, %v1341_v60 }
 0x8be   :  { %v1345_v54 = vmul.f32 %v3669_v55, %v3669_v55 }
 0x8c0   :  { %v1349_v61 = vsel %vm263_vm6, %v1345_v54, 0.0 }
 0x8c1   :  { %1350 = vadd.xlane.f32.xlu1 %v1349_v61 }
 0x92a   :  { %v1348_v16 = vpop.xlane.xlu0 %1347 }
 0x92b   :  { %v1352_v18 = vmul.f32 %v1348_v16, %v3081_v48 }
 0x92d   :  { %v1354_v20 = vadd.f32 1e-06, %v1352_v18 }
 0x92f   :  { %2695 = vrsqrt.f32 %v1354_v20  ;;  %vm1362_vm3 = vweird.f32 %v1354_v20 }
 0x934   :  { %v1351_v3 = vpop.xlane.xlu1 %1350 }
 0x935   :  { %v2696_v25 = vpop.eup %2695  ;;  %v1353_v7 = vmul.f32 %v1351_v3, %v3081_v48 }
 0x936   :  { %v1357_v27 = vmul.f32 %v2696_v25, %v1354_v20  ;;  %vm1363_vm0 = vweird.f32 %v2696_v25 }
 0x937   :  { %vm1364_vm7 = vmor %vm1362_vm3, %vm1363_vm0  ;;  %v1355_v26 = vadd.f32 1e-06, %v1353_v7 }
 0x938   :  { %v1358_v29 = vmul.f32 %v2696_v25, %v1357_v27 }
 0x939   :  { %2697 = vrsqrt.f32 %v1355_v26  ;;  %vm1372_vm9 = vweird.f32 %v1355_v26 }
 0x93a   :  { %v1359_v21 = vmul.f32 0.5, %v1358_v29 }
 0x93c   :  { %v1360_v30 = vsub.f32 1.5, %v1359_v21 }
 0x93e   :  { %v1361_v28 = vmul.f32 %v2696_v25, %v1360_v30 }
 0x93f   :  { %v2698_v38 = vpop.eup %2697 }
 0x940   :  { %v1365_v15 = vsel %vm1364_vm7, %v2696_v25, %v1361_v28  ;;  %v1367_v40 = vmul.f32 %v2698_v38, %v1355_v26  ;;  %vm1373_vm8 = vweird.f32 %v2698_v38 }
 0x941   :  { %v1376_v33 = vmul.f32 %v1365_v15, %v1342_v57  ;;  %vm1374_vm10 = vmor %vm1372_vm9, %vm1373_vm8 }
 0x942   :  { %v1368_v59 = vmul.f32 %v2698_v38, %v1367_v40 }
 0x943   :  { %v1379_v34 = vmul.f32 %v1378_v53, %v1376_v33 }
 0x944   :  { %v1369_v22 = vmul.f32 0.5, %v1368_v59 }
 0x945   :  { %v1382_v35 = vadd.f32 %v1381_v52, %v1379_v34 }
 0x946   :  { %v1370_v42 = vsub.f32 1.5, %v1369_v22 }
 0x947   :  { %2533 = vmatmul.msk.f32.vlgmr.msra.gmra.mxu3 %vm259_vm5, %v1382_v35  ;;  %2535 = vmatmul.msk.f32.vlgmr.msra.gmra.mxu0 %vm259_vm5, %v1382_v35 }
 0x948   :  { %v1371_v45 = vmul.f32 %v2698_v38, %v1370_v42 }
 0x94a   :  { %v1375_v47 = vsel %vm1374_vm10, %v2698_v38, %v1371_v45 }
 0x94b   :  { %v1377_v32 = vmul.f32 %v1375_v47, %v3669_v55 }
 0x94d   :  { %v1380_v49 = vmul.f32 %v1378_v53, %v1377_v32 }
 0x94f   :  { %v1383_v37 = vadd.f32 %v1381_v52, %v1380_v49 }
 0x951   :  { %2534 = vmatmul.msk.f32.gmra.mxu3 %vm259_vm5, %v1383_v37  ;;  %2536 = vmatmul.msk.f32.gmra.mxu0 %vm259_vm5, %v1383_v37 }
 0x9c4   :  { %v1449_v56 = vpop.f32.mrf.mxu0 }
 0x9c5   :  { %v3737_v36 = vadd.f32 %v1449_v56, %v1402_v46 }
 0x9ca   :  { %v1426_v13 = vpop.f32.mrf.mxu3 }
 0x9cb   :  { %v1427_v39 = vadd.f32 %v1426_v13, %v1401_v44 }
 0x9cd   :  { %1457 = vrot.lane.b32.xlu1 %v1427_v39, %s2775_s19 }
 0x9ce   :  { %v1452_v57 = vpop.f32.mrf.mxu0 }
 0x9cf   :  { %v3735_v43 = vadd.f32 %v1452_v57, %v1402_v46 }
 0x9d1   :  { %2541 = vmatpush.msk.msrb.mxu0 %vm482_vm14, %v3735_v43 }
 0x9d3   :  { %1564 = vmatpush.msrb.mxu0 %v3737_v36 }
 0x9d4   :  { %v1429_v31 = vpop.f32.mrf.mxu3 }
 0x9d5   :  { %1700 = vrot.lane.b32.xlu1 %v1427_v39, %s2776_s22  ;;  %v3742_v14 = vadd.f32 %v1429_v31, %v1401_v44 }
 0x9d7   :  { %1578 = vrot.lane.b32.xlu0 %v3742_v14, %s2777_s23  ;;  %1459 = vrot.lane.b32.xlu2 %v3742_v14, %s2775_s19 }
 0x9dd   :  { %1574 = vrot.lane.b32.xlu1 %v3742_v14, %s2781_s27 }
 0x9df   :  { %1576 = vrot.lane.b32.xlu0 %v1427_v39, %s2777_s23  ;;  %1572 = vrot.lane.b32.xlu2 %v1427_v39, %s2781_s27 }
 0x9e5   :  { %1819 = vrot.lane.b32.xlu1 %v1427_v39, %s2780_s26 }
 0x9e7   :  { %1702 = vrot.lane.b32.xlu0 %v3742_v14, %s2776_s22  ;;  %1825 = vrot.lane.b32.xlu2 %v3742_v14, %s2778_s24 }
 0x9ef   :  { %1823 = vrot.lane.b32.xlu0 %v1427_v39, %s2778_s24  ;;  %1696 = vrot.lane.b32.xlu2 %v1427_v39, %s2779_s25 }
 0xa31   :  { %v1460_v50 = vpop.permute.xlu2 %1459 }
 0xa32   :  { %2537 = vmatpush.xpose.msk.msrb.mxu3 %vm394_vm15, %v1460_v50 }
 0xa39   :  { %v1573_v55 = vpop.permute.xlu2 %1572 }
 0xa3f   :  { %v1458_v60 = vpop.permute.xlu1 %1457 }
 0xa40   :  { %2538 = vmatpush.xpose.msk.msrb.mxu3 %vm394_vm15, %v1458_v60 }
 0xa41   :  { %v1826_v2 = vpop.permute.xlu2 %1825 }
 0xa43   :  { %2539 = vmatmul.msk.f32.vlgmr.msrb.gmra.mxu3 %vm394_vm15, %v1427_v39 }
 0xa47   :  { %v1701_v61 = vpop.permute.xlu1 %1700 }
 0xa49   :  { %v1579_v54 = vpop.permute.xlu0 %1578  ;;  %v1697_v1 = vpop.permute.xlu2 %1696 }
 0xa4a   :  { %2544 = vmatpush.xpose.msk.msra.mxu1 %vm394_vm15, %v1579_v54 }
 0xa4b   :  { %2540 = vmatmul.msk.f32.gmra.mxu3 %vm394_vm15, %v3742_v14 }
 0xa4f   :  { %v1575_v0 = vpop.permute.xlu1 %1574 }
 0xa51   :  { %v1577_v62 = vpop.permute.xlu0 %1576 }
 0xa52   :  { %2545 = vmatpush.xpose.msk.msra.mxu1 %vm394_vm15, %v1577_v62 }
 0xa55   :  { %2546 = vmatmul.msk.f32.vlgmr.msra.gmra.mxu1 %vm394_vm15, %v1573_v55 }
 0xa56   :  { %2558 = vmatpush.xpose.msk.msrb.mxu1 %vm394_vm15, %v1826_v2 }
 0xa57   :  { %v1820_v4 = vpop.permute.xlu1 %1819 }
 0xa59   :  { %v1703_v51 = vpop.permute.xlu0 %1702 }
 0xa5a   :  { %2551 = vmatpush.xpose.msk.msra.mxu3 %vm394_vm15, %v1703_v51 }
 0xa5d   :  { %2547 = vmatmul.msk.f32.gmra.mxu1 %vm394_vm15, %v1575_v0 }
 0xa5e   :  { %2552 = vmatpush.xpose.msk.msra.mxu3 %vm394_vm15, %v1701_v61 }
 0xa61   :  { %v1824_v63 = vpop.permute.xlu0 %1823  ;;  %2553 = vmatmul.msk.f32.vlgmr.msra.gmra.mxu3 %vm394_vm15, %v1697_v1 }
 0xa62   :  { %2559 = vmatpush.xpose.msk.msrb.mxu1 %vm394_vm15, %v1824_v63 }
 0xa65   :  { %2560 = vmatmul.msk.f32.vlgmr.msrb.gmra.mxu1 %vm394_vm15, %v1820_v4 }
 0xac6   :  { %v1486_v5 = vpop.f32.mrf.mxu3 }
 0xac7   :  { %v1487_v11 = vadd.f32 %v1486_v5, %v3207_v9 }
 0xac9   :  { %v1492_v8 = vsel %vm426_vm4, %v1487_v11, -inf }
 0xaca   :  { %1493 = vmax.xlane.f32.xlu2 %v1492_v8 }
 0xace   :  { %v1489_v19 = vpop.f32.mrf.mxu3 }
 0xacf   :  { %v1490_v20 = vadd.f32 %v1489_v19, %v3203_v6 }
 0xad1   :  { %v1495_v23 = vsel %vm430_vm1, %v1490_v20, -inf }
 0xad2   :  { %v1605_v16 = vpop.f32.mrf.mxu1 }
 0xad3   :  { %v1606_v18 = vadd.f32 %v1605_v16, %v3207_v9 }
 0xad5   :  { %v1611_v17 = vsel %vm426_vm4, %v1606_v18, -inf }
 0xad6   :  { %1612 = vmax.xlane.f32.xlu0 %v1611_v17 }
 0xada   :  { %v1608_v10 = vpop.f32.mrf.mxu1 }
 0xadb   :  { %v1609_v12 = vadd.f32 %v1608_v10, %v3203_v6 }
 0xadd   :  { %v1614_v24 = vsel %vm430_vm1, %v1609_v12, -inf }
 0xade   :  { %1496 = vmax.xlane.f32.xlu0 %v1495_v23  ;;  %1615 = vmax.xlane.f32.xlu1 %v1614_v24 }
 0xae2   :  { %v1852_v25 = vpop.f32.mrf.mxu1 }
 0xae3   :  { %v1853_v27 = vadd.f32 %v1852_v25, %v3207_v9 }
 0xae4   :  { %v1729_v29 = vpop.f32.mrf.mxu3 }
 0xae5   :  { %v1730_v21 = vadd.f32 %v1729_v29, %v3207_v9  ;;  %v1858_v30 = vsel %vm426_vm4, %v1853_v27, -inf }
 0xae6   :  { %1859 = vmax.xlane.f32.xlu2 %v1858_v30 }
 0xae7   :  { %v1735_v3 = vsel %vm426_vm4, %v1730_v21, -inf }
 0xae8   :  { %1736 = vmax.xlane.f32.xlu1 %v1735_v3 }
 0xaf2   :  { %1660 = vrot.lane.b32.xlu0 %v3737_v36, %s2781_s27 }
 0xafa   :  { %1906 = vrot.lane.b32.xlu0 %v3737_v36, %s2780_s26 }
 0xafe   :  { %1908 = vrot.lane.b32.xlu2 %v3735_v43, %s2780_s26 }
 0xb01   :  { %1662 = vrot.lane.b32.xlu1 %v3735_v43, %s2781_s27 }
 0xb3d   :  { %v1494_v7 = vpop.xlane.xlu2 %1493 }
 0xb3e   :  { %v1498_v9 = vsub.f32 %v1487_v11, %v1494_v7 }
 0xb40   :  { %v1500_v28 = vmul.f32 1.442695, %v1498_v9 }
 0xb42   :  { %2699 = vpow2.f32 %v1500_v28 }
 0xb48   :  { %v3794_v53 = vpop.eup %2699 }
 0xb49   :  { %v1504_v26 = vsel %vm426_vm4, %v3794_v53, 0.0  ;;  %v1613_v15 = vpop.xlane.xlu0 %1612 }
 0xb4a   :  { %1505 = vadd.xlane.f32.xlu2 %v1504_v26  ;;  %v1617_v33 = vsub.f32 %v1606_v18, %v1613_v15 }
 0xb4c   :  { %v1619_v52 = vmul.f32 1.442695, %v1617_v33 }
 0xb4e   :  { %2701 = vpow2.f32 %v1619_v52 }
 0xb51   :  { %v1497_v34 = vpop.xlane.xlu0 %1496  ;;  %v1616_v35 = vpop.xlane.xlu1 %1615 }
 0xb52   :  { %v1499_v38 = vsub.f32 %v1490_v20, %v1497_v34  ;;  %v1618_v40 = vsub.f32 %v1609_v12, %v1616_v35 }
 0xb54   :  { %v3798_v59 = vpop.eup %2701  ;;  %v1502_v22 = vmul.f32 1.442695, %v1499_v38  ;;  %v1621_v42 = vmul.f32 1.442695, %v1618_v40 }
 0xb55   :  { %v1623_v45 = vsel %vm426_vm4, %v3798_v59, 0.0 }
 0xb56   :  { %2703 = vpow2.f32 %v1502_v22  ;;  %1624 = vadd.xlane.f32.xlu0 %v1623_v45 }
 0xb57   :  { %2705 = vpow2.f32 %v1621_v42 }
 0xb59   :  { %v1860_v47 = vpop.xlane.xlu2 %1859 }
 0xb5a   :  { %v1864_v32 = vsub.f32 %v1853_v27, %v1860_v47 }
 0xb5b   :  { %v1737_v49 = vpop.xlane.xlu1 %1736 }
 0xb5c   :  { %v3802_v37 = vpop.eup %2703  ;;  %v1866_v44 = vmul.f32 1.442695, %v1864_v32  ;;  %v1741_v13 = vsub.f32 %v1730_v21, %v1737_v49 }
 0xb5d   :  { %v3804_v39 = vpop.eup %2705  ;;  %v1507_v56 = vsel %vm430_vm1, %v3802_v37, 0.0 }
 0xb5e   :  { %2707 = vpow2.f32 %v1866_v44  ;;  %1508 = vadd.xlane.f32.xlu0 %v1507_v56  ;;  %v1626_v46 = vsel %vm430_vm1, %v3804_v39, 0.0  ;;  %v1743_v57 = vmul.f32 1.442695, %v1741_v13 }
 0xb5f   :  { %1627 = vadd.xlane.f32.xlu1 %v1626_v46 }
 0xb60   :  { %2709 = vpow2.f32 %v1743_v57 }
 0xb61   :  { %v1909_v62 = vpop.permute.xlu2 %1908 }
 0xb64   :  { %v3810_v31 = vpop.eup %2707  ;;  %v1661_v54 = vpop.permute.xlu0 %1660 }
 0xb65   :  { %v1870_v50 = vsel %vm426_vm4, %v3810_v31, 0.0 }
 0xb66   :  { %1871 = vadd.xlane.f32.xlu2 %v1870_v50  ;;  %v3814_v60 = vpop.eup %2709 }
 0xb67   :  { %v1747_v55 = vsel %vm426_vm4, %v3814_v60, 0.0 }
 0xb6c   :  { %v1907_v2 = vpop.permute.xlu0 %1906 }
 0xb6e   :  { %1748 = vadd.xlane.f32.xlu2 %v1747_v55 }
 0xb72   :  { %1783 = vrot.lane.b32.xlu0 %v3737_v36, %s2779_s25 }
 0xb73   :  { %v1663_v61 = vpop.permute.xlu1 %1662 }
 0xb74   :  { %2548 = vmatpush.msk.msrb.mxu2 %vm482_vm14, %v1663_v61 }
 0xb76   :  { %1688 = vmatpush.msrb.mxu2 %v1661_v54 }
 0xb78   :  { %2562 = vmatpush.msk.msra.mxu2 %vm482_vm14, %v1909_v62  ;;  %1785 = vrot.lane.b32.xlu1 %v3735_v43, %s2779_s25 }
 0xb7a   :  { %1934 = vmatpush.msra.mxu2 %v1907_v2 }
 0xb80   :  { %1698 = vrot.lane.b32.xlu1 %v3742_v14, %s2779_s25 }
 0xb86   :  { %1821 = vrot.lane.b32.xlu2 %v3742_v14, %s2780_s26 }
 0xbbd   :  { %v1506_v51 = vpop.xlane.xlu2 %1505 }
 0xbbe   :  { %2711 = vrcp.f32 %v1506_v51  ;;  %v1521_v63 = vand.u32 2147483648, %v1506_v51  ;;  %v1519_v5 = vand.u32 2147483647, %v1506_v51  ;;  %vm1515_vm0 = vweird.f32 %v1506_v51 }
 0xbc0   :  { %v1522_v43 = vor.u32 1.1754944e-38, %v1521_v63  ;;  %vm1520_vm7 = vcmp.eq.f32.partialorder %v1519_v5, 8.507059e+37 }
 0xbc4   :  { %v2712_v36 = vpop.eup %2711 }
 0xbc5   :  { %v1511_v0 = vmul.f32 %v2712_v36, %v1506_v51  ;;  %vm1516_vm13 = vweird.f32 %v2712_v36 }
 0xbc6   :  { %vm1517_vm3 = vmor %vm1515_vm0, %vm1516_vm13 }
 0xbc7   :  { %v1512_v1 = vsub.f32 1.0, %v1511_v0 }
 0xbc9   :  { %v1513_v4 = vmul.f32 %v2712_v36, %v1512_v1  ;;  %v1625_v17 = vpop.xlane.xlu0 %1624 }
 0xbca   :  { %2713 = vrcp.f32 %v1625_v17  ;;  %v1640_v23 = vand.u32 2147483648, %v1625_v17  ;;  %v1638_v25 = vand.u32 2147483647, %v1625_v17  ;;  %vm1634_vm9 = vweird.f32 %v1625_v17 }
 0xbcb   :  { %v1514_v11 = vadd.f32 %v2712_v36, %v1513_v4 }
 0xbcc   :  { %v1641_v21 = vor.u32 1.1754944e-38, %v1640_v23  ;;  %vm1639_vm13 = vcmp.eq.f32.partialorder %v1638_v25, 8.507059e+37 }
 0xbcd   :  { %v1518_v8 = vsel %vm1517_vm3, %v2712_v36, %v1514_v11 }
 0xbce   :  { %v1523_v16 = vsel %vm1520_vm7, %v1522_v43, %v1518_v8 }
 0xbcf   :  { %v1524_v18 = vmul.f32 %v3794_v53, %v1523_v16 }
 0xbd0   :  { %v2714_v14 = vpop.eup %2713 }
 0xbd1   :  { %2542 = vmatmul.msk.f32.vlgmr.msrb.gmra.mxu0 %vm426_vm4, %v1524_v18  ;;  %v1630_v19 = vmul.f32 %v2714_v14, %v1625_v17  ;;  %v1509_v20 = vpop.xlane.xlu0 %1508  ;;  %vm1635_vm8 = vweird.f32 %v2714_v14 }
 0xbd2   :  { %2715 = vrcp.f32 %v1509_v20  ;;  %v1628_v10 = vpop.xlane.xlu1 %1627  ;;  %vm1636_vm10 = vmor %vm1634_vm9, %vm1635_vm8  ;;  %v1536_v34 = vand.u32 2147483648, %v1509_v20  ;;  %v1534_v40 = vand.u32 2147483647, %v1509_v20  ;;  %vm1530_vm3 = vweird.f32 %v1509_v20 }
 0xbd3   :  { %v1631_v12 = vsub.f32 1.0, %v1630_v19  ;;  %2717 = vrcp.f32 %v1628_v10  ;;  %v1655_v38 = vand.u32 2147483648, %v1628_v10  ;;  %v1653_v42 = vand.u32 2147483647, %v1628_v10 }
 0xbd4   :  { %v1537_v32 = vor.u32 1.1754944e-38, %v1536_v34  ;;  %vm1649_vm9 = vweird.f32 %v1628_v10  ;;  %v2565_v34 = vld [vmem:[%s4226_s4 + $0x40] sm:$0xff] }
 0xbd5   :  { %v1632_v24 = vmul.f32 %v2714_v14, %v1631_v12  ;;  %v1656_v13 = vor.u32 1.1754944e-38, %v1655_v38  ;;  %vm1654_vm2 = vcmp.eq.f32.partialorder %v1653_v42, 8.507059e+37 }
 0xbd7   :  { %v1633_v27 = vadd.f32 %v2714_v14, %v1632_v24 }
 0xbd8   :  { %v2716_v29 = vpop.eup %2715 }
 0xbd9   :  { %v2718_v30 = vpop.eup %2717  ;;  %v1637_v3 = vsel %vm1636_vm10, %v2714_v14, %v1633_v27  ;;  %v1526_v7 = vmul.f32 %v2716_v29, %v1509_v20  ;;  %v1872_v9 = vpop.xlane.xlu2 %1871  ;;  %vm1531_vm0 = vweird.f32 %v2716_v29  ;;  %vm1535_vm10 = vcmp.eq.f32.partialorder %v1534_v40, 8.507059e+37 }
 0xbda   :  { %v1642_v28 = vsel %vm1639_vm13, %v1641_v21, %v1637_v3  ;;  %v1645_v53 = vmul.f32 %v2718_v30, %v1628_v10  ;;  %2719 = vrcp.f32 %v1872_v9  ;;  %vm1650_vm7 = vweird.f32 %v2718_v30  ;;  %vm1532_vm8 = vmor %vm1530_vm3, %vm1531_vm0 }
 0xbdb   :  { %v1527_v26 = vsub.f32 1.0, %v1526_v7  ;;  %v1643_v15 = vmul.f32 %v3798_v59, %v1642_v28  ;;  %vm1651_vm13 = vmor %vm1649_vm9, %vm1650_vm7  ;;  %v1887_v50 = vand.u32 2147483648, %v1872_v9  ;;  %v1885_v62 = vand.u32 2147483647, %v1872_v9  ;;  %v2572_v28 = vld [vmem:[%s4226_s4 + $0x78] sm:$0xff] }
 0xbdc   :  { %v1646_v33 = vsub.f32 1.0, %v1645_v53  ;;  %vm1881_vm3 = vweird.f32 %v1872_v9  ;;  %v2571_v53 = vld [vmem:[%s4226_s4 + $0x70] sm:$0xff]  ;;  %1996 = vmatpush.msrb.mxu3 %v2572_v28 }
 0xbdd   :  { %v1528_v52 = vmul.f32 %v2716_v29, %v1527_v26  ;;  %2549 = vmatmul.msk.f32.vlgmr.msrb.gmra.mxu2 %vm426_vm4, %v1643_v15  ;;  %v1888_v0 = vor.u32 1.1754944e-38, %v1887_v50  ;;  %v2570_v26 = vld [vmem:[%s4226_s4 + $0x68] sm:$0xff]  ;;  %v2568_v15 = vld [vmem:[%s4226_s4 + $0x58] sm:$0xff] }
 0xbde   :  { %v1647_v35 = vmul.f32 %v2718_v30, %v1646_v33  ;;  %1997 = vmatpush.msrb.mxu3 %v2571_v53  ;;  %v2567_v33 = vld [vmem:[%s4226_s4 + $0x50] sm:$0xff] }
 0xbdf   :  { %v1529_v22 = vadd.f32 %v2716_v29, %v1528_v52  ;;  %v2566_v52 = vld [vmem:[%s4226_s4 + $0x48] sm:$0xff] }
 0xbe0   :  { %v2720_v45 = vpop.eup %2719  ;;  %v1648_v47 = vadd.f32 %v2718_v30, %v1647_v35  ;;  %1998 = vmatpush.msrb.mxu3 %v2570_v26 }
 0xbe1   :  { %v1877_v49 = vmul.f32 %v2720_v45, %v1872_v9  ;;  %v1749_v59 = vpop.xlane.xlu2 %1748  ;;  %v1533_v44 = vsel %vm1532_vm8, %v2716_v29, %v1529_v22  ;;  %vm1882_vm0 = vweird.f32 %v2720_v45  ;;  %vm1886_vm8 = vcmp.eq.f32.partialorder %v1885_v62, 8.507059e+37 }
 0xbe2   :  { %2721 = vrcp.f32 %v1749_v59  ;;  %v1538_v46 = vsel %vm1535_vm10, %v1537_v32, %v1533_v44  ;;  %v1652_v57 = vsel %vm1651_vm13, %v2718_v30, %v1648_v47  ;;  %vm1883_vm7 = vmor %vm1881_vm3, %vm1882_vm0  ;;  %v1764_v43 = vand.u32 2147483648, %v1749_v59 }
 0xbe3   :  { %v1878_v56 = vsub.f32 1.0, %v1877_v49  ;;  %v1539_v55 = vmul.f32 %v3802_v37, %v1538_v46  ;;  %v1657_v54 = vsel %vm1654_vm2, %v1656_v13, %v1652_v57  ;;  %v1762_v18 = vand.u32 2147483647, %v1749_v59 }
 0xbe4   :  { %v1658_v2 = vmul.f32 %v3804_v39, %v1657_v54  ;;  %v1784_v8 = vpop.permute.xlu0 %1783  ;;  %vm1758_vm9 = vweird.f32 %v1749_v59  ;;  %v1765_v14 = vor.u32 1.1754944e-38, %v1764_v43  ;;  %v3891_v54 = vld [vmem:[%s4224_s2 + $0x20] sm:$0xff] }
 0xbe5   :  { %v1879_v61 = vmul.f32 %v2720_v45, %v1878_v56  ;;  %2543 = vmatmul.msk.f32.gmra.mxu0 %vm426_vm4, %v1539_v55  ;;  %vm1763_vm13 = vcmp.eq.f32.partialorder %v1762_v18, 8.507059e+37  ;;  %v3886_v55 = vld [vmem:[%s4224_s2 + $0x30] sm:$0x3f] }
 0xbe6   :  { %2550 = vmatmul.msk.f32.gmra.mxu2 %vm426_vm4, %v1658_v2  ;;  %v2011_v62 = vperm.slane %v3886_v55, 0 }
 0xbe7   :  { %v1880_v51 = vadd.f32 %v2720_v45, %v1879_v61  ;;  %v1981_v61 = vperm.slane %v3891_v54, 7 }
 0xbe8   :  { %v2722_v36 = vpop.eup %2721 }
 0xbe9   :  { %v1884_v1 = vsel %vm1883_vm7, %v2720_v45, %v1880_v51  ;;  %v1754_v63 = vmul.f32 %v2722_v36, %v1749_v59  ;;  %v1822_v4 = vpop.permute.xlu2 %1821  ;;  %vm1759_vm2 = vweird.f32 %v2722_v36 }
 0xbea   :  { %v1889_v37 = vsel %vm1886_vm8, %v1888_v0, %v1884_v1  ;;  %v1786_v5 = vpop.permute.xlu1 %1785  ;;  %2561 = vmatmul.msk.f32.gmra.mxu1 %vm394_vm15, %v1822_v4  ;;  %vm1760_vm10 = vmor %vm1758_vm9, %vm1759_vm2 }
 0xbeb   :  { %v1755_v11 = vsub.f32 1.0, %v1754_v63  ;;  %2555 = vmatpush.msk.msra.mxu0 %vm482_vm14, %v1786_v5  ;;  %v1890_v39 = vmul.f32 %v3810_v31, %v1889_v37 }
 0xbed   :  { %v1756_v16 = vmul.f32 %v2722_v36, %v1755_v11  ;;  %1811 = vmatpush.msra.mxu0 %v1784_v8 }
 0xbee   :  { %2563 = vmatmul.msk.f32.vlgmr.msra.gmra.mxu2 %vm426_vm4, %v1890_v39 }
 0xbef   :  { %v1757_v17 = vadd.f32 %v2722_v36, %v1756_v16 }
 0xbf1   :  { %v1761_v19 = vsel %vm1760_vm10, %v2722_v36, %v1757_v17 }
 0xbf2   :  { %v1766_v20 = vsel %vm1763_vm13, %v1765_v14, %v1761_v19  ;;  %v1699_v10 = vpop.permute.xlu1 %1698 }
 0xbf3   :  { %2554 = vmatmul.msk.f32.gmra.mxu3 %vm394_vm15, %v1699_v10  ;;  %v1767_v31 = vmul.f32 %v3814_v60, %v1766_v20 }
 0xbf5   :  { %2556 = vmatmul.msk.f32.vlgmr.msra.gmra.mxu0 %vm426_vm4, %v1767_v31 }
 0xc4e   :  { %v1566_v23 = vpop.f32.mrf.mxu0 }
 0xc60   :  { %v1690_v12 = vpop.f32.mrf.mxu2 }
 0xc61   :  { %1944 = vrot.lane.b32.xlu0 %v1690_v12, %s2778_s24 }
 0xc62   :  { %v3844_v24 = vpop.f32.mrf.mxu0 }
 0xc67   :  { %v1855_v21 = vpop.f32.mrf.mxu1 }
 0xc68   :  { %v1856_v30 = vadd.f32 %v1855_v21, %v3203_v6 }
 0xc69   :  { %v1693_v25 = vpop.f32.mrf.mxu2 }
 0xc6a   :  { %v1861_v60 = vsel %vm430_vm1, %v1856_v30, -inf }
 0xc71   :  { %v1936_v27 = vpop.f32.mrf.mxu2 }
 0xc72   :  { %v1813_v29 = vpop.f32.mrf.mxu0  ;;  %1960 = vrot.lane.b32.xlu2 %v1936_v27, %s2777_s23 }
 0xc73   :  { %1952 = vrot.lane.b32.xlu1 %v1813_v29, %s2776_s22 }
 0xc76   :  { %v1732_v3 = vpop.f32.mrf.mxu3 }
 0xc77   :  { %v1733_v7 = vadd.f32 %v1732_v3, %v3203_v6  ;;  %v2569_v6 = vld [vmem:[%s4226_s4 + $0x60] sm:$0xff] }
 0xc78   :  { %1999 = vmatpush.msrb.mxu3 %v2569_v6  ;;  %v2589_v6 = vld [vmem:[%s4227_s5 + $0xf0] sm:$0xff] }
 0xc79   :  { %v1738_v9 = vsel %vm430_vm1, %v1733_v7, -inf  ;;  %2099 = vmatpush.msrb.mxu0 %v2589_v6  ;;  %v2625_v6 = vld [vmem:[%s4228_s6 + $0x1d0] sm:$0xff] }
 0xc7a   :  { %2000 = vmatpush.msrb.mxu3 %v2568_v15  ;;  %v2590_v15 = vld [vmem:[%s4227_s5 + $0xf8] sm:$0xff] }
 0xc7b   :  { %2122 = vmatpush.msra.mxu1 %v2590_v15 }
 0xc7c   :  { %2001 = vmatpush.msrb.mxu3 %v2567_v33  ;;  %v2587_v33 = vld [vmem:[%s4227_s5 + $0xe0] sm:$0xff] }
 0xc7d   :  { %2100 = vmatpush.msrb.mxu0 %v2587_v33 }
 0xc7e   :  { %2002 = vmatpush.msrb.mxu3 %v2566_v52  ;;  %v2588_v52 = vld [vmem:[%s4227_s5 + $0xe8] sm:$0xff] }
 0xc7f   :  { %2123 = vmatpush.msra.mxu1 %v2588_v52  ;;  %v2608_v52 = vld [vmem:[%s4228_s6 + $0x148] sm:$0xff] }
 0xc80   :  { %2003 = vmatpush.msrb.mxu3 %v2565_v34  ;;  %v2585_v34 = vld [vmem:[%s4227_s5 + $0xd0] sm:$0xff] }
 0xc81   :  { %2101 = vmatpush.msrb.mxu0 %v2585_v34  ;;  %v2624_v34 = vld [vmem:[%s4228_s6 + $0x1c8] sm:$0xff] }
 0xc8b   :  { %1862 = vmax.xlane.f32.xlu0 %v1861_v60 }
 0xc9d   :  { %1739 = vmax.xlane.f32.xlu1 %v1738_v9 }
 0xccc   :  { %v1961_v22 = vpop.permute.xlu2 %1960 }
 0xcd3   :  { %v1945_v35 = vpop.permute.xlu0 %1944 }
 0xcd4   :  { %v1966_v38 = vsel %vm394_vm15, %v1566_v23, %v1945_v35  ;;  %v2586_v35 = vld [vmem:[%s4227_s5 + $0xd8] sm:$0xff] }
 0xcd5   :  { %2124 = vmatpush.msra.mxu1 %v2586_v35 }
 0xce5   :  { %v1953_v40 = vpop.permute.xlu1 %1952 }
 0xce6   :  { %v1968_v42 = vsel %vm905_vm11, %v1966_v38, %v1953_v40  ;;  %v2583_v38 = vld [vmem:[%s4227_s5 + $0xc0] sm:$0xff]  ;;  %v2584_v40 = vld [vmem:[%s4227_s5 + $0xc8] sm:$0xff] }
 0xce7   :  { %v1970_v45 = vsel %vm908_vm12, %v1968_v42, %v1961_v22  ;;  %2102 = vmatpush.msrb.mxu0 %v2583_v38  ;;  %2125 = vmatpush.msra.mxu1 %v2584_v40  ;;  %v2581_v22 = vld [vmem:[%s4227_s5 + $0xb0] sm:$0xff]  ;;  %v2582_v42 = vld [vmem:[%s4227_s5 + $0xb8] sm:$0xff]  ;;  %v2607_v40 = vld [vmem:[%s4228_s6 + $0x140] sm:$0xff] }
 0xce8   :  { %2573 = vmatmul.msk.f32.vlgmr.msrb.gmra.mxu3 %vm259_vm5, %v1970_v45  ;;  %v2579_v45 = vld [vmem:[%s4227_s5 + $0xa0] sm:$0xff] }
 0xce9   :  { %2103 = vmatpush.msrb.mxu0 %v2581_v22  ;;  %2126 = vmatpush.msra.mxu1 %v2582_v42  ;;  %v2623_v22 = vld [vmem:[%s4228_s6 + $0x1c0] sm:$0xff] }
 0xceb   :  { %2104 = vmatpush.msrb.mxu0 %v2579_v45 }
 0xcfe   :  { %v1863_v47 = vpop.xlane.xlu0 %1862 }
 0xcff   :  { %v1865_v32 = vsub.f32 %v1856_v30, %v1863_v47  ;;  %v2580_v47 = vld [vmem:[%s4227_s5 + $0xa8] sm:$0xff] }
 0xd00   :  { %2127 = vmatpush.msra.mxu1 %v2580_v47 }
 0xd01   :  { %v1868_v49 = vmul.f32 1.442695, %v1865_v32  ;;  %v2577_v32 = vld [vmem:[%s4227_s5 + $0x90] sm:$0xff] }
 0xd02   :  { %2105 = vmatpush.msrb.mxu0 %v2577_v32 }
 0xd03   :  { %2723 = vpow2.f32 %v1868_v49  ;;  %v2578_v49 = vld [vmem:[%s4227_s5 + $0x98] sm:$0xff] }
 0xd04   :  { %2128 = vmatpush.msra.mxu1 %v2578_v49  ;;  %v2606_v49 = vld [vmem:[%s4228_s6 + $0x138] sm:$0xff] }
 0xd09   :  { %v2724_v59 = vpop.eup %2723 }
 0xd0a   :  { %v1873_v44 = vsel %vm430_vm1, %v2724_v59, 0.0 }
 0xd0b   :  { %1874 = vadd.xlane.f32.xlu2 %v1873_v44  ;;  %v2576_v44 = vld [vmem:[%s4227_s5 + $0x88] sm:$0xff] }
 0xd0c   :  { %2129 = vmatpush.msra.mxu1 %v2576_v44 }
 0xd10   :  { %v1740_v13 = vpop.xlane.xlu1 %1739 }
 0xd11   :  { %v1742_v56 = vsub.f32 %v1733_v7, %v1740_v13 }
 0xd13   :  { %v1745_v46 = vmul.f32 1.442695, %v1742_v56 }
 0xd15   :  { %2725 = vpow2.f32 %v1745_v46 }
 0xd1b   :  { %v2726_v57 = vpop.eup %2725 }
 0xd1c   :  { %v1750_v50 = vsel %vm430_vm1, %v2726_v57, 0.0 }
 0xd1d   :  { %1751 = vadd.xlane.f32.xlu0 %v1750_v50 }
 0xd31   :  { %1946 = vrot.lane.b32.xlu0 %v1693_v25, %s2778_s24 }
 0xd6b   :  { %v2005_v2 = vpop.f32.mrf.mxu3 }
 0xd6c   :  { %v2006_v51 = vadd.f32 %v2005_v2, %v1981_v61 }
 0xd6e   :  { %v2012_v36 = vmul.f32 %v2011_v62, %v2006_v51 }
 0xd70   :  { %v3900_v0 = vadd.f32 %v2012_v36, %v3655_v41 }
 0xd72   :  { %v2016_v1 = vsel %vm259_vm5, %v3900_v0, 0.0 }
 0xd73   :  { %2017 = vadd.xlane.f32.xlu1 %v2016_v1 }
 0xd7e   :  { %v1875_v63 = vpop.xlane.xlu2 %1874 }
 0xd7f   :  { %2727 = vrcp.f32 %v1875_v63  ;;  %v1902_v11 = vand.u32 2147483648, %v1875_v63  ;;  %v1900_v43 = vand.u32 2147483647, %v1875_v63  ;;  %vm1896_vm1 = vweird.f32 %v1875_v63 }
 0xd81   :  { %v1903_v16 = vor.u32 1.1754944e-38, %v1902_v11  ;;  %vm1901_vm3 = vcmp.eq.f32.partialorder %v1900_v43, 8.507059e+37 }
 0xd85   :  { %v2728_v4 = vpop.eup %2727 }
 0xd86   :  { %v1892_v37 = vmul.f32 %v2728_v4, %v1875_v63  ;;  %vm1897_vm14 = vweird.f32 %v2728_v4  ;;  %v2060_v63 = vperm.slane %v3886_v55, 1 }
 0xd87   :  { %vm1898_vm0 = vmor %vm1896_vm1, %vm1897_vm14 }
 0xd88   :  { %v1893_v5 = vsub.f32 1.0, %v1892_v37 }
 0xd8a   :  { %v1894_v39 = vmul.f32 %v2728_v4, %v1893_v5  ;;  %v2063_v5 = vperm.slane %v3886_v55, 2 }
 0xd8c   :  { %v1895_v8 = vadd.f32 %v2728_v4, %v1894_v39 }
 0xd8e   :  { %v1899_v18 = vsel %vm1898_vm0, %v2728_v4, %v1895_v8 }
 0xd8f   :  { %v1904_v41 = vsel %vm1901_vm3, %v1903_v16, %v1899_v18 }
 0xd90   :  { %v1752_v17 = vpop.xlane.xlu0 %1751  ;;  %v1905_v14 = vmul.f32 %v2724_v59, %v1904_v41  ;;  %v2575_v59 = vld [vmem:[%s4227_s5 + $0x80] sm:$0xff] }
 0xd91   :  { %2729 = vrcp.f32 %v1752_v17  ;;  %v1779_v31 = vand.u32 2147483648, %v1752_v17  ;;  %v1777_v23 = vand.u32 2147483647, %v1752_v17  ;;  %vm1773_vm8 = vweird.f32 %v1752_v17  ;;  %2106 = vmatpush.msrb.mxu0 %v2575_v59  ;;  %v2622_v59 = vld [vmem:[%s4228_s6 + $0x1b8] sm:$0xff] }
 0xd92   :  { %2564 = vmatmul.msk.f32.gmra.mxu2 %vm426_vm4, %v1905_v14  ;;  %v2614_v14 = vld [vmem:[%s4228_s6 + $0x178] sm:$0xff] }
 0xd93   :  { %v1780_v27 = vor.u32 1.1754944e-38, %v1779_v31  ;;  %vm1778_vm9 = vcmp.eq.f32.partialorder %v1777_v23, 8.507059e+37  ;;  %2347 = vmatpush.msrb.mxu2 %v2614_v14  ;;  %v2083_v31 = vperm.slane %v3886_v55, 3  ;;  %v2612_v23 = vld [vmem:[%s4228_s6 + $0x168] sm:$0xff]  ;;  %v2618_v14 = vld [vmem:[%s4228_s6 + $0x198] sm:$0xff] }
 0xd97   :  { %v2730_v19 = vpop.eup %2729 }
 0xd98   :  { %v1769_v20 = vmul.f32 %v2730_v19, %v1752_v17  ;;  %vm1774_vm7 = vweird.f32 %v2730_v19 }
 0xd99   :  { %vm1775_vm2 = vmor %vm1773_vm8, %vm1774_vm7  ;;  %vm4234_vm8 = vcmask 1040384  }
 0xd9a   :  { %v1770_v10 = vsub.f32 1.0, %v1769_v20  ;;  %v2613_v20 = vld [vmem:[%s4228_s6 + $0x170] sm:$0xff] }
 0xd9b   :  { %2348 = vmatpush.msrb.mxu2 %v2613_v20 }
 0xd9c   :  { %v1771_v12 = vmul.f32 %v2730_v19, %v1770_v10  ;;  %v2629_v10 = vld [vmem:[%s4228_s6 + $0x1f0] sm:$0xff] }
 0xd9d   :  { %2349 = vmatpush.msrb.mxu2 %v2612_v23 }
 0xd9e   :  { %v1772_v25 = vadd.f32 %v2730_v19, %v1771_v12 }
 0xda0   :  { %v1776_v29 = vsel %vm1775_vm2, %v2730_v19, %v1772_v25  ;;  %v2630_v19 = vld [vmem:[%s4228_s6 + $0x1f8] sm:$0xff]  ;;  %v2628_v25 = vld [vmem:[%s4228_s6 + $0x1e8] sm:$0xff] }
 0xda1   :  { %v1781_v21 = vsel %vm1778_vm9, %v1780_v27, %v1776_v29  ;;  %2369 = vmatpush.msra.mxu3 %v2630_v19  ;;  %v2611_v27 = vld [vmem:[%s4228_s6 + $0x160] sm:$0xff] }
 0xda2   :  { %v1782_v30 = vmul.f32 %v2726_v57, %v1781_v21  ;;  %v2627_v29 = vld [vmem:[%s4228_s6 + $0x1e0] sm:$0xff]  ;;  %2350 = vmatpush.msrb.mxu2 %v2611_v27  ;;  %v2617_v27 = vld [vmem:[%s4228_s6 + $0x190] sm:$0xff] }
 0xda3   :  { %v1947_v43 = vpop.permute.xlu0 %1946  ;;  %2370 = vmatpush.msra.mxu3 %v2629_v10 }
 0xda4   :  { %2557 = vmatmul.msk.f32.gmra.mxu0 %vm426_vm4, %v1782_v30  ;;  %v1967_v8 = vsel %vm394_vm15, %v3844_v24, %v1947_v43  ;;  %v3982_v24 = vld [vmem:[%s4224_s2 + $0x38] sm:$0x3f] }
 0xda5   :  { %v2084_v12 = vperm.slane %v3982_v24, 3  ;;  %2371 = vmatpush.msra.mxu3 %v2628_v25  ;;  %v2601_v25 = vld [vmem:[%s4228_s6 + $0x110] sm:$0xff] }
 0xda7   :  { %2372 = vmatpush.msra.mxu3 %v2627_v29 }
 0xde6   :  { %v2018_v60 = vpop.xlane.xlu1 %2017 }
 0xde7   :  { %v2022_v3 = vmul.f32 %v2018_v60, %v3081_v48 }
 0xde9   :  { %v2024_v7 = vsub.f32 %v3900_v0, %v2022_v3 }
 0xdeb   :  { %v2026_v9 = vmul.f32 %v2024_v7, %v2024_v7 }
 0xded   :  { %v2028_v28 = vsel %vm259_vm5, %v2026_v9, 0.0  ;;  %v2626_v9 = vld [vmem:[%s4228_s6 + $0x1d8] sm:$0xff] }
 0xdee   :  { %2029 = vadd.xlane.f32.xlu2 %v2028_v28  ;;  %2373 = vmatpush.msra.mxu3 %v2626_v9 }
 0xdf0   :  { %2374 = vmatpush.msra.mxu3 %v2625_v6  ;;  %v2615_v6 = vld [vmem:[%s4228_s6 + $0x180] sm:$0xff] }
 0xdf2   :  { %2375 = vmatpush.msra.mxu3 %v2624_v34 }
 0xdf4   :  { %2376 = vmatpush.msra.mxu3 %v2623_v22 }
 0xdf6   :  { %2377 = vmatpush.msra.mxu3 %v2622_v59 }
 0xe15   :  { %v1939_v53 = vpop.f32.mrf.mxu2 }
 0xe16   :  { %1962 = vrot.lane.b32.xlu2 %v1939_v53, %s2777_s23 }
 0xe21   :  { %v1816_v26 = vpop.f32.mrf.mxu0 }
 0xe22   :  { %1954 = vrot.lane.b32.xlu1 %v1816_v26, %s2776_s22  ;;  %v2609_v26 = vld [vmem:[%s4228_s6 + $0x150] sm:$0xff] }
 0xe61   :  { %v2030_v13 = vpop.xlane.xlu2 %2029 }
 0xe62   :  { %v2034_v56 = vmul.f32 %v2030_v13, %v3081_v48 }
 0xe64   :  { %v2036_v46 = vadd.f32 1e-06, %v2034_v56 }
 0xe66   :  { %2731 = vrsqrt.f32 %v2036_v46  ;;  %vm2044_vm10 = vweird.f32 %v2036_v46 }
 0xe6c   :  { %v2732_v57 = vpop.eup %2731 }
 0xe6d   :  { %v2039_v50 = vmul.f32 %v2732_v57, %v2036_v46  ;;  %vm2045_vm4 = vweird.f32 %v2732_v57 }
 0xe6e   :  { %vm2046_vm13 = vmor %vm2044_vm10, %vm2045_vm4 }
 0xe6f   :  { %v2040_v2 = vmul.f32 %v2732_v57, %v2039_v50  ;;  %v2621_v50 = vld [vmem:[%s4228_s6 + $0x1b0] sm:$0xff] }
 0xe70   :  { %v1963_v18 = vpop.permute.xlu2 %1962  ;;  %2378 = vmatpush.msra.mxu3 %v2621_v50 }
 0xe71   :  { %v2041_v51 = vmul.f32 0.5, %v2040_v2 }
 0xe73   :  { %v2042_v36 = vsub.f32 1.5, %v2041_v51 }
 0xe75   :  { %v2043_v1 = vmul.f32 %v2732_v57, %v2042_v36 }
 0xe77   :  { %v2047_v4 = vsel %vm2046_vm13, %v2732_v57, %v2043_v1  ;;  %v2605_v57 = vld [vmem:[%s4228_s6 + $0x130] sm:$0xff]  ;;  %v2604_v1 = vld [vmem:[%s4228_s6 + $0x128] sm:$0xff] }
 0xe78   :  { %v2058_v37 = vmul.f32 %v2047_v4, %v2024_v7  ;;  %v2610_v7 = vld [vmem:[%s4228_s6 + $0x158] sm:$0xff]  ;;  %v2620_v4 = vld [vmem:[%s4228_s6 + $0x1a8] sm:$0xff] }
 0xe79   :  { %2351 = vmatpush.msrb.mxu2 %v2610_v7  ;;  %2379 = vmatpush.msra.mxu3 %v2620_v4  ;;  %v2616_v7 = vld [vmem:[%s4228_s6 + $0x188] sm:$0xff] }
 0xe7a   :  { %v2061_v11 = vmul.f32 %v2060_v63, %v2058_v37 }
 0xe7b   :  { %2352 = vmatpush.msrb.mxu2 %v2609_v26  ;;  %v2599_v26 = vld [vmem:[%s4228_s6 + $0x100] sm:$0xff] }
 0xe7c   :  { %v2064_v39 = vadd.f32 %v2063_v5, %v2061_v11 }
 0xe7d   :  { %2353 = vmatpush.msrb.mxu2 %v2608_v52 }
 0xe7e   :  { %2591 = vmatmul.msk.f32.vlgmr.msrb.gmra.mxu0 %vm259_vm5, %v2064_v39  ;;  %2593 = vmatmul.msk.f32.vlgmr.msra.gmra.mxu1 %vm259_vm5, %v2064_v39 }
 0xe7f   :  { %2354 = vmatpush.msrb.mxu2 %v2607_v40 }
 0xe81   :  { %2355 = vmatpush.msrb.mxu2 %v2606_v49 }
 0xe83   :  { %2356 = vmatpush.msrb.mxu2 %v2605_v57 }
 0xe85   :  { %2357 = vmatpush.msrb.mxu2 %v2604_v1 }
 0xe94   :  { %v1955_v16 = vpop.permute.xlu1 %1954 }
 0xe95   :  { %v1969_v41 = vsel %vm905_vm11, %v1967_v8, %v1955_v16  ;;  %v2603_v8 = vld [vmem:[%s4228_s6 + $0x120] sm:$0xff] }
 0xe96   :  { %v1971_v17 = vsel %vm908_vm12, %v1969_v41, %v1963_v18  ;;  %v2619_v16 = vld [vmem:[%s4228_s6 + $0x1a0] sm:$0xff]  ;;  %2358 = vmatpush.msrb.mxu2 %v2603_v8 }
 0xe97   :  { %2574 = vmatmul.msk.f32.gmra.mxu3 %vm259_vm5, %v1971_v17  ;;  %v2602_v17 = vld [vmem:[%s4228_s6 + $0x118] sm:$0xff] }
 0xe98   :  { %2380 = vmatpush.msra.mxu3 %v2619_v16  ;;  %2359 = vmatpush.msrb.mxu2 %v2602_v17 }
 0xe9a   :  { %2381 = vmatpush.msra.mxu3 %v2618_v14  ;;  %2360 = vmatpush.msrb.mxu2 %v2601_v25 }
 0xe9c   :  { %2382 = vmatpush.msra.mxu3 %v2617_v27 }
 0xe9e   :  { %2383 = vmatpush.msra.mxu3 %v2616_v7 }
 0xea0   :  { %2384 = vmatpush.msra.mxu3 %v2615_v6 }
 0xefb   :  { %v2108_v21 = vpop.f32.mrf.mxu0  ;;  %v2131_v30 = vpop.f32.mrf.mxu1 }
 0xefc   :  { %v4006_v60 = vadd.f32 %v2108_v21, %v2083_v31  ;;  %v4010_v3 = vadd.f32 %v2131_v30, %v2084_v12  ;;  %v2600_v30 = vld [vmem:[%s4228_s6 + $0x108] sm:$0xff] }
 0xefd   :  { %2361 = vmatpush.msrb.mxu2 %v2600_v30 }
 0xefe   :  { %v4019_v28 = vmul.f32 0.70710677, %v4006_v60  ;;  %v4022_v53 = vmul.f32 0.70710677, %v4010_v3  ;;  %v2137_v30 = vmul.f32 0.5, %v4006_v60 }
 0xeff   :  { %2362 = vmatpush.msrb.mxu2 %v2599_v26 }
 0xf00   :  { %v2145_v15 = vmul.f32 %v4019_v28, %v4019_v28  ;;  %v2185_v33 = vmul.f32 %v4022_v53, %v4022_v53 }
 0xf02   :  { %v4040_v35 = vmin.f32 %v2145_v15, 16.0  ;;  %v4042_v38 = vmin.f32 %v2185_v33, 16.0 }
 0xf04   :  { %v2147_v42 = vmul.f32 2.1237322e-06, %v4040_v35  ;;  %v2158_v45 = vmul.f32 3.8918573e-05, %v4040_v35  ;;  %v2187_v47 = vmul.f32 2.1237322e-06, %v4042_v38 }
 0xf05   :  { %v2198_v32 = vmul.f32 3.8918573e-05, %v4042_v38 }
 0xf06   :  { %v2148_v44 = vadd.f32 0.00028619796, %v2147_v42  ;;  %v2159_v13 = vadd.f32 0.001143296, %v2158_v45  ;;  %v2188_v56 = vadd.f32 0.00028619796, %v2187_v47 }
 0xf07   :  { %v2199_v46 = vadd.f32 0.001143296, %v2198_v32 }
 0xf08   :  { %v2149_v2 = vmul.f32 %v2148_v44, %v4040_v35  ;;  %v2160_v51 = vmul.f32 %v2159_v13, %v4040_v35  ;;  %v2189_v36 = vmul.f32 %v2188_v56, %v4042_v38 }
 0xf09   :  { %v2200_v37 = vmul.f32 %v2199_v46, %v4042_v38 }
 0xf0a   :  { %v2150_v11 = vadd.f32 0.0036580483, %v2149_v2  ;;  %v2161_v39 = vadd.f32 0.014752088, %v2160_v51  ;;  %v2190_v41 = vadd.f32 0.0036580483, %v2189_v36 }
 0xf0b   :  { %v2201_v43 = vadd.f32 0.014752088, %v2200_v37 }
 0xf0c   :  { %v2162_v18 = vmul.f32 %v2161_v39, %v4040_v35  ;;  %v2151_v20 = vmul.f32 %v2150_v11, %v4040_v35  ;;  %v2191_v21 = vmul.f32 %v2190_v41, %v4042_v38 }
 0xf0d   :  { %v2202_v19 = vmul.f32 %v2201_v43, %v4042_v38 }
 0xf0e   :  { %v2163_v10 = vadd.f32 0.112945676, %v2162_v18  ;;  %v2152_v15 = vadd.f32 0.05243302, %v2151_v20  ;;  %v2192_v40 = vadd.f32 0.05243302, %v2191_v21 }
 0xf0f   :  { %v2203_v23 = vadd.f32 0.112945676, %v2202_v19 }
 0xf10   :  { %v2164_v29 = vmul.f32 %v2163_v10, %v4040_v35  ;;  %v2153_v42 = vmul.f32 %v2152_v15, %v4040_v35  ;;  %v2193_v32 = vmul.f32 %v2192_v40, %v4042_v38  ;;  %v2346_v40 = vperm.slane %v3886_v55, 4 }
 0xf11   :  { %v2204_v9 = vmul.f32 %v2203_v23, %v4042_v38 }
 0xf12   :  { %v2165_v33 = vadd.f32 0.4994258, %v2164_v29  ;;  %v2154_v49 = vadd.f32 0.18741608, %v2153_v42  ;;  %v2194_v13 = vadd.f32 0.18741608, %v2193_v32 }
 0xf13   :  { %v2205_v52 = vadd.f32 0.4994258, %v2204_v9  ;;  %v2138_v9 = vmul.f32 0.5, %v4010_v3  ;;  %v2391_v42 = vperm.slane %v3886_v55, 5 }
 0xf14   :  { %v2166_v34 = vmul.f32 %v2165_v33, %v4040_v35  ;;  %v2155_v57 = vmul.f32 %v2154_v49, %v4040_v35  ;;  %v2195_v36 = vmul.f32 %v2194_v13, %v4042_v38 }
 0xf15   :  { %v2206_v22 = vmul.f32 %v2205_v52, %v4042_v38 }
 0xf16   :  { %v2167_v45 = vadd.f32 1.0, %v2166_v34  ;;  %v2156_v11 = vadd.f32 1.1283791, %v2155_v57  ;;  %v2196_v8 = vadd.f32 1.1283791, %v2195_v36 }
 0xf17   :  { %v2207_v47 = vadd.f32 1.0, %v2206_v22 }
 0xf18   :  { %2733 = vrcp.f32 %v2167_v45  ;;  %v2179_v54 = vand.u32 2147483648, %v2167_v45  ;;  %vm2173_vm12 = vweird.f32 %v2167_v45  ;;  %v2157_v41 = vmul.f32 %v2156_v11, %v4019_v28 }
 0xf19   :  { %2735 = vrcp.f32 %v2207_v47  ;;  %v2219_v43 = vand.u32 2147483648, %v2207_v47  ;;  %v2217_v16 = vand.u32 2147483647, %v2207_v47  ;;  %vm2213_vm1 = vweird.f32 %v2207_v47 }
 0xf1a   :  { %v2008_v59 = vpop.f32.mrf.mxu3  ;;  %v2197_v20 = vmul.f32 %v2196_v8, %v4022_v53  ;;  %v2429_v8 = vld [vmem:[%s4229_s7 + $0x28] sm:$0xff] }
 0xf1b   :  { %v2009_v44 = vadd.f32 %v2008_v59, %v1981_v61  ;;  %v2220_v14 = vor.u32 1.1754944e-38, %v2219_v43  ;;  %vm2218_vm7 = vcmp.eq.f32.partialorder %v2217_v16, 8.507059e+37  ;;  %v2427_v16 = vld [vmem:[%s4229_s7 + $0x18] sm:$0xff] }
 0xf1d   :  { %v2013_v56 = vmul.f32 %v2011_v62, %v2009_v44  ;;  %v2177_v62 = vand.u32 2147483647, %v2167_v45 }
 0xf1e   :  { %v2734_v46 = vpop.eup %2733 }
 0xf1f   :  { %v2736_v50 = vpop.eup %2735  ;;  %v2169_v2 = vmul.f32 %v2734_v46, %v2167_v45  ;;  %v2015_v51 = vadd.f32 %v2013_v56, %v3660_v58  ;;  %vm2174_vm15 = vweird.f32 %v2734_v46  ;;  %v2180_v58 = vor.u32 1.1754944e-38, %v2179_v54 }
 0xf20   :  { %v2209_v1 = vmul.f32 %v2736_v50, %v2207_v47  ;;  %vm2214_vm11 = vweird.f32 %v2736_v50  ;;  %vm2175_vm14 = vmor %vm2173_vm12, %vm2174_vm15  ;;  %vm2178_vm0 = vcmp.eq.f32.partialorder %v2177_v62, 8.507059e+37 }
 0xf21   :  { %v2170_v4 = vsub.f32 1.0, %v2169_v2  ;;  %v2019_v37 = vsel %vm263_vm6, %v2015_v51, 0.0  ;;  %vm2215_vm3 = vmor %vm2213_vm1, %vm2214_vm11 }
 0xf22   :  { %v2210_v61 = vsub.f32 1.0, %v2209_v1  ;;  %2020 = vadd.xlane.f32.xlu0 %v2019_v37 }
 0xf23   :  { %v2171_v39 = vmul.f32 %v2734_v46, %v2170_v4 }
 0xf24   :  { %v2211_v35 = vmul.f32 %v2736_v50, %v2210_v61 }
 0xf25   :  { %v2172_v18 = vadd.f32 %v2734_v46, %v2171_v39 }
 0xf26   :  { %v2212_v38 = vadd.f32 %v2736_v50, %v2211_v35  ;;  %v2428_v35 = vld [vmem:[%s4229_s7 + $0x20] sm:$0xff] }
 0xf27   :  { %v2176_v17 = vsel %vm2175_vm14, %v2734_v46, %v2172_v18  ;;  %v2426_v18 = vld [vmem:[%s4229_s7 + $0x10] sm:$0xff] }
 0xf28   :  { %v2181_v19 = vsel %vm2178_vm0, %v2180_v58, %v2176_v17  ;;  %v2216_v10 = vsel %vm2215_vm3, %v2736_v50, %v2212_v38  ;;  %v2425_v58 = vld [vmem:[%s4229_s7 + $0x8] sm:$0xff] }
 0xf29   :  { %v2182_v23 = vmul.f32 %v2181_v19, %v2157_v41  ;;  %v2221_v25 = vsel %vm2218_vm7, %v2220_v14, %v2216_v10  ;;  %v2424_v19 = vld [vmem:[%s4229_s7] sm:$0xff] }
 0xf2a   :  { %v2222_v27 = vmul.f32 %v2221_v25, %v2197_v20 }
 0xf2b   :  { %v2595_v29 = vclamps-f32 %v2182_v23, 1.0 }
 0xf2c   :  { %v2596_v21 = vclamps-f32 %v2222_v27, 1.0 }
 0xf2d   :  { %v2305_v7 = vadd.f32 1.0, %v2595_v29 }
 0xf2e   :  { %v2306_v28 = vadd.f32 1.0, %v2596_v21 }
 0xf2f   :  { %v2309_v26 = vmul.f32 %v2305_v7, %v2137_v30 }
 0xf30   :  { %v2310_v6 = vmul.f32 %v2306_v28, %v2138_v9 }
 0xf31   :  { %2363 = vmatmul.f32.vlgmr.msrb.gmra.mxu2 %v2309_v26 }
 0xf32   :  { %2385 = vmatmul.f32.vlgmr.msra.gmra.mxu3 %v2310_v6 }
 0xf95   :  { %v2021_v15 = vpop.xlane.xlu0 %2020 }
 0xf96   :  { %v2023_v53 = vmul.f32 %v2021_v15, %v3081_v48 }
 0xf98   :  { %v2025_v33 = vsub.f32 %v2015_v51, %v2023_v53 }
 0xf9a   :  { %v2027_v52 = vmul.f32 %v2025_v33, %v2025_v33 }
 0xf9c   :  { %v2031_v34 = vsel %vm263_vm6, %v2027_v52, 0.0 }
 0xf9d   :  { %2032 = vadd.xlane.f32.xlu2 %v2031_v34 }
 0xfb4   :  { %v2364_v22 = vpop.f32.mrf.mxu2 }
 0xfb5   :  { %v2365_v60 = vadd.f32 %v2364_v22, %v2346_v40  ;;  %v2386_v3 = vpop.f32.mrf.mxu3 }
 0xfb7   :  { %v2387_v45 = vadd.f32 %v2386_v3, %v2365_v60 }
 0xfb9   :  { %v2392_v47 = vmul.f32 %v2391_v42, %v2387_v45 }
 0xfbb   :  { %v2393_v32 = vadd.f32 %v2392_v47, %v3900_v0 }
 0xfbd   :  { %v2395_v49 = vrot.slane %v2393_v32, 4 }
 0xfbf   :  { %v2397_v59 = vsel %vm4234_vm8, %v2393_v32, %v2395_v49 }
 0xfc0   :  { %v2398_v44 = vsel %vm263_vm6, %v2397_v59, 0.0 }
 0xfc1   :  { %2399 = vadd.xlane.f32.xlu1 %v2398_v44 }
0x1010   :  { %v2033_v13 = vpop.xlane.xlu2 %2032 }
0x1011   :  { %v2035_v56 = vmul.f32 %v2033_v13, %v3081_v48 }
0x1013   :  { %v2037_v46 = vadd.f32 1e-06, %v2035_v56 }
0x1015   :  { %2737 = vrsqrt.f32 %v2037_v46  ;;  %vm2054_vm9 = vweird.f32 %v2037_v46 }
0x101b   :  { %v2738_v57 = vpop.eup %2737 }
0x101c   :  { %v2049_v50 = vmul.f32 %v2738_v57, %v2037_v46  ;;  %vm2055_vm2 = vweird.f32 %v2738_v57 }
0x101d   :  { %vm2056_vm4 = vmor %vm2054_vm9, %vm2055_vm2 }
0x101e   :  { %v2050_v2 = vmul.f32 %v2738_v57, %v2049_v50 }
0x1020   :  { %v2051_v51 = vmul.f32 0.5, %v2050_v2 }
0x1022   :  { %v2052_v36 = vsub.f32 1.5, %v2051_v51 }
0x1024   :  { %v2053_v1 = vmul.f32 %v2738_v57, %v2052_v36 }
0x1026   :  { %v2057_v0 = vsel %vm2056_vm4, %v2738_v57, %v2053_v1 }
0x1027   :  { %v2059_v4 = vmul.f32 %v2057_v0, %v2025_v33  ;;  %v2746_v0 = vld [vmem:[%s4224_s2] sm:$0xff] }
0x1029   :  { %v2062_v37 = vmul.f32 %v2060_v63, %v2059_v4  ;;  %v2431_v63 = vld [vmem:[%s4229_s7 + $0x38] sm:$0xff]  ;;  %v2420_v4 = vperm.slane %v2746_v0, 7 }
0x102a   :  { %2444 = vmatpush.msra.mxu0 %v2431_v63 }
0x102b   :  { %v2065_v11 = vadd.f32 %v2063_v5, %v2062_v37  ;;  %v2430_v5 = vld [vmem:[%s4229_s7 + $0x30] sm:$0xff] }
0x102c   :  { %2445 = vmatpush.msra.mxu0 %v2430_v5 }
0x102d   :  { %2592 = vmatmul.msk.f32.gmra.mxu0 %vm259_vm5, %v2065_v11  ;;  %2594 = vmatmul.msk.f32.gmra.mxu1 %vm259_vm5, %v2065_v11 }
0x102e   :  { %2446 = vmatpush.msra.mxu0 %v2429_v8 }
0x1030   :  { %2447 = vmatpush.msra.mxu0 %v2428_v35 }
0x1032   :  { %2448 = vmatpush.msra.mxu0 %v2427_v16 }
0x1034   :  { %v2400_v54 = vpop.xlane.xlu1 %2399  ;;  %2449 = vmatpush.msra.mxu0 %v2426_v18 }
0x1035   :  { %v2401_v61 = vmul.f32 %v2400_v54, %v3081_v48 }
0x1036   :  { %2450 = vmatpush.msra.mxu0 %v2425_v58 }
0x1037   :  { %v4143_v39 = vsub.f32 %v2397_v59, %v2401_v61  ;;  %v4207_v61 = vld [vmem:[%s4224_s2 + $0x10] sm:$0xff]  ;;  %s2784_s2 = smov [#allocation2]  }
0x1038   :  { %2451 = vmatpush.msra.mxu0 %v2424_v19  ;;  %s2462_s22 = sshll.u32 %s2784_s2, 4  ;;  %s2463_s22 = int_to_ptr.vmem [resolvable:$true] %s2462_s22 }
0x1039   :  { %v2403_v62 = vmul.f32 %v4143_v39, %v4143_v39 }
0x103b   :  { %v2404_v43 = vsel %vm263_vm6, %v2403_v62, 0.0  ;;  %v2422_v62 = vperm.slane %v4207_v61, 0 }
0x103c   :  { %2405 = vadd.xlane.f32.xlu0 %v2404_v43 }
0x10aa   :  { %v2111_v38 = vpop.f32.mrf.mxu0  ;;  %v2134_v41 = vpop.f32.mrf.mxu1 }
0x10ab   :  { %v4171_v17 = vadd.f32 %v2111_v38, %v2083_v31  ;;  %v4175_v14 = vadd.f32 %v2134_v41, %v2084_v12 }
0x10ad   :  { %v4181_v20 = vmul.f32 0.70710677, %v4171_v17  ;;  %v4184_v10 = vmul.f32 0.70710677, %v4175_v14 }
0x10af   :  { %v2225_v55 = vmul.f32 %v4181_v20, %v4181_v20  ;;  %v2265_v24 = vmul.f32 %v4184_v10, %v4184_v10  ;;  %v2406_v31 = vpop.xlane.xlu0 %2405 }
0x10b0   :  { %v2407_v12 = vmul.f32 %v2406_v31, %v3081_v48 }
0x10b1   :  { %v2226_v23 = vmin.f32 %v2225_v55, 16.0  ;;  %v4191_v25 = vmin.f32 %v2265_v24, 16.0 }
0x10b2   :  { %v2408_v27 = vadd.f32 1e-06, %v2407_v12 }
0x10b3   :  { %v2227_v29 = vmul.f32 2.1237322e-06, %v2226_v23  ;;  %v2267_v21 = vmul.f32 2.1237322e-06, %v4191_v25  ;;  %v2238_v30 = vmul.f32 3.8918573e-05, %v2226_v23 }
0x10b4   :  { %2739 = vrsqrt.f32 %v2408_v27  ;;  %v2278_v7 = vmul.f32 3.8918573e-05, %v4191_v25  ;;  %vm2415_vm10 = vweird.f32 %v2408_v27 }
0x10b5   :  { %v2228_v9 = vadd.f32 0.00028619796, %v2227_v29  ;;  %v2268_v28 = vadd.f32 0.00028619796, %v2267_v21  ;;  %v2239_v26 = vadd.f32 0.001143296, %v2238_v30 }
0x10b6   :  { %v2279_v6 = vadd.f32 0.001143296, %v2278_v7 }
0x10b7   :  { %v2229_v15 = vmul.f32 %v2228_v9, %v2226_v23  ;;  %v2240_v53 = vmul.f32 %v2239_v26, %v2226_v23  ;;  %v2269_v33 = vmul.f32 %v2268_v28, %v4191_v25 }
0x10b8   :  { %v2280_v48 = vmul.f32 %v2279_v6, %v4191_v25 }
0x10b9   :  { %v2241_v52 = vadd.f32 0.014752088, %v2240_v53  ;;  %v2230_v40 = vadd.f32 0.0036580483, %v2229_v15  ;;  %v2270_v42 = vadd.f32 0.0036580483, %v2269_v33 }
0x10ba   :  { %v2740_v34 = vpop.eup %2739  ;;  %v2281_v22 = vadd.f32 0.014752088, %v2280_v48 }
0x10bb   :  { %v2410_v60 = vmul.f32 %v2740_v34, %v2408_v27  ;;  %v2242_v3 = vmul.f32 %v2241_v52, %v2226_v23  ;;  %v2231_v32 = vmul.f32 %v2230_v40, %v2226_v23  ;;  %v2271_v13 = vmul.f32 %v2270_v42, %v4191_v25 }
0x10bc   :  { %v2282_v45 = vmul.f32 %v2281_v22, %v4191_v25  ;;  %vm2416_vm6 = vweird.f32 %v2740_v34 }
0x10bd   :  { %v2411_v47 = vmul.f32 %v2740_v34, %v2410_v60  ;;  %v2243_v49 = vadd.f32 0.112945676, %v2242_v3  ;;  %v2232_v50 = vadd.f32 0.05243302, %v2231_v32  ;;  %v2272_v1 = vadd.f32 0.05243302, %v2271_v13  ;;  %vm2417_vm13 = vmor %vm2415_vm10, %vm2416_vm6 }
0x10be   :  { %v2283_v59 = vadd.f32 0.112945676, %v2282_v45 }
0x10bf   :  { %v2412_v44 = vmul.f32 0.5, %v2411_v47  ;;  %v2244_v56 = vmul.f32 %v2243_v49, %v2226_v23  ;;  %v2233_v43 = vmul.f32 %v2232_v50, %v2226_v23  ;;  %v2273_v35 = vmul.f32 %v2272_v1, %v4191_v25 }
0x10c0   :  { %v2284_v46 = vmul.f32 %v2283_v59, %v4191_v25  ;;  %v2139_v47 = vmul.f32 0.5, %v4171_v17  ;;  %v2140_v49 = vmul.f32 0.5, %v4175_v14 }
0x10c1   :  { %v2413_v57 = vsub.f32 1.5, %v2412_v44  ;;  %v2245_v2 = vadd.f32 0.4994258, %v2244_v56  ;;  %v2234_v18 = vadd.f32 0.18741608, %v2233_v43 }
0x10c2   :  { %v2285_v51 = vadd.f32 0.4994258, %v2284_v46  ;;  %v2274_v38 = vadd.f32 0.18741608, %v2273_v35 }
0x10c3   :  { %v2414_v36 = vmul.f32 %v2740_v34, %v2413_v57  ;;  %v2246_v37 = vmul.f32 %v2245_v2, %v2226_v23  ;;  %v2235_v19 = vmul.f32 %v2234_v18, %v2226_v23 }
0x10c4   :  { %v2286_v11 = vmul.f32 %v2285_v51, %v4191_v25  ;;  %v2275_v31 = vmul.f32 %v2274_v38, %v4191_v25 }
0x10c5   :  { %v2418_v54 = vsel %vm2417_vm13, %v2740_v34, %v2414_v36  ;;  %v2247_v5 = vadd.f32 1.0, %v2246_v37  ;;  %v2236_v27 = vadd.f32 1.1283791, %v2235_v19 }
0x10c6   :  { %v2419_v63 = vmul.f32 %v2418_v54, %v4143_v39  ;;  %v2287_v8 = vadd.f32 1.0, %v2286_v11  ;;  %v2276_v28 = vadd.f32 1.1283791, %v2275_v31 }
0x10c7   :  { %2741 = vrcp.f32 %v2247_v5  ;;  %v2259_v29 = vand.u32 2147483648, %v2247_v5  ;;  %v2257_v7 = vand.u32 2147483647, %v2247_v5  ;;  %v2237_v25 = vmul.f32 %v2236_v27, %v4181_v20 }
0x10c8   :  { %v2421_v16 = vmul.f32 %v2420_v4, %v2419_v63  ;;  %2743 = vrcp.f32 %v2287_v8  ;;  %v2299_v9 = vand.u32 2147483648, %v2287_v8  ;;  %v2297_v6 = vand.u32 2147483647, %v2287_v8 }
0x10c9   :  { %v2260_v23 = vor.u32 1.1754944e-38, %v2259_v29  ;;  %vm2293_vm14 = vweird.f32 %v2287_v8  ;;  %vm2258_vm1 = vcmp.eq.f32.partialorder %v2257_v7, 8.507059e+37  ;;  %v2277_v52 = vmul.f32 %v2276_v28, %v4184_v10 }
0x10ca   :  { %v2423_v58 = vadd.f32 %v2422_v62, %v2421_v16  ;;  %v2300_v48 = vor.u32 1.1754944e-38, %v2299_v9  ;;  %vm2298_vm3 = vcmp.eq.f32.partialorder %v2297_v6, 8.507059e+37  ;;  %v2432_v10 = vperm.slane %v4207_v61, 1 }
0x10cc   :  { %2631 = vmatmul.msk.f32.vlgmr.msra.gmra.mxu0 %vm259_vm5, %v2423_v58  ;;  %vm2253_vm5 = vweird.f32 %v2247_v5 }
0x10cd   :  { %v2742_v41 = vpop.eup %2741 }
0x10ce   :  { %v2744_v55 = vpop.eup %2743  ;;  %v2249_v24 = vmul.f32 %v2742_v41, %v2247_v5  ;;  %vm2254_vm15 = vweird.f32 %v2742_v41 }
0x10cf   :  { %v2289_v12 = vmul.f32 %v2744_v55, %v2287_v8  ;;  %vm2294_vm11 = vweird.f32 %v2744_v55  ;;  %vm2255_vm12 = vmor %vm2253_vm5, %vm2254_vm15 }
0x10d0   :  { %v2250_v39 = vsub.f32 1.0, %v2249_v24  ;;  %vm2295_vm0 = vmor %vm2293_vm14, %vm2294_vm11 }
0x10d1   :  { %v2290_v21 = vsub.f32 1.0, %v2289_v12 }
0x10d2   :  { %v2251_v30 = vmul.f32 %v2742_v41, %v2250_v39 }
0x10d3   :  { %v2291_v26 = vmul.f32 %v2744_v55, %v2290_v21 }
0x10d4   :  { %v2252_v15 = vadd.f32 %v2742_v41, %v2251_v30 }
0x10d5   :  { %v2292_v53 = vadd.f32 %v2744_v55, %v2291_v26 }
0x10d6   :  { %v2256_v33 = vsel %vm2255_vm12, %v2742_v41, %v2252_v15 }
0x10d7   :  { %v2261_v34 = vsel %vm2258_vm1, %v2260_v23, %v2256_v33  ;;  %v2296_v40 = vsel %vm2295_vm0, %v2744_v55, %v2292_v53 }
0x10d8   :  { %v2262_v22 = vmul.f32 %v2261_v34, %v2237_v25  ;;  %v2301_v60 = vsel %vm2298_vm3, %v2300_v48, %v2296_v40 }
0x10d9   :  { %v2302_v42 = vmul.f32 %v2301_v60, %v2277_v52 }
0x10da   :  { %v2597_v3 = vclamps-f32 %v2262_v22, 1.0 }
0x10db   :  { %v2598_v45 = vclamps-f32 %v2302_v42, 1.0 }
0x10dc   :  { %v2307_v32 = vadd.f32 1.0, %v2597_v3 }
0x10dd   :  { %v2308_v20 = vadd.f32 1.0, %v2598_v45 }
0x10de   :  { %v2311_v59 = vmul.f32 %v2307_v32, %v2139_v47 }
0x10df   :  { %v2312_v44 = vmul.f32 %v2308_v20, %v2140_v49 }
0x10e0   :  { %2366 = vmatmul.f32.gmra.mxu2 %v2311_v59 }
0x10e1   :  { %2388 = vmatmul.f32.gmra.mxu3 %v2312_v44 }
0x1149   :  { %v2453_v13 = vpop.f32.mrf.mxu0 }
0x114a   :  { %v2454_v56 = vadd.f32 %v2453_v13, %v2432_v10 }
0x114c   :  { %2456 = vst [vmem:[#allocation2] sm:$0x3] %v2454_v56 }
0x114d   :  { %2467 = dma.vmem_to_hbm [thread:$0]  %s2463_s22, 32, %s2465_s16, [#allocation3]  }
0x1163   :  { %v2367_v17 = vpop.f32.mrf.mxu2 }
0x1164   :  { %v2389_v14 = vpop.f32.mrf.mxu3 }
0x1165   :  { %2772 = dma.done.wait [#allocation3], 32  }
0x1166   :  { %2773 = vsyncadd [#allocation3], 4294967264 }
0x1167   :  { %2472 = vsyncpa [#allocation3], 1 }

</bundles_post_ra>
